<compile_context>
chip_gen: v6e
topology: v6e:2x2x1
jax: 0.10.0
libtpu: 0.0.40
codegen_flags: <defaults>
</compile_context>

<pallas_src>
import functools
from dataclasses import dataclass

import jax
import jax.numpy as jnp
from jax.experimental import pallas as pl
from jax.experimental.pallas import tpu as pltpu


# ----------------------------- Config (small) -------------------------------

@dataclass
class Config:
    hidden_size: int = 32
    num_heads: int = 4
    num_layers: int = 2
    image_size: int = 16
    patch_size: int = 8
    num_channels: int = 3
    vocab_size: int = 100
    seq_len: int = 16          # max position embeddings for text
    dropout: float = 0.2       # unused at eval time


_EPS = 1e-12


# ------------------------- in-kernel math helpers ----------------------------

def _layernorm(x, g, b):
    m = jnp.mean(x, axis=-1, keepdims=True)
    v = jnp.mean((x - m) ** 2, axis=-1, keepdims=True)
    return (x - m) * jax.lax.rsqrt(v + _EPS) * g + b


def _gelu(x):
    c = jnp.float32(0.7978845608028654)   # sqrt(2/pi)
    return 0.5 * x * (1.0 + jnp.tanh(c * (x + 0.044715 * x * x * x)))


def _encoder_layers(x, w_ref, b_ref, num_layers, num_heads):
    """Run `num_layers` pre-LN transformer blocks fully in-kernel.

    x      : [S, H] float32 value (stays VMEM/vreg resident).
    w_ref  : [L, 6H, 4H] weight slab
               rows 0:H    = Wq|Wk|Wv|Wo  (lane-concatenated, each [H, H])
               rows H:2H   = W1 [H, 4H]
               rows 2H:6H  = W2 [4H, H] (lanes H:4H are zero padding)
    b_ref  : [L, 8, 4H] bias/LN slab
               rows: ln1_g, ln1_b, b_qkv(3H), b_o, ln2_g, ln2_b, b1(4H), b2
    """
    S, H = x.shape
    Dh = H // num_heads
    scale = 1.0 / float(Dh) ** 0.5

    for l in range(num_layers):
        bias = b_ref[l]                                          # [8, 4H]
        ln1_g, ln1_b = bias[0:1, :H], bias[1:2, :H]
        b_qkv, b_o = bias[2:3, :3 * H], bias[3:4, :H]
        ln2_g, ln2_b = bias[4:5, :H], bias[5:6, :H]
        b1, b2 = bias[6:7, :], bias[7:8, :H]

        # --- attention: fused QKV matmul, per-head softmax, fused out-proj ---
        h = _layernorm(x, ln1_g, ln1_b)
        qkv = jnp.dot(h, w_ref[l, :H, :3 * H],
                      preferred_element_type=jnp.float32) + b_qkv        # [S, 3H]
        ctx = []
        for hd in range(num_heads):
            q = qkv[:, hd * Dh:(hd + 1) * Dh]
            k = qkv[:, H + hd * Dh:H + (hd + 1) * Dh]
            v = qkv[:, 2 * H + hd * Dh:2 * H + (hd + 1) * Dh]
            s = jax.lax.dot_general(q, k, (((1,), (1,)), ((), ())),
                                    preferred_element_type=jnp.float32) * scale
            s = s - jnp.max(s, axis=-1, keepdims=True)
            e = jnp.exp(s)
            p = e * pl.reciprocal(jnp.sum(e, axis=-1, keepdims=True),
                                  approx=True)
            ctx.append(jnp.dot(p, v, preferred_element_type=jnp.float32))  # [S,Dh]
        ctx = jnp.concatenate(ctx, axis=-1)                               # [S, H]
        attn = jnp.dot(ctx, w_ref[l, :H, 3 * H:],
                       preferred_element_type=jnp.float32) + b_o
        x = x + attn

        # --- MLP sub-block ---
        h = _layernorm(x, ln2_g, ln2_b)
        h = jnp.dot(h, w_ref[l, H:2 * H, :],
                    preferred_element_type=jnp.float32) + b1              # [S, 4H]
        h = _gelu(h)
        h = jnp.dot(h, w_ref[l, 2 * H:, :H],
                    preferred_element_type=jnp.float32) + b2              # [S, H]
        x = x + h
    return x


# ------------------------------ fused kernel ---------------------------------

def _flava_kernel(ids_ref,                       # SMEM [B, L_text] int32 (prefetch)
                  patches_ref,                   # [1, S_img, C*P*P]
                  img_pw_ref, img_bias_ref, w_img_ref, b_img_ref, head_img_ref,
                  word_emb_ref, txt_emb_ref, w_txt_ref, b_txt_ref, head_txt_ref,
                  w_mm_ref, b_mm_ref, head_mm_ref,
                  out_ref,                       # [1, 1 + S_img + L_text, H]
                  *, num_layers, mm_layers, num_heads, L_text, hidden):
    H = hidden
    b = pl.program_id(0)

    # -------- image encoder + image->mm projection --------
    x = jnp.dot(patches_ref[0], img_pw_ref[...],
                preferred_element_type=jnp.float32) + img_bias_ref[...]
    x = _encoder_layers(x, w_img_ref, b_img_ref, num_layers, num_heads)
    x = _layernorm(x, head_img_ref[H + 1:H + 2, :], head_img_ref[H + 2:H + 3, :])
    img_h = jnp.dot(x, head_img_ref[:H, :],
                    preferred_element_type=jnp.float32) + head_img_ref[H:H + 1, :]

    # -------- text encoder + text->mm projection --------
    # in-kernel embedding gather: token ids come from SMEM (scalar prefetch),
    # word_emb is VMEM-resident [vocab, 1, H]
    rows = [word_emb_ref[ids_ref[b, j]] for j in range(L_text)]    # each [1, H]
    t = jnp.concatenate(rows, axis=0) + txt_emb_ref[:L_text, :]
    t = _layernorm(t, txt_emb_ref[L_text:L_text + 1, :],
                   txt_emb_ref[L_text + 1:L_text + 2, :])          # embedding LN
    t = _encoder_layers(t, w_txt_ref, b_txt_ref, num_layers, num_heads)
    t = _layernorm(t, head_txt_ref[H + 1:H + 2, :], head_txt_ref[H + 2:H + 3, :])
    txt_h = jnp.dot(t, head_txt_ref[:H, :],
                    preferred_element_type=jnp.float32) + head_txt_ref[H:H + 1, :]

    # -------- multimodal fusion encoder --------
    fused = jnp.concatenate([head_mm_ref[2:3, :], img_h, txt_h], axis=0)
    fused = _encoder_layers(fused, w_mm_ref, b_mm_ref, mm_layers, num_heads)
    fused = _layernorm(fused, head_mm_ref[0:1, :], head_mm_ref[1:2, :])
    out_ref[0] = fused.astype(out_ref.dtype)


# ------------------------------- Parameters -----------------------------------

def init_params(key, cfg: Config):
    H, P, C = cfg.hidden_size, cfg.patch_size, cfg.num_channels
    L, Lmm = cfg.num_layers, max(cfg.num_layers // 2, 1)
    n_patch = (cfg.image_size // P) ** 2

    keys = iter(jax.random.split(key, 32))
    nk = lambda: next(keys)
    d = lambda shape: 0.02 * jax.random.normal(nk(), shape, jnp.float32)

    def stack_slabs(nl):
        wq, wk, wv, wo = d((nl, H, H)), d((nl, H, H)), d((nl, H, H)), d((nl, H, H))
        w1 = d((nl, H, 4 * H))
        w2 = d((nl, 4 * H, H))
        w_slab = jnp.concatenate(
            [jnp.concatenate([wq, wk, wv, wo], axis=-1),                # [nl,H,4H]
             w1,                                                         # [nl,H,4H]
             jnp.pad(w2, ((0, 0), (0, 0), (0, 3 * H)))], axis=1)         # [nl,4H,4H]
        one_row = jnp.pad(jnp.ones((nl, 1, H), jnp.float32),
                          ((0, 0), (0, 0), (0, 3 * H)))
        zero_row = jnp.zeros((nl, 1, 4 * H), jnp.float32)
        # rows: ln1_g, ln1_b, b_qkv, b_o, ln2_g, ln2_b, b1, b2   (biases zero-init)
        b_slab = jnp.concatenate(
            [one_row, zero_row, zero_row, zero_row,
             one_row, zero_row, zero_row, zero_row], axis=1)             # [nl,8,4H]
        return w_slab, b_slab

    def proj_head():
        # rows 0:H proj_w, H proj_b, H+1 final-LN gamma, H+2 final-LN beta
        return jnp.concatenate(
            [d((H, H)), jnp.zeros((1, H), jnp.float32),
             jnp.ones((1, H), jnp.float32), jnp.zeros((1, H), jnp.float32)],
            axis=0)

    w_img, b_img = stack_slabs(L)
    w_txt, b_txt = stack_slabs(L)
    w_mm, b_mm = stack_slabs(Lmm)

    cls = d((1, H))
    pos = d((n_patch + 1, H))
    patch_b = jnp.zeros((H,), jnp.float32)
    # row 0: CLS + pos[0]; rows 1..: pos + patch-embedding bias  -> [S_img, H]
    img_emb_bias = jnp.concatenate([cls + pos[:1], pos[1:] + patch_b[None, :]],
                                   axis=0)

    # rows: final-LN gamma, final-LN beta, mm CLS token
    mm_head = jnp.concatenate(
        [jnp.ones((1, H), jnp.float32), jnp.zeros((1, H), jnp.float32),
         d((1, H))], axis=0)

    return {
        "img_patch_w": d((C * P * P, H)),
        "img_emb_bias": img_emb_bias,
        "w_img": w_img, "b_img": b_img, "head_img": proj_head(),
        "word_emb": d((cfg.vocab_size, 1, H)),     # [vocab, 1, H] for in-kernel gather
        "txt_pos_emb": d((cfg.seq_len, H)),
        "txt_type_emb": d((2, H)),
        "w_txt": w_txt, "b_txt": b_txt, "head_txt": proj_head(),
        "w_mm": w_mm, "b_mm": b_mm, "head_mm": mm_head,
    }


# ------------------------------ FLAVA forward ----------------------------------

def flava_forward(params, image, text, cfg: Config):
    H, P, nh = cfg.hidden_size, cfg.patch_size, cfg.num_heads
    mm_layers = max(cfg.num_layers // 2, 1)

    # patch extraction (layout only; the patch-embedding matmul runs in-kernel)
    N, C, Hi, Wi = image.shape
    gh, gw = Hi // P, Wi // P
    CPP = C * P * P
    patches = (image.reshape(N, C, gh, P, gw, P)
                    .transpose(0, 2, 4, 1, 3, 5)
                    .reshape(N, gh * gw, CPP))
    # row 0 is zeros -> CLS slot (CLS/pos/patch-bias folded into img_emb_bias)
    patches = jnp.concatenate(
        [jnp.zeros((N, 1, CPP), patches.dtype), patches], axis=1)
    S_img = patches.shape[1]

    L_text = text.shape[1]
    # rows 0:L = pos+type additive embedding, row L = emb-LN gamma, L+1 = beta
    txt_emb = jnp.concatenate(
        [params["txt_pos_emb"][:L_text] + params["txt_type_emb"][0:1],
         jnp.ones((1, H), jnp.float32), jnp.zeros((1, H), jnp.float32)], axis=0)

    consts = (params["img_patch_w"], params["img_emb_bias"],
              params["w_img"], params["b_img"], params["head_img"],
              params["word_emb"], txt_emb,
              params["w_txt"], params["b_txt"], params["head_txt"],
              params["w_mm"], params["b_mm"], params["head_mm"])

    S_total = 1 + S_img + L_text

    def batched_spec(shape):
        nd = len(shape)
        return pl.BlockSpec((1,) + tuple(shape[1:]),
                            lambda b, ids, _nd=nd: (b,) + (0,) * (_nd - 1))

    def const_spec(shape):
        nd = len(shape)
        return pl.BlockSpec(tuple(shape), lambda b, ids, _nd=nd: (0,) * _nd)

    kernel = functools.partial(
        _flava_kernel, num_layers=cfg.num_layers, mm_layers=mm_layers,
        num_heads=nh, L_text=L_text, hidden=H)

    return pl.pallas_call(
        kernel,
        out_shape=jax.ShapeDtypeStruct((N, S_total, H), jnp.float32),
        grid_spec=pltpu.PrefetchScalarGridSpec(
            num_scalar_prefetch=1,                       # text ids -> SMEM
            grid=(N,),
            in_specs=[batched_spec(patches.shape)]
                     + [const_spec(a.shape) for a in consts],
            out_specs=batched_spec((N, S_total, H)),
        ),
        compiler_params=pltpu.CompilerParams(
            dimension_semantics=("parallel",)),          # v7x: 2 TCs split batch
    )(text.astype(jnp.int32), patches, *consts)


# ----------------------------------- main ---------------------------------------

if __name__ == "__main__":
    cfg = Config()
    key = jax.random.PRNGKey(0)
    k_param, k_img, k_txt = jax.random.split(key, 3)

    params = init_params(k_param, cfg)

    B, L_text = 2, 8
    image = jax.random.normal(
        k_img, (B, cfg.num_channels, cfg.image_size, cfg.image_size), jnp.float32)
    text = jax.random.randint(k_txt, (B, L_text), 1, cfg.vocab_size, jnp.int32)

    fwd = jax.jit(functools.partial(flava_forward, cfg=cfg))
    out = fwd(params, image, text)
    jax.block_until_ready(out)

    n_img_tokens = (cfg.image_size // cfg.patch_size) ** 2 + 1   # patches + img CLS
    expected = (B, 1 + n_img_tokens + L_text, cfg.hidden_size)    # + mm CLS token
    assert out.shape == expected, (out.shape, expected)
    assert bool(jnp.all(jnp.isfinite(out)))
    print("KERNEL_OK")
</pallas_src>

<mosaic_0001>
module attributes {stable_mosaic.version = 11 : i64} {
  func.func @_flava_kernel(%arg0: i32, %arg1: memref<2x8xi32, #tpu.memory_space<smem>>, %arg2: memref<1x5x192xf32, #tpu.memory_space<vmem>>, %arg3: memref<192x32xf32, #tpu.memory_space<vmem>>, %arg4: memref<5x32xf32, #tpu.memory_space<vmem>>, %arg5: memref<2x192x128xf32, #tpu.memory_space<vmem>>, %arg6: memref<2x8x128xf32, #tpu.memory_space<vmem>>, %arg7: memref<35x32xf32, #tpu.memory_space<vmem>>, %arg8: memref<100x1x32xf32, #tpu.memory_space<vmem>>, %arg9: memref<10x32xf32, #tpu.memory_space<vmem>>, %arg10: memref<2x192x128xf32, #tpu.memory_space<vmem>>, %arg11: memref<2x8x128xf32, #tpu.memory_space<vmem>>, %arg12: memref<35x32xf32, #tpu.memory_space<vmem>>, %arg13: memref<1x192x128xf32, #tpu.memory_space<vmem>>, %arg14: memref<1x8x128xf32, #tpu.memory_space<vmem>>, %arg15: memref<3x32xf32, #tpu.memory_space<vmem>>, %arg16: memref<1x14x32xf32, #tpu.memory_space<vmem>>) attributes {dimension_semantics = [#tpu.dimension_semantics<parallel>], iteration_bounds = array<i64: 2>, scalar_prefetch = 1 : i64, scratch_operands = 0 : i64, tpu.core_type = #tpu.core_type<tc>, window_params = [{transform_indices = @transform_0, window_bounds = array<i64: 1, 5, 192>}, {pipeline_mode = #tpu.pipeline_mode<synchronous>, transform_indices = @transform_1, window_bounds = array<i64: 192, 32>}, {pipeline_mode = #tpu.pipeline_mode<synchronous>, transform_indices = @transform_2, window_bounds = array<i64: 5, 32>}, {pipeline_mode = #tpu.pipeline_mode<synchronous>, transform_indices = @transform_3, window_bounds = array<i64: 2, 192, 128>}, {pipeline_mode = #tpu.pipeline_mode<synchronous>, transform_indices = @transform_4, window_bounds = array<i64: 2, 8, 128>}, {pipeline_mode = #tpu.pipeline_mode<synchronous>, transform_indices = @transform_5, window_bounds = array<i64: 35, 32>}, {pipeline_mode = #tpu.pipeline_mode<synchronous>, transform_indices = @transform_6, window_bounds = array<i64: 100, 1, 32>}, {pipeline_mode = #tpu.pipeline_mode<synchronous>, transform_indices = @transform_7, window_bounds = array<i64: 10, 32>}, {pipeline_mode = #tpu.pipeline_mode<synchronous>, transform_indices = @transform_8, window_bounds = array<i64: 2, 192, 128>}, {pipeline_mode = #tpu.pipeline_mode<synchronous>, transform_indices = @transform_9, window_bounds = array<i64: 2, 8, 128>}, {pipeline_mode = #tpu.pipeline_mode<synchronous>, transform_indices = @transform_10, window_bounds = array<i64: 35, 32>}, {pipeline_mode = #tpu.pipeline_mode<synchronous>, transform_indices = @transform_11, window_bounds = array<i64: 1, 192, 128>}, {pipeline_mode = #tpu.pipeline_mode<synchronous>, transform_indices = @transform_12, window_bounds = array<i64: 1, 8, 128>}, {pipeline_mode = #tpu.pipeline_mode<synchronous>, transform_indices = @transform_13, window_bounds = array<i64: 3, 32>}, {transform_indices = @transform_14, window_bounds = array<i64: 1, 14, 32>}]} {
    %c0 = arith.constant 0 : index
    %c0_0 = arith.constant 0 : index
    %c0_1 = arith.constant 0 : index
    %0 = vector.load %arg2[%c0, %c0_0, %c0_1] : memref<1x5x192xf32, #tpu.memory_space<vmem>>, vector<1x5x192xf32>
    %1 = vector.shape_cast %0 : vector<1x5x192xf32> to vector<5x192xf32>
    %c0_2 = arith.constant 0 : index
    %c0_3 = arith.constant 0 : index
    %2 = vector.load %arg3[%c0_2, %c0_3] : memref<192x32xf32, #tpu.memory_space<vmem>>, vector<192x32xf32>
    %cst = arith.constant dense<0.000000e+00> : vector<5x32xf32>
    %3 = tpu.matmul %1, %2, %cst {dimension_numbers = #tpu.dot_dimension_numbers<[1], [0], [0], [1], [0, 0, 1, 1], [], []>} : vector<5x192xf32>, vector<192x32xf32>, vector<5x32xf32> -> vector<5x32xf32>
    %c0_4 = arith.constant 0 : index
    %c0_5 = arith.constant 0 : index
    %4 = vector.load %arg4[%c0_4, %c0_5] : memref<5x32xf32, #tpu.memory_space<vmem>>, vector<5x32xf32>
    %5 = arith.addf %3, %4 : vector<5x32xf32>
    %c0_6 = arith.constant 0 : index
    %c0_7 = arith.constant 0 : index
    %c0_8 = arith.constant 0 : index
    %6 = vector.load %arg6[%c0_6, %c0_7, %c0_8] : memref<2x8x128xf32, #tpu.memory_space<vmem>>, vector<1x8x128xf32>
    %7 = vector.shape_cast %6 : vector<1x8x128xf32> to vector<8x128xf32>
    %8 = vector.extract_strided_slice %7 {offsets = [0, 0], sizes = [1, 32], strides = [1, 1]} : vector<8x128xf32> to vector<1x32xf32>
    %9 = vector.extract_strided_slice %7 {offsets = [1, 0], sizes = [1, 32], strides = [1, 1]} : vector<8x128xf32> to vector<1x32xf32>
    %10 = vector.extract_strided_slice %7 {offsets = [2, 0], sizes = [1, 96], strides = [1, 1]} : vector<8x128xf32> to vector<1x96xf32>
    %11 = vector.extract_strided_slice %7 {offsets = [3, 0], sizes = [1, 32], strides = [1, 1]} : vector<8x128xf32> to vector<1x32xf32>
    %12 = vector.extract_strided_slice %7 {offsets = [4, 0], sizes = [1, 32], strides = [1, 1]} : vector<8x128xf32> to vector<1x32xf32>
    %13 = vector.extract_strided_slice %7 {offsets = [5, 0], sizes = [1, 32], strides = [1, 1]} : vector<8x128xf32> to vector<1x32xf32>
    %14 = vector.extract_strided_slice %7 {offsets = [6, 0], sizes = [1, 128], strides = [1, 1]} : vector<8x128xf32> to vector<1x128xf32>
    %15 = vector.extract_strided_slice %7 {offsets = [7, 0], sizes = [1, 32], strides = [1, 1]} : vector<8x128xf32> to vector<1x32xf32>
    %cst_9 = arith.constant dense<0.000000e+00> : vector<5xf32>
    %16 = vector.multi_reduction <add>, %5, %cst_9 [1] : vector<5x32xf32> to vector<5xf32>
    %17 = vector.shape_cast %16 : vector<5xf32> to vector<5x1xf32>
    %cst_10 = arith.constant 3.200000e+01 : f32
    %18 = vector.broadcast %cst_10 : f32 to vector<5x1xf32>
    %19 = arith.divf %17, %18 : vector<5x1xf32>
    %20 = vector.broadcast %19 : vector<5x1xf32> to vector<5x32xf32>
    %21 = arith.subf %5, %20 : vector<5x32xf32>
    %22 = arith.mulf %21, %21 : vector<5x32xf32>
    %cst_11 = arith.constant dense<0.000000e+00> : vector<5xf32>
    %23 = vector.multi_reduction <add>, %22, %cst_11 [1] : vector<5x32xf32> to vector<5xf32>
    %24 = vector.shape_cast %23 : vector<5xf32> to vector<5x1xf32>
    %cst_12 = arith.constant 3.200000e+01 : f32
    %25 = vector.broadcast %cst_12 : f32 to vector<5x1xf32>
    %26 = arith.divf %24, %25 : vector<5x1xf32>
    %27 = vector.broadcast %19 : vector<5x1xf32> to vector<5x32xf32>
    %28 = arith.subf %5, %27 : vector<5x32xf32>
    %cst_13 = arith.constant 9.99999996E-13 : f32
    %29 = vector.broadcast %cst_13 : f32 to vector<5x1xf32>
    %30 = arith.addf %26, %29 : vector<5x1xf32>
    %31 = math.rsqrt %30 : vector<5x1xf32>
    %32 = vector.broadcast %31 : vector<5x1xf32> to vector<5x32xf32>
    %33 = arith.mulf %28, %32 : vector<5x32xf32>
    %34 = vector.broadcast %8 : vector<1x32xf32> to vector<5x32xf32>
    %35 = arith.mulf %33, %34 : vector<5x32xf32>
    %36 = vector.broadcast %9 : vector<1x32xf32> to vector<5x32xf32>
    %37 = arith.addf %35, %36 : vector<5x32xf32>
    %c0_14 = arith.constant 0 : index
    %c0_15 = arith.constant 0 : index
    %c0_16 = arith.constant 0 : index
    %38 = vector.load %arg5[%c0_14, %c0_15, %c0_16] : memref<2x192x128xf32, #tpu.memory_space<vmem>>, vector<1x32x96xf32>
    %39 = vector.shape_cast %38 : vector<1x32x96xf32> to vector<32x96xf32>
    %cst_17 = arith.constant dense<0.000000e+00> : vector<5x96xf32>
    %40 = tpu.matmul %37, %39, %cst_17 {dimension_numbers = #tpu.dot_dimension_numbers<[1], [0], [0], [1], [0, 0, 1, 1], [], []>} : vector<5x32xf32>, vector<32x96xf32>, vector<5x96xf32> -> vector<5x96xf32>
    %41 = vector.broadcast %10 : vector<1x96xf32> to vector<5x96xf32>
    %42 = arith.addf %40, %41 : vector<5x96xf32>
    %43 = vector.extract_strided_slice %42 {offsets = [0, 0], sizes = [5, 8], strides = [1, 1]} : vector<5x96xf32> to vector<5x8xf32>
    %44 = vector.extract_strided_slice %42 {offsets = [0, 32], sizes = [5, 8], strides = [1, 1]} : vector<5x96xf32> to vector<5x8xf32>
    %45 = vector.extract_strided_slice %42 {offsets = [0, 64], sizes = [5, 8], strides = [1, 1]} : vector<5x96xf32> to vector<5x8xf32>
    %cst_18 = arith.constant dense<0.000000e+00> : vector<5x5xf32>
    %46 = tpu.matmul %43, %44, %cst_18 {dimension_numbers = #tpu.dot_dimension_numbers<[1], [1], [0], [0], [0, 0, 1, 0], [], []>} : vector<5x8xf32>, vector<5x8xf32>, vector<5x5xf32> -> vector<5x5xf32>
    %cst_19 = arith.constant 0.353553385 : f32
    %47 = vector.broadcast %cst_19 : f32 to vector<5x5xf32>
    %48 = arith.mulf %46, %47 : vector<5x5xf32>
    %cst_20 = arith.constant dense<0xFF800000> : vector<5xf32>
    %49 = vector.multi_reduction <maximumf>, %48, %cst_20 [1] : vector<5x5xf32> to vector<5xf32>
    %50 = vector.shape_cast %49 : vector<5xf32> to vector<5x1xf32>
    %51 = vector.broadcast %50 : vector<5x1xf32> to vector<5x5xf32>
    %52 = arith.subf %48, %51 : vector<5x5xf32>
    %53 = math.exp %52 : vector<5x5xf32>
    %cst_21 = arith.constant dense<0.000000e+00> : vector<5xf32>
    %54 = vector.multi_reduction <add>, %53, %cst_21 [1] : vector<5x5xf32> to vector<5xf32>
    %55 = vector.shape_cast %54 : vector<5xf32> to vector<5x1xf32>
    %56 = tpu.reciprocal %55 {approx = true} : vector<5x1xf32> -> vector<5x1xf32>
    %57 = vector.broadcast %56 : vector<5x1xf32> to vector<5x5xf32>
    %58 = arith.mulf %53, %57 : vector<5x5xf32>
    %cst_22 = arith.constant dense<0.000000e+00> : vector<5x8xf32>
    %59 = tpu.matmul %58, %45, %cst_22 {dimension_numbers = #tpu.dot_dimension_numbers<[1], [0], [0], [1], [0, 0, 1, 1], [], []>} : vector<5x5xf32>, vector<5x8xf32>, vector<5x8xf32> -> vector<5x8xf32>
    %60 = vector.extract_strided_slice %42 {offsets = [0, 8], sizes = [5, 8], strides = [1, 1]} : vector<5x96xf32> to vector<5x8xf32>
    %61 = vector.extract_strided_slice %42 {offsets = [0, 40], sizes = [5, 8], strides = [1, 1]} : vector<5x96xf32> to vector<5x8xf32>
    %62 = vector.extract_strided_slice %42 {offsets = [0, 72], sizes = [5, 8], strides = [1, 1]} : vector<5x96xf32> to vector<5x8xf32>
    %cst_23 = arith.constant dense<0.000000e+00> : vector<5x5xf32>
    %63 = tpu.matmul %60, %61, %cst_23 {dimension_numbers = #tpu.dot_dimension_numbers<[1], [1], [0], [0], [0, 0, 1, 0], [], []>} : vector<5x8xf32>, vector<5x8xf32>, vector<5x5xf32> -> vector<5x5xf32>
    %cst_24 = arith.constant 0.353553385 : f32
    %64 = vector.broadcast %cst_24 : f32 to vector<5x5xf32>
    %65 = arith.mulf %63, %64 : vector<5x5xf32>
    %cst_25 = arith.constant dense<0xFF800000> : vector<5xf32>
    %66 = vector.multi_reduction <maximumf>, %65, %cst_25 [1] : vector<5x5xf32> to vector<5xf32>
    %67 = vector.shape_cast %66 : vector<5xf32> to vector<5x1xf32>
    %68 = vector.broadcast %67 : vector<5x1xf32> to vector<5x5xf32>
    %69 = arith.subf %65, %68 : vector<5x5xf32>
    %70 = math.exp %69 : vector<5x5xf32>
    %cst_26 = arith.constant dense<0.000000e+00> : vector<5xf32>
    %71 = vector.multi_reduction <add>, %70, %cst_26 [1] : vector<5x5xf32> to vector<5xf32>
    %72 = vector.shape_cast %71 : vector<5xf32> to vector<5x1xf32>
    %73 = tpu.reciprocal %72 {approx = true} : vector<5x1xf32> -> vector<5x1xf32>
    %74 = vector.broadcast %73 : vector<5x1xf32> to vector<5x5xf32>
    %75 = arith.mulf %70, %74 : vector<5x5xf32>
    %cst_27 = arith.constant dense<0.000000e+00> : vector<5x8xf32>
    %76 = tpu.matmul %75, %62, %cst_27 {dimension_numbers = #tpu.dot_dimension_numbers<[1], [0], [0], [1], [0, 0, 1, 1], [], []>} : vector<5x5xf32>, vector<5x8xf32>, vector<5x8xf32> -> vector<5x8xf32>
    %77 = vector.extract_strided_slice %42 {offsets = [0, 16], sizes = [5, 8], strides = [1, 1]} : vector<5x96xf32> to vector<5x8xf32>
    %78 = vector.extract_strided_slice %42 {offsets = [0, 48], sizes = [5, 8], strides = [1, 1]} : vector<5x96xf32> to vector<5x8xf32>
    %79 = vector.extract_strided_slice %42 {offsets = [0, 80], sizes = [5, 8], strides = [1, 1]} : vector<5x96xf32> to vector<5x8xf32>
    %cst_28 = arith.constant dense<0.000000e+00> : vector<5x5xf32>
    %80 = tpu.matmul %77, %78, %cst_28 {dimension_numbers = #tpu.dot_dimension_numbers<[1], [1], [0], [0], [0, 0, 1, 0], [], []>} : vector<5x8xf32>, vector<5x8xf32>, vector<5x5xf32> -> vector<5x5xf32>
    %cst_29 = arith.constant 0.353553385 : f32
    %81 = vector.broadcast %cst_29 : f32 to vector<5x5xf32>
    %82 = arith.mulf %80, %81 : vector<5x5xf32>
    %cst_30 = arith.constant dense<0xFF800000> : vector<5xf32>
    %83 = vector.multi_reduction <maximumf>, %82, %cst_30 [1] : vector<5x5xf32> to vector<5xf32>
    %84 = vector.shape_cast %83 : vector<5xf32> to vector<5x1xf32>
    %85 = vector.broadcast %84 : vector<5x1xf32> to vector<5x5xf32>
    %86 = arith.subf %82, %85 : vector<5x5xf32>
    %87 = math.exp %86 : vector<5x5xf32>
    %cst_31 = arith.constant dense<0.000000e+00> : vector<5xf32>
    %88 = vector.multi_reduction <add>, %87, %cst_31 [1] : vector<5x5xf32> to vector<5xf32>
    %89 = vector.shape_cast %88 : vector<5xf32> to vector<5x1xf32>
    %90 = tpu.reciprocal %89 {approx = true} : vector<5x1xf32> -> vector<5x1xf32>
    %91 = vector.broadcast %90 : vector<5x1xf32> to vector<5x5xf32>
    %92 = arith.mulf %87, %91 : vector<5x5xf32>
    %cst_32 = arith.constant dense<0.000000e+00> : vector<5x8xf32>
    %93 = tpu.matmul %92, %79, %cst_32 {dimension_numbers = #tpu.dot_dimension_numbers<[1], [0], [0], [1], [0, 0, 1, 1], [], []>} : vector<5x5xf32>, vector<5x8xf32>, vector<5x8xf32> -> vector<5x8xf32>
    %94 = vector.extract_strided_slice %42 {offsets = [0, 24], sizes = [5, 8], strides = [1, 1]} : vector<5x96xf32> to vector<5x8xf32>
    %95 = vector.extract_strided_slice %42 {offsets = [0, 56], sizes = [5, 8], strides = [1, 1]} : vector<5x96xf32> to vector<5x8xf32>
    %96 = vector.extract_strided_slice %42 {offsets = [0, 88], sizes = [5, 8], strides = [1, 1]} : vector<5x96xf32> to vector<5x8xf32>
    %cst_33 = arith.constant dense<0.000000e+00> : vector<5x5xf32>
    %97 = tpu.matmul %94, %95, %cst_33 {dimension_numbers = #tpu.dot_dimension_numbers<[1], [1], [0], [0], [0, 0, 1, 0], [], []>} : vector<5x8xf32>, vector<5x8xf32>, vector<5x5xf32> -> vector<5x5xf32>
    %cst_34 = arith.constant 0.353553385 : f32
    %98 = vector.broadcast %cst_34 : f32 to vector<5x5xf32>
    %99 = arith.mulf %97, %98 : vector<5x5xf32>
    %cst_35 = arith.constant dense<0xFF800000> : vector<5xf32>
    %100 = vector.multi_reduction <maximumf>, %99, %cst_35 [1] : vector<5x5xf32> to vector<5xf32>
    %101 = vector.shape_cast %100 : vector<5xf32> to vector<5x1xf32>
    %102 = vector.broadcast %101 : vector<5x1xf32> to vector<5x5xf32>
    %103 = arith.subf %99, %102 : vector<5x5xf32>
    %104 = math.exp %103 : vector<5x5xf32>
    %cst_36 = arith.constant dense<0.000000e+00> : vector<5xf32>
    %105 = vector.multi_reduction <add>, %104, %cst_36 [1] : vector<5x5xf32> to vector<5xf32>
    %106 = vector.shape_cast %105 : vector<5xf32> to vector<5x1xf32>
    %107 = tpu.reciprocal %106 {approx = true} : vector<5x1xf32> -> vector<5x1xf32>
    %108 = vector.broadcast %107 : vector<5x1xf32> to vector<5x5xf32>
    %109 = arith.mulf %104, %108 : vector<5x5xf32>
    %cst_37 = arith.constant dense<0.000000e+00> : vector<5x8xf32>
    %110 = tpu.matmul %109, %96, %cst_37 {dimension_numbers = #tpu.dot_dimension_numbers<[1], [0], [0], [1], [0, 0, 1, 1], [], []>} : vector<5x5xf32>, vector<5x8xf32>, vector<5x8xf32> -> vector<5x8xf32>
    %111 = tpu.concatenate %59, %76, %93, %110 in 1 : vector<5x8xf32>, vector<5x8xf32>, vector<5x8xf32>, vector<5x8xf32> -> vector<5x32xf32>
    %c0_38 = arith.constant 0 : index
    %c0_39 = arith.constant 0 : index
    %c96 = arith.constant 96 : index
    %112 = vector.load %arg5[%c0_38, %c0_39, %c96] : memref<2x192x128xf32, #tpu.memory_space<vmem>>, vector<1x32x32xf32>
    %113 = vector.shape_cast %112 : vector<1x32x32xf32> to vector<32x32xf32>
    %cst_40 = arith.constant dense<0.000000e+00> : vector<5x32xf32>
    %114 = tpu.matmul %111, %113, %cst_40 {dimension_numbers = #tpu.dot_dimension_numbers<[1], [0], [0], [1], [0, 0, 1, 1], [], []>} : vector<5x32xf32>, vector<32x32xf32>, vector<5x32xf32> -> vector<5x32xf32>
    %115 = vector.broadcast %11 : vector<1x32xf32> to vector<5x32xf32>
    %116 = arith.addf %114, %115 : vector<5x32xf32>
    %117 = arith.addf %5, %116 : vector<5x32xf32>
    %cst_41 = arith.constant dense<0.000000e+00> : vector<5xf32>
    %118 = vector.multi_reduction <add>, %117, %cst_41 [1] : vector<5x32xf32> to vector<5xf32>
    %119 = vector.shape_cast %118 : vector<5xf32> to vector<5x1xf32>
    %cst_42 = arith.constant 3.200000e+01 : f32
    %120 = vector.broadcast %cst_42 : f32 to vector<5x1xf32>
    %121 = arith.divf %119, %120 : vector<5x1xf32>
    %122 = vector.broadcast %121 : vector<5x1xf32> to vector<5x32xf32>
    %123 = arith.subf %117, %122 : vector<5x32xf32>
    %124 = arith.mulf %123, %123 : vector<5x32xf32>
    %cst_43 = arith.constant dense<0.000000e+00> : vector<5xf32>
    %125 = vector.multi_reduction <add>, %124, %cst_43 [1] : vector<5x32xf32> to vector<5xf32>
    %126 = vector.shape_cast %125 : vector<5xf32> to vector<5x1xf32>
    %cst_44 = arith.constant 3.200000e+01 : f32
    %127 = vector.broadcast %cst_44 : f32 to vector<5x1xf32>
    %128 = arith.divf %126, %127 : vector<5x1xf32>
    %129 = vector.broadcast %121 : vector<5x1xf32> to vector<5x32xf32>
    %130 = arith.subf %117, %129 : vector<5x32xf32>
    %cst_45 = arith.constant 9.99999996E-13 : f32
    %131 = vector.broadcast %cst_45 : f32 to vector<5x1xf32>
    %132 = arith.addf %128, %131 : vector<5x1xf32>
    %133 = math.rsqrt %132 : vector<5x1xf32>
    %134 = vector.broadcast %133 : vector<5x1xf32> to vector<5x32xf32>
    %135 = arith.mulf %130, %134 : vector<5x32xf32>
    %136 = vector.broadcast %12 : vector<1x32xf32> to vector<5x32xf32>
    %137 = arith.mulf %135, %136 : vector<5x32xf32>
    %138 = vector.broadcast %13 : vector<1x32xf32> to vector<5x32xf32>
    %139 = arith.addf %137, %138 : vector<5x32xf32>
    %c0_46 = arith.constant 0 : index
    %c32 = arith.constant 32 : index
    %c0_47 = arith.constant 0 : index
    %140 = vector.load %arg5[%c0_46, %c32, %c0_47] : memref<2x192x128xf32, #tpu.memory_space<vmem>>, vector<1x32x128xf32>
    %141 = vector.shape_cast %140 : vector<1x32x128xf32> to vector<32x128xf32>
    %cst_48 = arith.constant dense<0.000000e+00> : vector<5x128xf32>
    %142 = tpu.matmul %139, %141, %cst_48 {dimension_numbers = #tpu.dot_dimension_numbers<[1], [0], [0], [1], [0, 0, 1, 1], [], []>} : vector<5x32xf32>, vector<32x128xf32>, vector<5x128xf32> -> vector<5x128xf32>
    %143 = vector.broadcast %14 : vector<1x128xf32> to vector<5x128xf32>
    %144 = arith.addf %142, %143 : vector<5x128xf32>
    %cst_49 = arith.constant 5.000000e-01 : f32
    %145 = vector.broadcast %cst_49 : f32 to vector<5x128xf32>
    %146 = arith.mulf %145, %144 : vector<5x128xf32>
    %cst_50 = arith.constant 4.471500e-02 : f32
    %147 = vector.broadcast %cst_50 : f32 to vector<5x128xf32>
    %148 = arith.mulf %147, %144 : vector<5x128xf32>
    %149 = arith.mulf %148, %144 : vector<5x128xf32>
    %150 = arith.mulf %149, %144 : vector<5x128xf32>
    %151 = arith.addf %144, %150 : vector<5x128xf32>
    %cst_51 = arith.constant 0.797884583 : f32
    %152 = vector.broadcast %cst_51 : f32 to vector<5x128xf32>
    %153 = arith.mulf %152, %151 : vector<5x128xf32>
    %154 = math.tanh %153 : vector<5x128xf32>
    %cst_52 = arith.constant 1.000000e+00 : f32
    %155 = vector.broadcast %cst_52 : f32 to vector<5x128xf32>
    %156 = arith.addf %155, %154 : vector<5x128xf32>
    %157 = arith.mulf %146, %156 : vector<5x128xf32>
    %c0_53 = arith.constant 0 : index
    %c64 = arith.constant 64 : index
    %c0_54 = arith.constant 0 : index
    %158 = vector.load %arg5[%c0_53, %c64, %c0_54] : memref<2x192x128xf32, #tpu.memory_space<vmem>>, vector<1x128x32xf32>
    %159 = vector.shape_cast %158 : vector<1x128x32xf32> to vector<128x32xf32>
    %cst_55 = arith.constant dense<0.000000e+00> : vector<5x32xf32>
    %160 = tpu.matmul %157, %159, %cst_55 {dimension_numbers = #tpu.dot_dimension_numbers<[1], [0], [0], [1], [0, 0, 1, 1], [], []>} : vector<5x128xf32>, vector<128x32xf32>, vector<5x32xf32> -> vector<5x32xf32>
    %161 = vector.broadcast %15 : vector<1x32xf32> to vector<5x32xf32>
    %162 = arith.addf %160, %161 : vector<5x32xf32>
    %163 = arith.addf %117, %162 : vector<5x32xf32>
    %c1 = arith.constant 1 : index
    %c0_56 = arith.constant 0 : index
    %c0_57 = arith.constant 0 : index
    %164 = vector.load %arg6[%c1, %c0_56, %c0_57] : memref<2x8x128xf32, #tpu.memory_space<vmem>>, vector<1x8x128xf32>
    %165 = vector.shape_cast %164 : vector<1x8x128xf32> to vector<8x128xf32>
    %166 = vector.extract_strided_slice %165 {offsets = [0, 0], sizes = [1, 32], strides = [1, 1]} : vector<8x128xf32> to vector<1x32xf32>
    %167 = vector.extract_strided_slice %165 {offsets = [1, 0], sizes = [1, 32], strides = [1, 1]} : vector<8x128xf32> to vector<1x32xf32>
    %168 = vector.extract_strided_slice %165 {offsets = [2, 0], sizes = [1, 96], strides = [1, 1]} : vector<8x128xf32> to vector<1x96xf32>
    %169 = vector.extract_strided_slice %165 {offsets = [3, 0], sizes = [1, 32], strides = [1, 1]} : vector<8x128xf32> to vector<1x32xf32>
    %170 = vector.extract_strided_slice %165 {offsets = [4, 0], sizes = [1, 32], strides = [1, 1]} : vector<8x128xf32> to vector<1x32xf32>
    %171 = vector.extract_strided_slice %165 {offsets = [5, 0], sizes = [1, 32], strides = [1, 1]} : vector<8x128xf32> to vector<1x32xf32>
    %172 = vector.extract_strided_slice %165 {offsets = [6, 0], sizes = [1, 128], strides = [1, 1]} : vector<8x128xf32> to vector<1x128xf32>
    %173 = vector.extract_strided_slice %165 {offsets = [7, 0], sizes = [1, 32], strides = [1, 1]} : vector<8x128xf32> to vector<1x32xf32>
    %cst_58 = arith.constant dense<0.000000e+00> : vector<5xf32>
    %174 = vector.multi_reduction <add>, %163, %cst_58 [1] : vector<5x32xf32> to vector<5xf32>
    %175 = vector.shape_cast %174 : vector<5xf32> to vector<5x1xf32>
    %cst_59 = arith.constant 3.200000e+01 : f32
    %176 = vector.broadcast %cst_59 : f32 to vector<5x1xf32>
    %177 = arith.divf %175, %176 : vector<5x1xf32>
    %178 = vector.broadcast %177 : vector<5x1xf32> to vector<5x32xf32>
    %179 = arith.subf %163, %178 : vector<5x32xf32>
    %180 = arith.mulf %179, %179 : vector<5x32xf32>
    %cst_60 = arith.constant dense<0.000000e+00> : vector<5xf32>
    %181 = vector.multi_reduction <add>, %180, %cst_60 [1] : vector<5x32xf32> to vector<5xf32>
    %182 = vector.shape_cast %181 : vector<5xf32> to vector<5x1xf32>
    %cst_61 = arith.constant 3.200000e+01 : f32
    %183 = vector.broadcast %cst_61 : f32 to vector<5x1xf32>
    %184 = arith.divf %182, %183 : vector<5x1xf32>
    %185 = vector.broadcast %177 : vector<5x1xf32> to vector<5x32xf32>
    %186 = arith.subf %163, %185 : vector<5x32xf32>
    %cst_62 = arith.constant 9.99999996E-13 : f32
    %187 = vector.broadcast %cst_62 : f32 to vector<5x1xf32>
    %188 = arith.addf %184, %187 : vector<5x1xf32>
    %189 = math.rsqrt %188 : vector<5x1xf32>
    %190 = vector.broadcast %189 : vector<5x1xf32> to vector<5x32xf32>
    %191 = arith.mulf %186, %190 : vector<5x32xf32>
    %192 = vector.broadcast %166 : vector<1x32xf32> to vector<5x32xf32>
    %193 = arith.mulf %191, %192 : vector<5x32xf32>
    %194 = vector.broadcast %167 : vector<1x32xf32> to vector<5x32xf32>
    %195 = arith.addf %193, %194 : vector<5x32xf32>
    %c1_63 = arith.constant 1 : index
    %c0_64 = arith.constant 0 : index
    %c0_65 = arith.constant 0 : index
    %196 = vector.load %arg5[%c1_63, %c0_64, %c0_65] : memref<2x192x128xf32, #tpu.memory_space<vmem>>, vector<1x32x96xf32>
    %197 = vector.shape_cast %196 : vector<1x32x96xf32> to vector<32x96xf32>
    %cst_66 = arith.constant dense<0.000000e+00> : vector<5x96xf32>
    %198 = tpu.matmul %195, %197, %cst_66 {dimension_numbers = #tpu.dot_dimension_numbers<[1], [0], [0], [1], [0, 0, 1, 1], [], []>} : vector<5x32xf32>, vector<32x96xf32>, vector<5x96xf32> -> vector<5x96xf32>
    %199 = vector.broadcast %168 : vector<1x96xf32> to vector<5x96xf32>
    %200 = arith.addf %198, %199 : vector<5x96xf32>
    %201 = vector.extract_strided_slice %200 {offsets = [0, 0], sizes = [5, 8], strides = [1, 1]} : vector<5x96xf32> to vector<5x8xf32>
    %202 = vector.extract_strided_slice %200 {offsets = [0, 32], sizes = [5, 8], strides = [1, 1]} : vector<5x96xf32> to vector<5x8xf32>
    %203 = vector.extract_strided_slice %200 {offsets = [0, 64], sizes = [5, 8], strides = [1, 1]} : vector<5x96xf32> to vector<5x8xf32>
    %cst_67 = arith.constant dense<0.000000e+00> : vector<5x5xf32>
    %204 = tpu.matmul %201, %202, %cst_67 {dimension_numbers = #tpu.dot_dimension_numbers<[1], [1], [0], [0], [0, 0, 1, 0], [], []>} : vector<5x8xf32>, vector<5x8xf32>, vector<5x5xf32> -> vector<5x5xf32>
    %cst_68 = arith.constant 0.353553385 : f32
    %205 = vector.broadcast %cst_68 : f32 to vector<5x5xf32>
    %206 = arith.mulf %204, %205 : vector<5x5xf32>
    %cst_69 = arith.constant dense<0xFF800000> : vector<5xf32>
    %207 = vector.multi_reduction <maximumf>, %206, %cst_69 [1] : vector<5x5xf32> to vector<5xf32>
    %208 = vector.shape_cast %207 : vector<5xf32> to vector<5x1xf32>
    %209 = vector.broadcast %208 : vector<5x1xf32> to vector<5x5xf32>
    %210 = arith.subf %206, %209 : vector<5x5xf32>
    %211 = math.exp %210 : vector<5x5xf32>
    %cst_70 = arith.constant dense<0.000000e+00> : vector<5xf32>
    %212 = vector.multi_reduction <add>, %211, %cst_70 [1] : vector<5x5xf32> to vector<5xf32>
    %213 = vector.shape_cast %212 : vector<5xf32> to vector<5x1xf32>
    %214 = tpu.reciprocal %213 {approx = true} : vector<5x1xf32> -> vector<5x1xf32>
    %215 = vector.broadcast %214 : vector<5x1xf32> to vector<5x5xf32>
    %216 = arith.mulf %211, %215 : vector<5x5xf32>
    %cst_71 = arith.constant dense<0.000000e+00> : vector<5x8xf32>
    %217 = tpu.matmul %216, %203, %cst_71 {dimension_numbers = #tpu.dot_dimension_numbers<[1], [0], [0], [1], [0, 0, 1, 1], [], []>} : vector<5x5xf32>, vector<5x8xf32>, vector<5x8xf32> -> vector<5x8xf32>
    %218 = vector.extract_strided_slice %200 {offsets = [0, 8], sizes = [5, 8], strides = [1, 1]} : vector<5x96xf32> to vector<5x8xf32>
    %219 = vector.extract_strided_slice %200 {offsets = [0, 40], sizes = [5, 8], strides = [1, 1]} : vector<5x96xf32> to vector<5x8xf32>
    %220 = vector.extract_strided_slice %200 {offsets = [0, 72], sizes = [5, 8], strides = [1, 1]} : vector<5x96xf32> to vector<5x8xf32>
    %cst_72 = arith.constant dense<0.000000e+00> : vector<5x5xf32>
    %221 = tpu.matmul %218, %219, %cst_72 {dimension_numbers = #tpu.dot_dimension_numbers<[1], [1], [0], [0], [0, 0, 1, 0], [], []>} : vector<5x8xf32>, vector<5x8xf32>, vector<5x5xf32> -> vector<5x5xf32>
    %cst_73 = arith.constant 0.353553385 : f32
    %222 = vector.broadcast %cst_73 : f32 to vector<5x5xf32>
    %223 = arith.mulf %221, %222 : vector<5x5xf32>
    %cst_74 = arith.constant dense<0xFF800000> : vector<5xf32>
    %224 = vector.multi_reduction <maximumf>, %223, %cst_74 [1] : vector<5x5xf32> to vector<5xf32>
    %225 = vector.shape_cast %224 : vector<5xf32> to vector<5x1xf32>
    %226 = vector.broadcast %225 : vector<5x1xf32> to vector<5x5xf32>
    %227 = arith.subf %223, %226 : vector<5x5xf32>
    %228 = math.exp %227 : vector<5x5xf32>
    %cst_75 = arith.constant dense<0.000000e+00> : vector<5xf32>
    %229 = vector.multi_reduction <add>, %228, %cst_75 [1] : vector<5x5xf32> to vector<5xf32>
    %230 = vector.shape_cast %229 : vector<5xf32> to vector<5x1xf32>
    %231 = tpu.reciprocal %230 {approx = true} : vector<5x1xf32> -> vector<5x1xf32>
    %232 = vector.broadcast %231 : vector<5x1xf32> to vector<5x5xf32>
    %233 = arith.mulf %228, %232 : vector<5x5xf32>
    %cst_76 = arith.constant dense<0.000000e+00> : vector<5x8xf32>
    %234 = tpu.matmul %233, %220, %cst_76 {dimension_numbers = #tpu.dot_dimension_numbers<[1], [0], [0], [1], [0, 0, 1, 1], [], []>} : vector<5x5xf32>, vector<5x8xf32>, vector<5x8xf32> -> vector<5x8xf32>
    %235 = vector.extract_strided_slice %200 {offsets = [0, 16], sizes = [5, 8], strides = [1, 1]} : vector<5x96xf32> to vector<5x8xf32>
    %236 = vector.extract_strided_slice %200 {offsets = [0, 48], sizes = [5, 8], strides = [1, 1]} : vector<5x96xf32> to vector<5x8xf32>
    %237 = vector.extract_strided_slice %200 {offsets = [0, 80], sizes = [5, 8], strides = [1, 1]} : vector<5x96xf32> to vector<5x8xf32>
    %cst_77 = arith.constant dense<0.000000e+00> : vector<5x5xf32>
    %238 = tpu.matmul %235, %236, %cst_77 {dimension_numbers = #tpu.dot_dimension_numbers<[1], [1], [0], [0], [0, 0, 1, 0], [], []>} : vector<5x8xf32>, vector<5x8xf32>, vector<5x5xf32> -> vector<5x5xf32>
    %cst_78 = arith.constant 0.353553385 : f32
    %239 = vector.broadcast %cst_78 : f32 to vector<5x5xf32>
    %240 = arith.mulf %238, %239 : vector<5x5xf32>
    %cst_79 = arith.constant dense<0xFF800000> : vector<5xf32>
    %241 = vector.multi_reduction <maximumf>, %240, %cst_79 [1] : vector<5x5xf32> to vector<5xf32>
    %242 = vector.shape_cast %241 : vector<5xf32> to vector<5x1xf32>
    %243 = vector.broadcast %242 : vector<5x1xf32> to vector<5x5xf32>
    %244 = arith.subf %240, %243 : vector<5x5xf32>
    %245 = math.exp %244 : vector<5x5xf32>
    %cst_80 = arith.constant dense<0.000000e+00> : vector<5xf32>
    %246 = vector.multi_reduction <add>, %245, %cst_80 [1] : vector<5x5xf32> to vector<5xf32>
    %247 = vector.shape_cast %246 : vector<5xf32> to vector<5x1xf32>
    %248 = tpu.reciprocal %247 {approx = true} : vector<5x1xf32> -> vector<5x1xf32>
    %249 = vector.broadcast %248 : vector<5x1xf32> to vector<5x5xf32>
    %250 = arith.mulf %245, %249 : vector<5x5xf32>
    %cst_81 = arith.constant dense<0.000000e+00> : vector<5x8xf32>
    %251 = tpu.matmul %250, %237, %cst_81 {dimension_numbers = #tpu.dot_dimension_numbers<[1], [0], [0], [1], [0, 0, 1, 1], [], []>} : vector<5x5xf32>, vector<5x8xf32>, vector<5x8xf32> -> vector<5x8xf32>
    %252 = vector.extract_strided_slice %200 {offsets = [0, 24], sizes = [5, 8], strides = [1, 1]} : vector<5x96xf32> to vector<5x8xf32>
    %253 = vector.extract_strided_slice %200 {offsets = [0, 56], sizes = [5, 8], strides = [1, 1]} : vector<5x96xf32> to vector<5x8xf32>
    %254 = vector.extract_strided_slice %200 {offsets = [0, 88], sizes = [5, 8], strides = [1, 1]} : vector<5x96xf32> to vector<5x8xf32>
    %cst_82 = arith.constant dense<0.000000e+00> : vector<5x5xf32>
    %255 = tpu.matmul %252, %253, %cst_82 {dimension_numbers = #tpu.dot_dimension_numbers<[1], [1], [0], [0], [0, 0, 1, 0], [], []>} : vector<5x8xf32>, vector<5x8xf32>, vector<5x5xf32> -> vector<5x5xf32>
    %cst_83 = arith.constant 0.353553385 : f32
    %256 = vector.broadcast %cst_83 : f32 to vector<5x5xf32>
    %257 = arith.mulf %255, %256 : vector<5x5xf32>
    %cst_84 = arith.constant dense<0xFF800000> : vector<5xf32>
    %258 = vector.multi_reduction <maximumf>, %257, %cst_84 [1] : vector<5x5xf32> to vector<5xf32>
    %259 = vector.shape_cast %258 : vector<5xf32> to vector<5x1xf32>
    %260 = vector.broadcast %259 : vector<5x1xf32> to vector<5x5xf32>
    %261 = arith.subf %257, %260 : vector<5x5xf32>
    %262 = math.exp %261 : vector<5x5xf32>
    %cst_85 = arith.constant dense<0.000000e+00> : vector<5xf32>
    %263 = vector.multi_reduction <add>, %262, %cst_85 [1] : vector<5x5xf32> to vector<5xf32>
    %264 = vector.shape_cast %263 : vector<5xf32> to vector<5x1xf32>
    %265 = tpu.reciprocal %264 {approx = true} : vector<5x1xf32> -> vector<5x1xf32>
    %266 = vector.broadcast %265 : vector<5x1xf32> to vector<5x5xf32>
    %267 = arith.mulf %262, %266 : vector<5x5xf32>
    %cst_86 = arith.constant dense<0.000000e+00> : vector<5x8xf32>
    %268 = tpu.matmul %267, %254, %cst_86 {dimension_numbers = #tpu.dot_dimension_numbers<[1], [0], [0], [1], [0, 0, 1, 1], [], []>} : vector<5x5xf32>, vector<5x8xf32>, vector<5x8xf32> -> vector<5x8xf32>
    %269 = tpu.concatenate %217, %234, %251, %268 in 1 : vector<5x8xf32>, vector<5x8xf32>, vector<5x8xf32>, vector<5x8xf32> -> vector<5x32xf32>
    %c1_87 = arith.constant 1 : index
    %c0_88 = arith.constant 0 : index
    %c96_89 = arith.constant 96 : index
    %270 = vector.load %arg5[%c1_87, %c0_88, %c96_89] : memref<2x192x128xf32, #tpu.memory_space<vmem>>, vector<1x32x32xf32>
    %271 = vector.shape_cast %270 : vector<1x32x32xf32> to vector<32x32xf32>
    %cst_90 = arith.constant dense<0.000000e+00> : vector<5x32xf32>
    %272 = tpu.matmul %269, %271, %cst_90 {dimension_numbers = #tpu.dot_dimension_numbers<[1], [0], [0], [1], [0, 0, 1, 1], [], []>} : vector<5x32xf32>, vector<32x32xf32>, vector<5x32xf32> -> vector<5x32xf32>
    %273 = vector.broadcast %169 : vector<1x32xf32> to vector<5x32xf32>
    %274 = arith.addf %272, %273 : vector<5x32xf32>
    %275 = arith.addf %163, %274 : vector<5x32xf32>
    %cst_91 = arith.constant dense<0.000000e+00> : vector<5xf32>
    %276 = vector.multi_reduction <add>, %275, %cst_91 [1] : vector<5x32xf32> to vector<5xf32>
    %277 = vector.shape_cast %276 : vector<5xf32> to vector<5x1xf32>
    %cst_92 = arith.constant 3.200000e+01 : f32
    %278 = vector.broadcast %cst_92 : f32 to vector<5x1xf32>
    %279 = arith.divf %277, %278 : vector<5x1xf32>
    %280 = vector.broadcast %279 : vector<5x1xf32> to vector<5x32xf32>
    %281 = arith.subf %275, %280 : vector<5x32xf32>
    %282 = arith.mulf %281, %281 : vector<5x32xf32>
    %cst_93 = arith.constant dense<0.000000e+00> : vector<5xf32>
    %283 = vector.multi_reduction <add>, %282, %cst_93 [1] : vector<5x32xf32> to vector<5xf32>
    %284 = vector.shape_cast %283 : vector<5xf32> to vector<5x1xf32>
    %cst_94 = arith.constant 3.200000e+01 : f32
    %285 = vector.broadcast %cst_94 : f32 to vector<5x1xf32>
    %286 = arith.divf %284, %285 : vector<5x1xf32>
    %287 = vector.broadcast %279 : vector<5x1xf32> to vector<5x32xf32>
    %288 = arith.subf %275, %287 : vector<5x32xf32>
    %cst_95 = arith.constant 9.99999996E-13 : f32
    %289 = vector.broadcast %cst_95 : f32 to vector<5x1xf32>
    %290 = arith.addf %286, %289 : vector<5x1xf32>
    %291 = math.rsqrt %290 : vector<5x1xf32>
    %292 = vector.broadcast %291 : vector<5x1xf32> to vector<5x32xf32>
    %293 = arith.mulf %288, %292 : vector<5x32xf32>
    %294 = vector.broadcast %170 : vector<1x32xf32> to vector<5x32xf32>
    %295 = arith.mulf %293, %294 : vector<5x32xf32>
    %296 = vector.broadcast %171 : vector<1x32xf32> to vector<5x32xf32>
    %297 = arith.addf %295, %296 : vector<5x32xf32>
    %c1_96 = arith.constant 1 : index
    %c32_97 = arith.constant 32 : index
    %c0_98 = arith.constant 0 : index
    %298 = vector.load %arg5[%c1_96, %c32_97, %c0_98] : memref<2x192x128xf32, #tpu.memory_space<vmem>>, vector<1x32x128xf32>
    %299 = vector.shape_cast %298 : vector<1x32x128xf32> to vector<32x128xf32>
    %cst_99 = arith.constant dense<0.000000e+00> : vector<5x128xf32>
    %300 = tpu.matmul %297, %299, %cst_99 {dimension_numbers = #tpu.dot_dimension_numbers<[1], [0], [0], [1], [0, 0, 1, 1], [], []>} : vector<5x32xf32>, vector<32x128xf32>, vector<5x128xf32> -> vector<5x128xf32>
    %301 = vector.broadcast %172 : vector<1x128xf32> to vector<5x128xf32>
    %302 = arith.addf %300, %301 : vector<5x128xf32>
    %cst_100 = arith.constant 5.000000e-01 : f32
    %303 = vector.broadcast %cst_100 : f32 to vector<5x128xf32>
    %304 = arith.mulf %303, %302 : vector<5x128xf32>
    %cst_101 = arith.constant 4.471500e-02 : f32
    %305 = vector.broadcast %cst_101 : f32 to vector<5x128xf32>
    %306 = arith.mulf %305, %302 : vector<5x128xf32>
    %307 = arith.mulf %306, %302 : vector<5x128xf32>
    %308 = arith.mulf %307, %302 : vector<5x128xf32>
    %309 = arith.addf %302, %308 : vector<5x128xf32>
    %cst_102 = arith.constant 0.797884583 : f32
    %310 = vector.broadcast %cst_102 : f32 to vector<5x128xf32>
    %311 = arith.mulf %310, %309 : vector<5x128xf32>
    %312 = math.tanh %311 : vector<5x128xf32>
    %cst_103 = arith.constant 1.000000e+00 : f32
    %313 = vector.broadcast %cst_103 : f32 to vector<5x128xf32>
    %314 = arith.addf %313, %312 : vector<5x128xf32>
    %315 = arith.mulf %304, %314 : vector<5x128xf32>
    %c1_104 = arith.constant 1 : index
    %c64_105 = arith.constant 64 : index
    %c0_106 = arith.constant 0 : index
    %316 = vector.load %arg5[%c1_104, %c64_105, %c0_106] : memref<2x192x128xf32, #tpu.memory_space<vmem>>, vector<1x128x32xf32>
    %317 = vector.shape_cast %316 : vector<1x128x32xf32> to vector<128x32xf32>
    %cst_107 = arith.constant dense<0.000000e+00> : vector<5x32xf32>
    %318 = tpu.matmul %315, %317, %cst_107 {dimension_numbers = #tpu.dot_dimension_numbers<[1], [0], [0], [1], [0, 0, 1, 1], [], []>} : vector<5x128xf32>, vector<128x32xf32>, vector<5x32xf32> -> vector<5x32xf32>
    %319 = vector.broadcast %173 : vector<1x32xf32> to vector<5x32xf32>
    %320 = arith.addf %318, %319 : vector<5x32xf32>
    %321 = arith.addf %275, %320 : vector<5x32xf32>
    %c33 = arith.constant 33 : index
    %c0_108 = arith.constant 0 : index
    %322 = vector.load %arg7[%c33, %c0_108] : memref<35x32xf32, #tpu.memory_space<vmem>>, vector<1x32xf32>
    %c34 = arith.constant 34 : index
    %c0_109 = arith.constant 0 : index
    %323 = vector.load %arg7[%c34, %c0_109] : memref<35x32xf32, #tpu.memory_space<vmem>>, vector<1x32xf32>
    %cst_110 = arith.constant dense<0.000000e+00> : vector<5xf32>
    %324 = vector.multi_reduction <add>, %321, %cst_110 [1] : vector<5x32xf32> to vector<5xf32>
    %325 = vector.shape_cast %324 : vector<5xf32> to vector<5x1xf32>
    %cst_111 = arith.constant 3.200000e+01 : f32
    %326 = vector.broadcast %cst_111 : f32 to vector<5x1xf32>
    %327 = arith.divf %325, %326 : vector<5x1xf32>
    %328 = vector.broadcast %327 : vector<5x1xf32> to vector<5x32xf32>
    %329 = arith.subf %321, %328 : vector<5x32xf32>
    %330 = arith.mulf %329, %329 : vector<5x32xf32>
    %cst_112 = arith.constant dense<0.000000e+00> : vector<5xf32>
    %331 = vector.multi_reduction <add>, %330, %cst_112 [1] : vector<5x32xf32> to vector<5xf32>
    %332 = vector.shape_cast %331 : vector<5xf32> to vector<5x1xf32>
    %cst_113 = arith.constant 3.200000e+01 : f32
    %333 = vector.broadcast %cst_113 : f32 to vector<5x1xf32>
    %334 = arith.divf %332, %333 : vector<5x1xf32>
    %335 = vector.broadcast %327 : vector<5x1xf32> to vector<5x32xf32>
    %336 = arith.subf %321, %335 : vector<5x32xf32>
    %cst_114 = arith.constant 9.99999996E-13 : f32
    %337 = vector.broadcast %cst_114 : f32 to vector<5x1xf32>
    %338 = arith.addf %334, %337 : vector<5x1xf32>
    %339 = math.rsqrt %338 : vector<5x1xf32>
    %340 = vector.broadcast %339 : vector<5x1xf32> to vector<5x32xf32>
    %341 = arith.mulf %336, %340 : vector<5x32xf32>
    %342 = vector.broadcast %322 : vector<1x32xf32> to vector<5x32xf32>
    %343 = arith.mulf %341, %342 : vector<5x32xf32>
    %344 = vector.broadcast %323 : vector<1x32xf32> to vector<5x32xf32>
    %345 = arith.addf %343, %344 : vector<5x32xf32>
    %c0_115 = arith.constant 0 : index
    %c0_116 = arith.constant 0 : index
    %346 = vector.load %arg7[%c0_115, %c0_116] : memref<35x32xf32, #tpu.memory_space<vmem>>, vector<32x32xf32>
    %cst_117 = arith.constant dense<0.000000e+00> : vector<5x32xf32>
    %347 = tpu.matmul %345, %346, %cst_117 {dimension_numbers = #tpu.dot_dimension_numbers<[1], [0], [0], [1], [0, 0, 1, 1], [], []>} : vector<5x32xf32>, vector<32x32xf32>, vector<5x32xf32> -> vector<5x32xf32>
    %c32_118 = arith.constant 32 : index
    %c0_119 = arith.constant 0 : index
    %348 = vector.load %arg7[%c32_118, %c0_119] : memref<35x32xf32, #tpu.memory_space<vmem>>, vector<1x32xf32>
    %349 = vector.broadcast %348 : vector<1x32xf32> to vector<5x32xf32>
    %350 = arith.addf %347, %349 : vector<5x32xf32>
    %351 = arith.index_cast %arg0 : i32 to index
    %c0_120 = arith.constant 0 : index
    %352 = memref.load %arg1[%351, %c0_120] : memref<2x8xi32, #tpu.memory_space<smem>>
    %353 = arith.index_cast %352 : i32 to index
    %c0_121 = arith.constant 0 : index
    %c0_122 = arith.constant 0 : index
    %354 = vector.load %arg8[%353, %c0_121, %c0_122] : memref<100x1x32xf32, #tpu.memory_space<vmem>>, vector<1x1x32xf32>
    %355 = vector.shape_cast %354 : vector<1x1x32xf32> to vector<1x32xf32>
    %356 = arith.index_cast %arg0 : i32 to index
    %c1_123 = arith.constant 1 : index
    %357 = memref.load %arg1[%356, %c1_123] : memref<2x8xi32, #tpu.memory_space<smem>>
    %358 = arith.index_cast %357 : i32 to index
    %c0_124 = arith.constant 0 : index
    %c0_125 = arith.constant 0 : index
    %359 = vector.load %arg8[%358, %c0_124, %c0_125] : memref<100x1x32xf32, #tpu.memory_space<vmem>>, vector<1x1x32xf32>
    %360 = vector.shape_cast %359 : vector<1x1x32xf32> to vector<1x32xf32>
    %361 = arith.index_cast %arg0 : i32 to index
    %c2 = arith.constant 2 : index
    %362 = memref.load %arg1[%361, %c2] : memref<2x8xi32, #tpu.memory_space<smem>>
    %363 = arith.index_cast %362 : i32 to index
    %c0_126 = arith.constant 0 : index
    %c0_127 = arith.constant 0 : index
    %364 = vector.load %arg8[%363, %c0_126, %c0_127] : memref<100x1x32xf32, #tpu.memory_space<vmem>>, vector<1x1x32xf32>
    %365 = vector.shape_cast %364 : vector<1x1x32xf32> to vector<1x32xf32>
    %366 = arith.index_cast %arg0 : i32 to index
    %c3 = arith.constant 3 : index
    %367 = memref.load %arg1[%366, %c3] : memref<2x8xi32, #tpu.memory_space<smem>>
    %368 = arith.index_cast %367 : i32 to index
    %c0_128 = arith.constant 0 : index
    %c0_129 = arith.constant 0 : index
    %369 = vector.load %arg8[%368, %c0_128, %c0_129] : memref<100x1x32xf32, #tpu.memory_space<vmem>>, vector<1x1x32xf32>
    %370 = vector.shape_cast %369 : vector<1x1x32xf32> to vector<1x32xf32>
    %371 = arith.index_cast %arg0 : i32 to index
    %c4 = arith.constant 4 : index
    %372 = memref.load %arg1[%371, %c4] : memref<2x8xi32, #tpu.memory_space<smem>>
    %373 = arith.index_cast %372 : i32 to index
    %c0_130 = arith.constant 0 : index
    %c0_131 = arith.constant 0 : index
    %374 = vector.load %arg8[%373, %c0_130, %c0_131] : memref<100x1x32xf32, #tpu.memory_space<vmem>>, vector<1x1x32xf32>
    %375 = vector.shape_cast %374 : vector<1x1x32xf32> to vector<1x32xf32>
    %376 = arith.index_cast %arg0 : i32 to index
    %c5 = arith.constant 5 : index
    %377 = memref.load %arg1[%376, %c5] : memref<2x8xi32, #tpu.memory_space<smem>>
    %378 = arith.index_cast %377 : i32 to index
    %c0_132 = arith.constant 0 : index
    %c0_133 = arith.constant 0 : index
    %379 = vector.load %arg8[%378, %c0_132, %c0_133] : memref<100x1x32xf32, #tpu.memory_space<vmem>>, vector<1x1x32xf32>
    %380 = vector.shape_cast %379 : vector<1x1x32xf32> to vector<1x32xf32>
    %381 = arith.index_cast %arg0 : i32 to index
    %c6 = arith.constant 6 : index
    %382 = memref.load %arg1[%381, %c6] : memref<2x8xi32, #tpu.memory_space<smem>>
    %383 = arith.index_cast %382 : i32 to index
    %c0_134 = arith.constant 0 : index
    %c0_135 = arith.constant 0 : index
    %384 = vector.load %arg8[%383, %c0_134, %c0_135] : memref<100x1x32xf32, #tpu.memory_space<vmem>>, vector<1x1x32xf32>
    %385 = vector.shape_cast %384 : vector<1x1x32xf32> to vector<1x32xf32>
    %386 = arith.index_cast %arg0 : i32 to index
    %c7 = arith.constant 7 : index
    %387 = memref.load %arg1[%386, %c7] : memref<2x8xi32, #tpu.memory_space<smem>>
    %388 = arith.index_cast %387 : i32 to index
    %c0_136 = arith.constant 0 : index
    %c0_137 = arith.constant 0 : index
    %389 = vector.load %arg8[%388, %c0_136, %c0_137] : memref<100x1x32xf32, #tpu.memory_space<vmem>>, vector<1x1x32xf32>
    %390 = vector.shape_cast %389 : vector<1x1x32xf32> to vector<1x32xf32>
    %391 = tpu.concatenate %355, %360, %365, %370, %375, %380, %385, %390 in 0 : vector<1x32xf32>, vector<1x32xf32>, vector<1x32xf32>, vector<1x32xf32>, vector<1x32xf32>, vector<1x32xf32>, vector<1x32xf32>, vector<1x32xf32> -> vector<8x32xf32>
    %c0_138 = arith.constant 0 : index
    %c0_139 = arith.constant 0 : index
    %392 = vector.load %arg9[%c0_138, %c0_139] : memref<10x32xf32, #tpu.memory_space<vmem>>, vector<8x32xf32>
    %393 = arith.addf %391, %392 : vector<8x32xf32>
    %c8 = arith.constant 8 : index
    %c0_140 = arith.constant 0 : index
    %394 = vector.load %arg9[%c8, %c0_140] : memref<10x32xf32, #tpu.memory_space<vmem>>, vector<1x32xf32>
    %c9 = arith.constant 9 : index
    %c0_141 = arith.constant 0 : index
    %395 = vector.load %arg9[%c9, %c0_141] : memref<10x32xf32, #tpu.memory_space<vmem>>, vector<1x32xf32>
    %cst_142 = arith.constant dense<0.000000e+00> : vector<8xf32>
    %396 = vector.multi_reduction <add>, %393, %cst_142 [1] : vector<8x32xf32> to vector<8xf32>
    %397 = vector.shape_cast %396 : vector<8xf32> to vector<8x1xf32>
    %cst_143 = arith.constant 3.200000e+01 : f32
    %398 = vector.broadcast %cst_143 : f32 to vector<8x1xf32>
    %399 = arith.divf %397, %398 : vector<8x1xf32>
    %400 = vector.broadcast %399 : vector<8x1xf32> to vector<8x32xf32>
    %401 = arith.subf %393, %400 : vector<8x32xf32>
    %402 = arith.mulf %401, %401 : vector<8x32xf32>
    %cst_144 = arith.constant dense<0.000000e+00> : vector<8xf32>
    %403 = vector.multi_reduction <add>, %402, %cst_144 [1] : vector<8x32xf32> to vector<8xf32>
    %404 = vector.shape_cast %403 : vector<8xf32> to vector<8x1xf32>
    %cst_145 = arith.constant 3.200000e+01 : f32
    %405 = vector.broadcast %cst_145 : f32 to vector<8x1xf32>
    %406 = arith.divf %404, %405 : vector<8x1xf32>
    %407 = vector.broadcast %399 : vector<8x1xf32> to vector<8x32xf32>
    %408 = arith.subf %393, %407 : vector<8x32xf32>
    %cst_146 = arith.constant 9.99999996E-13 : f32
    %409 = vector.broadcast %cst_146 : f32 to vector<8x1xf32>
    %410 = arith.addf %406, %409 : vector<8x1xf32>
    %411 = math.rsqrt %410 : vector<8x1xf32>
    %412 = vector.broadcast %411 : vector<8x1xf32> to vector<8x32xf32>
    %413 = arith.mulf %408, %412 : vector<8x32xf32>
    %414 = vector.broadcast %394 : vector<1x32xf32> to vector<8x32xf32>
    %415 = arith.mulf %413, %414 : vector<8x32xf32>
    %416 = vector.broadcast %395 : vector<1x32xf32> to vector<8x32xf32>
    %417 = arith.addf %415, %416 : vector<8x32xf32>
    %c0_147 = arith.constant 0 : index
    %c0_148 = arith.constant 0 : index
    %c0_149 = arith.constant 0 : index
    %418 = vector.load %arg11[%c0_147, %c0_148, %c0_149] : memref<2x8x128xf32, #tpu.memory_space<vmem>>, vector<1x8x128xf32>
    %419 = vector.shape_cast %418 : vector<1x8x128xf32> to vector<8x128xf32>
    %420 = vector.extract_strided_slice %419 {offsets = [0, 0], sizes = [1, 32], strides = [1, 1]} : vector<8x128xf32> to vector<1x32xf32>
    %421 = vector.extract_strided_slice %419 {offsets = [1, 0], sizes = [1, 32], strides = [1, 1]} : vector<8x128xf32> to vector<1x32xf32>
    %422 = vector.extract_strided_slice %419 {offsets = [2, 0], sizes = [1, 96], strides = [1, 1]} : vector<8x128xf32> to vector<1x96xf32>
    %423 = vector.extract_strided_slice %419 {offsets = [3, 0], sizes = [1, 32], strides = [1, 1]} : vector<8x128xf32> to vector<1x32xf32>
    %424 = vector.extract_strided_slice %419 {offsets = [4, 0], sizes = [1, 32], strides = [1, 1]} : vector<8x128xf32> to vector<1x32xf32>
    %425 = vector.extract_strided_slice %419 {offsets = [5, 0], sizes = [1, 32], strides = [1, 1]} : vector<8x128xf32> to vector<1x32xf32>
    %426 = vector.extract_strided_slice %419 {offsets = [6, 0], sizes = [1, 128], strides = [1, 1]} : vector<8x128xf32> to vector<1x128xf32>
    %427 = vector.extract_strided_slice %419 {offsets = [7, 0], sizes = [1, 32], strides = [1, 1]} : vector<8x128xf32> to vector<1x32xf32>
    %cst_150 = arith.constant dense<0.000000e+00> : vector<8xf32>
    %428 = vector.multi_reduction <add>, %417, %cst_150 [1] : vector<8x32xf32> to vector<8xf32>
    %429 = vector.shape_cast %428 : vector<8xf32> to vector<8x1xf32>
    %cst_151 = arith.constant 3.200000e+01 : f32
    %430 = vector.broadcast %cst_151 : f32 to vector<8x1xf32>
    %431 = arith.divf %429, %430 : vector<8x1xf32>
    %432 = vector.broadcast %431 : vector<8x1xf32> to vector<8x32xf32>
    %433 = arith.subf %417, %432 : vector<8x32xf32>
    %434 = arith.mulf %433, %433 : vector<8x32xf32>
    %cst_152 = arith.constant dense<0.000000e+00> : vector<8xf32>
    %435 = vector.multi_reduction <add>, %434, %cst_152 [1] : vector<8x32xf32> to vector<8xf32>
    %436 = vector.shape_cast %435 : vector<8xf32> to vector<8x1xf32>
    %cst_153 = arith.constant 3.200000e+01 : f32
    %437 = vector.broadcast %cst_153 : f32 to vector<8x1xf32>
    %438 = arith.divf %436, %437 : vector<8x1xf32>
    %439 = vector.broadcast %431 : vector<8x1xf32> to vector<8x32xf32>
    %440 = arith.subf %417, %439 : vector<8x32xf32>
    %cst_154 = arith.constant 9.99999996E-13 : f32
    %441 = vector.broadcast %cst_154 : f32 to vector<8x1xf32>
    %442 = arith.addf %438, %441 : vector<8x1xf32>
    %443 = math.rsqrt %442 : vector<8x1xf32>
    %444 = vector.broadcast %443 : vector<8x1xf32> to vector<8x32xf32>
    %445 = arith.mulf %440, %444 : vector<8x32xf32>
    %446 = vector.broadcast %420 : vector<1x32xf32> to vector<8x32xf32>
    %447 = arith.mulf %445, %446 : vector<8x32xf32>
    %448 = vector.broadcast %421 : vector<1x32xf32> to vector<8x32xf32>
    %449 = arith.addf %447, %448 : vector<8x32xf32>
    %c0_155 = arith.constant 0 : index
    %c0_156 = arith.constant 0 : index
    %c0_157 = arith.constant 0 : index
    %450 = vector.load %arg10[%c0_155, %c0_156, %c0_157] : memref<2x192x128xf32, #tpu.memory_space<vmem>>, vector<1x32x96xf32>
    %451 = vector.shape_cast %450 : vector<1x32x96xf32> to vector<32x96xf32>
    %cst_158 = arith.constant dense<0.000000e+00> : vector<8x96xf32>
    %452 = tpu.matmul %449, %451, %cst_158 {dimension_numbers = #tpu.dot_dimension_numbers<[1], [0], [0], [1], [0, 0, 1, 1], [], []>} : vector<8x32xf32>, vector<32x96xf32>, vector<8x96xf32> -> vector<8x96xf32>
    %453 = vector.broadcast %422 : vector<1x96xf32> to vector<8x96xf32>
    %454 = arith.addf %452, %453 : vector<8x96xf32>
    %455 = vector.extract_strided_slice %454 {offsets = [0, 0], sizes = [8, 8], strides = [1, 1]} : vector<8x96xf32> to vector<8x8xf32>
    %456 = vector.extract_strided_slice %454 {offsets = [0, 32], sizes = [8, 8], strides = [1, 1]} : vector<8x96xf32> to vector<8x8xf32>
    %457 = vector.extract_strided_slice %454 {offsets = [0, 64], sizes = [8, 8], strides = [1, 1]} : vector<8x96xf32> to vector<8x8xf32>
    %cst_159 = arith.constant dense<0.000000e+00> : vector<8x8xf32>
    %458 = tpu.matmul %455, %456, %cst_159 {dimension_numbers = #tpu.dot_dimension_numbers<[1], [1], [0], [0], [0, 0, 1, 0], [], []>} : vector<8x8xf32>, vector<8x8xf32>, vector<8x8xf32> -> vector<8x8xf32>
    %cst_160 = arith.constant 0.353553385 : f32
    %459 = vector.broadcast %cst_160 : f32 to vector<8x8xf32>
    %460 = arith.mulf %458, %459 : vector<8x8xf32>
    %cst_161 = arith.constant dense<0xFF800000> : vector<8xf32>
    %461 = vector.multi_reduction <maximumf>, %460, %cst_161 [1] : vector<8x8xf32> to vector<8xf32>
    %462 = vector.shape_cast %461 : vector<8xf32> to vector<8x1xf32>
    %463 = vector.broadcast %462 : vector<8x1xf32> to vector<8x8xf32>
    %464 = arith.subf %460, %463 : vector<8x8xf32>
    %465 = math.exp %464 : vector<8x8xf32>
    %cst_162 = arith.constant dense<0.000000e+00> : vector<8xf32>
    %466 = vector.multi_reduction <add>, %465, %cst_162 [1] : vector<8x8xf32> to vector<8xf32>
    %467 = vector.shape_cast %466 : vector<8xf32> to vector<8x1xf32>
    %468 = tpu.reciprocal %467 {approx = true} : vector<8x1xf32> -> vector<8x1xf32>
    %469 = vector.broadcast %468 : vector<8x1xf32> to vector<8x8xf32>
    %470 = arith.mulf %465, %469 : vector<8x8xf32>
    %cst_163 = arith.constant dense<0.000000e+00> : vector<8x8xf32>
    %471 = tpu.matmul %470, %457, %cst_163 {dimension_numbers = #tpu.dot_dimension_numbers<[1], [0], [0], [1], [0, 0, 1, 1], [], []>} : vector<8x8xf32>, vector<8x8xf32>, vector<8x8xf32> -> vector<8x8xf32>
    %472 = vector.extract_strided_slice %454 {offsets = [0, 8], sizes = [8, 8], strides = [1, 1]} : vector<8x96xf32> to vector<8x8xf32>
    %473 = vector.extract_strided_slice %454 {offsets = [0, 40], sizes = [8, 8], strides = [1, 1]} : vector<8x96xf32> to vector<8x8xf32>
    %474 = vector.extract_strided_slice %454 {offsets = [0, 72], sizes = [8, 8], strides = [1, 1]} : vector<8x96xf32> to vector<8x8xf32>
    %cst_164 = arith.constant dense<0.000000e+00> : vector<8x8xf32>
    %475 = tpu.matmul %472, %473, %cst_164 {dimension_numbers = #tpu.dot_dimension_numbers<[1], [1], [0], [0], [0, 0, 1, 0], [], []>} : vector<8x8xf32>, vector<8x8xf32>, vector<8x8xf32> -> vector<8x8xf32>
    %cst_165 = arith.constant 0.353553385 : f32
    %476 = vector.broadcast %cst_165 : f32 to vector<8x8xf32>
    %477 = arith.mulf %475, %476 : vector<8x8xf32>
    %cst_166 = arith.constant dense<0xFF800000> : vector<8xf32>
    %478 = vector.multi_reduction <maximumf>, %477, %cst_166 [1] : vector<8x8xf32> to vector<8xf32>
    %479 = vector.shape_cast %478 : vector<8xf32> to vector<8x1xf32>
    %480 = vector.broadcast %479 : vector<8x1xf32> to vector<8x8xf32>
    %481 = arith.subf %477, %480 : vector<8x8xf32>
    %482 = math.exp %481 : vector<8x8xf32>
    %cst_167 = arith.constant dense<0.000000e+00> : vector<8xf32>
    %483 = vector.multi_reduction <add>, %482, %cst_167 [1] : vector<8x8xf32> to vector<8xf32>
    %484 = vector.shape_cast %483 : vector<8xf32> to vector<8x1xf32>
    %485 = tpu.reciprocal %484 {approx = true} : vector<8x1xf32> -> vector<8x1xf32>
    %486 = vector.broadcast %485 : vector<8x1xf32> to vector<8x8xf32>
    %487 = arith.mulf %482, %486 : vector<8x8xf32>
    %cst_168 = arith.constant dense<0.000000e+00> : vector<8x8xf32>
    %488 = tpu.matmul %487, %474, %cst_168 {dimension_numbers = #tpu.dot_dimension_numbers<[1], [0], [0], [1], [0, 0, 1, 1], [], []>} : vector<8x8xf32>, vector<8x8xf32>, vector<8x8xf32> -> vector<8x8xf32>
    %489 = vector.extract_strided_slice %454 {offsets = [0, 16], sizes = [8, 8], strides = [1, 1]} : vector<8x96xf32> to vector<8x8xf32>
    %490 = vector.extract_strided_slice %454 {offsets = [0, 48], sizes = [8, 8], strides = [1, 1]} : vector<8x96xf32> to vector<8x8xf32>
    %491 = vector.extract_strided_slice %454 {offsets = [0, 80], sizes = [8, 8], strides = [1, 1]} : vector<8x96xf32> to vector<8x8xf32>
    %cst_169 = arith.constant dense<0.000000e+00> : vector<8x8xf32>
    %492 = tpu.matmul %489, %490, %cst_169 {dimension_numbers = #tpu.dot_dimension_numbers<[1], [1], [0], [0], [0, 0, 1, 0], [], []>} : vector<8x8xf32>, vector<8x8xf32>, vector<8x8xf32> -> vector<8x8xf32>
    %cst_170 = arith.constant 0.353553385 : f32
    %493 = vector.broadcast %cst_170 : f32 to vector<8x8xf32>
    %494 = arith.mulf %492, %493 : vector<8x8xf32>
    %cst_171 = arith.constant dense<0xFF800000> : vector<8xf32>
    %495 = vector.multi_reduction <maximumf>, %494, %cst_171 [1] : vector<8x8xf32> to vector<8xf32>
    %496 = vector.shape_cast %495 : vector<8xf32> to vector<8x1xf32>
    %497 = vector.broadcast %496 : vector<8x1xf32> to vector<8x8xf32>
    %498 = arith.subf %494, %497 : vector<8x8xf32>
    %499 = math.exp %498 : vector<8x8xf32>
    %cst_172 = arith.constant dense<0.000000e+00> : vector<8xf32>
    %500 = vector.multi_reduction <add>, %499, %cst_172 [1] : vector<8x8xf32> to vector<8xf32>
    %501 = vector.shape_cast %500 : vector<8xf32> to vector<8x1xf32>
    %502 = tpu.reciprocal %501 {approx = true} : vector<8x1xf32> -> vector<8x1xf32>
    %503 = vector.broadcast %502 : vector<8x1xf32> to vector<8x8xf32>
    %504 = arith.mulf %499, %503 : vector<8x8xf32>
    %cst_173 = arith.constant dense<0.000000e+00> : vector<8x8xf32>
    %505 = tpu.matmul %504, %491, %cst_173 {dimension_numbers = #tpu.dot_dimension_numbers<[1], [0], [0], [1], [0, 0, 1, 1], [], []>} : vector<8x8xf32>, vector<8x8xf32>, vector<8x8xf32> -> vector<8x8xf32>
    %506 = vector.extract_strided_slice %454 {offsets = [0, 24], sizes = [8, 8], strides = [1, 1]} : vector<8x96xf32> to vector<8x8xf32>
    %507 = vector.extract_strided_slice %454 {offsets = [0, 56], sizes = [8, 8], strides = [1, 1]} : vector<8x96xf32> to vector<8x8xf32>
    %508 = vector.extract_strided_slice %454 {offsets = [0, 88], sizes = [8, 8], strides = [1, 1]} : vector<8x96xf32> to vector<8x8xf32>
    %cst_174 = arith.constant dense<0.000000e+00> : vector<8x8xf32>
    %509 = tpu.matmul %506, %507, %cst_174 {dimension_numbers = #tpu.dot_dimension_numbers<[1], [1], [0], [0], [0, 0, 1, 0], [], []>} : vector<8x8xf32>, vector<8x8xf32>, vector<8x8xf32> -> vector<8x8xf32>
    %cst_175 = arith.constant 0.353553385 : f32
    %510 = vector.broadcast %cst_175 : f32 to vector<8x8xf32>
    %511 = arith.mulf %509, %510 : vector<8x8xf32>
    %cst_176 = arith.constant dense<0xFF800000> : vector<8xf32>
    %512 = vector.multi_reduction <maximumf>, %511, %cst_176 [1] : vector<8x8xf32> to vector<8xf32>
    %513 = vector.shape_cast %512 : vector<8xf32> to vector<8x1xf32>
    %514 = vector.broadcast %513 : vector<8x1xf32> to vector<8x8xf32>
    %515 = arith.subf %511, %514 : vector<8x8xf32>
    %516 = math.exp %515 : vector<8x8xf32>
    %cst_177 = arith.constant dense<0.000000e+00> : vector<8xf32>
    %517 = vector.multi_reduction <add>, %516, %cst_177 [1] : vector<8x8xf32> to vector<8xf32>
    %518 = vector.shape_cast %517 : vector<8xf32> to vector<8x1xf32>
    %519 = tpu.reciprocal %518 {approx = true} : vector<8x1xf32> -> vector<8x1xf32>
    %520 = vector.broadcast %519 : vector<8x1xf32> to vector<8x8xf32>
    %521 = arith.mulf %516, %520 : vector<8x8xf32>
    %cst_178 = arith.constant dense<0.000000e+00> : vector<8x8xf32>
    %522 = tpu.matmul %521, %508, %cst_178 {dimension_numbers = #tpu.dot_dimension_numbers<[1], [0], [0], [1], [0, 0, 1, 1], [], []>} : vector<8x8xf32>, vector<8x8xf32>, vector<8x8xf32> -> vector<8x8xf32>
    %523 = tpu.concatenate %471, %488, %505, %522 in 1 : vector<8x8xf32>, vector<8x8xf32>, vector<8x8xf32>, vector<8x8xf32> -> vector<8x32xf32>
    %c0_179 = arith.constant 0 : index
    %c0_180 = arith.constant 0 : index
    %c96_181 = arith.constant 96 : index
    %524 = vector.load %arg10[%c0_179, %c0_180, %c96_181] : memref<2x192x128xf32, #tpu.memory_space<vmem>>, vector<1x32x32xf32>
    %525 = vector.shape_cast %524 : vector<1x32x32xf32> to vector<32x32xf32>
    %cst_182 = arith.constant dense<0.000000e+00> : vector<8x32xf32>
    %526 = tpu.matmul %523, %525, %cst_182 {dimension_numbers = #tpu.dot_dimension_numbers<[1], [0], [0], [1], [0, 0, 1, 1], [], []>} : vector<8x32xf32>, vector<32x32xf32>, vector<8x32xf32> -> vector<8x32xf32>
    %527 = vector.broadcast %423 : vector<1x32xf32> to vector<8x32xf32>
    %528 = arith.addf %526, %527 : vector<8x32xf32>
    %529 = arith.addf %417, %528 : vector<8x32xf32>
    %cst_183 = arith.constant dense<0.000000e+00> : vector<8xf32>
    %530 = vector.multi_reduction <add>, %529, %cst_183 [1] : vector<8x32xf32> to vector<8xf32>
    %531 = vector.shape_cast %530 : vector<8xf32> to vector<8x1xf32>
    %cst_184 = arith.constant 3.200000e+01 : f32
    %532 = vector.broadcast %cst_184 : f32 to vector<8x1xf32>
    %533 = arith.divf %531, %532 : vector<8x1xf32>
    %534 = vector.broadcast %533 : vector<8x1xf32> to vector<8x32xf32>
    %535 = arith.subf %529, %534 : vector<8x32xf32>
    %536 = arith.mulf %535, %535 : vector<8x32xf32>
    %cst_185 = arith.constant dense<0.000000e+00> : vector<8xf32>
    %537 = vector.multi_reduction <add>, %536, %cst_185 [1] : vector<8x32xf32> to vector<8xf32>
    %538 = vector.shape_cast %537 : vector<8xf32> to vector<8x1xf32>
    %cst_186 = arith.constant 3.200000e+01 : f32
    %539 = vector.broadcast %cst_186 : f32 to vector<8x1xf32>
    %540 = arith.divf %538, %539 : vector<8x1xf32>
    %541 = vector.broadcast %533 : vector<8x1xf32> to vector<8x32xf32>
    %542 = arith.subf %529, %541 : vector<8x32xf32>
    %cst_187 = arith.constant 9.99999996E-13 : f32
    %543 = vector.broadcast %cst_187 : f32 to vector<8x1xf32>
    %544 = arith.addf %540, %543 : vector<8x1xf32>
    %545 = math.rsqrt %544 : vector<8x1xf32>
    %546 = vector.broadcast %545 : vector<8x1xf32> to vector<8x32xf32>
    %547 = arith.mulf %542, %546 : vector<8x32xf32>
    %548 = vector.broadcast %424 : vector<1x32xf32> to vector<8x32xf32>
    %549 = arith.mulf %547, %548 : vector<8x32xf32>
    %550 = vector.broadcast %425 : vector<1x32xf32> to vector<8x32xf32>
    %551 = arith.addf %549, %550 : vector<8x32xf32>
    %c0_188 = arith.constant 0 : index
    %c32_189 = arith.constant 32 : index
    %c0_190 = arith.constant 0 : index
    %552 = vector.load %arg10[%c0_188, %c32_189, %c0_190] : memref<2x192x128xf32, #tpu.memory_space<vmem>>, vector<1x32x128xf32>
    %553 = vector.shape_cast %552 : vector<1x32x128xf32> to vector<32x128xf32>
    %cst_191 = arith.constant dense<0.000000e+00> : vector<8x128xf32>
    %554 = tpu.matmul %551, %553, %cst_191 {dimension_numbers = #tpu.dot_dimension_numbers<[1], [0], [0], [1], [0, 0, 1, 1], [], []>} : vector<8x32xf32>, vector<32x128xf32>, vector<8x128xf32> -> vector<8x128xf32>
    %555 = vector.broadcast %426 : vector<1x128xf32> to vector<8x128xf32>
    %556 = arith.addf %554, %555 : vector<8x128xf32>
    %cst_192 = arith.constant 5.000000e-01 : f32
    %557 = vector.broadcast %cst_192 : f32 to vector<8x128xf32>
    %558 = arith.mulf %557, %556 : vector<8x128xf32>
    %cst_193 = arith.constant 4.471500e-02 : f32
    %559 = vector.broadcast %cst_193 : f32 to vector<8x128xf32>
    %560 = arith.mulf %559, %556 : vector<8x128xf32>
    %561 = arith.mulf %560, %556 : vector<8x128xf32>
    %562 = arith.mulf %561, %556 : vector<8x128xf32>
    %563 = arith.addf %556, %562 : vector<8x128xf32>
    %cst_194 = arith.constant 0.797884583 : f32
    %564 = vector.broadcast %cst_194 : f32 to vector<8x128xf32>
    %565 = arith.mulf %564, %563 : vector<8x128xf32>
    %566 = math.tanh %565 : vector<8x128xf32>
    %cst_195 = arith.constant 1.000000e+00 : f32
    %567 = vector.broadcast %cst_195 : f32 to vector<8x128xf32>
    %568 = arith.addf %567, %566 : vector<8x128xf32>
    %569 = arith.mulf %558, %568 : vector<8x128xf32>
    %c0_196 = arith.constant 0 : index
    %c64_197 = arith.constant 64 : index
    %c0_198 = arith.constant 0 : index
    %570 = vector.load %arg10[%c0_196, %c64_197, %c0_198] : memref<2x192x128xf32, #tpu.memory_space<vmem>>, vector<1x128x32xf32>
    %571 = vector.shape_cast %570 : vector<1x128x32xf32> to vector<128x32xf32>
    %cst_199 = arith.constant dense<0.000000e+00> : vector<8x32xf32>
    %572 = tpu.matmul %569, %571, %cst_199 {dimension_numbers = #tpu.dot_dimension_numbers<[1], [0], [0], [1], [0, 0, 1, 1], [], []>} : vector<8x128xf32>, vector<128x32xf32>, vector<8x32xf32> -> vector<8x32xf32>
    %573 = vector.broadcast %427 : vector<1x32xf32> to vector<8x32xf32>
    %574 = arith.addf %572, %573 : vector<8x32xf32>
    %575 = arith.addf %529, %574 : vector<8x32xf32>
    %c1_200 = arith.constant 1 : index
    %c0_201 = arith.constant 0 : index
    %c0_202 = arith.constant 0 : index
    %576 = vector.load %arg11[%c1_200, %c0_201, %c0_202] : memref<2x8x128xf32, #tpu.memory_space<vmem>>, vector<1x8x128xf32>
    %577 = vector.shape_cast %576 : vector<1x8x128xf32> to vector<8x128xf32>
    %578 = vector.extract_strided_slice %577 {offsets = [0, 0], sizes = [1, 32], strides = [1, 1]} : vector<8x128xf32> to vector<1x32xf32>
    %579 = vector.extract_strided_slice %577 {offsets = [1, 0], sizes = [1, 32], strides = [1, 1]} : vector<8x128xf32> to vector<1x32xf32>
    %580 = vector.extract_strided_slice %577 {offsets = [2, 0], sizes = [1, 96], strides = [1, 1]} : vector<8x128xf32> to vector<1x96xf32>
    %581 = vector.extract_strided_slice %577 {offsets = [3, 0], sizes = [1, 32], strides = [1, 1]} : vector<8x128xf32> to vector<1x32xf32>
    %582 = vector.extract_strided_slice %577 {offsets = [4, 0], sizes = [1, 32], strides = [1, 1]} : vector<8x128xf32> to vector<1x32xf32>
    %583 = vector.extract_strided_slice %577 {offsets = [5, 0], sizes = [1, 32], strides = [1, 1]} : vector<8x128xf32> to vector<1x32xf32>
    %584 = vector.extract_strided_slice %577 {offsets = [6, 0], sizes = [1, 128], strides = [1, 1]} : vector<8x128xf32> to vector<1x128xf32>
    %585 = vector.extract_strided_slice %577 {offsets = [7, 0], sizes = [1, 32], strides = [1, 1]} : vector<8x128xf32> to vector<1x32xf32>
    %cst_203 = arith.constant dense<0.000000e+00> : vector<8xf32>
    %586 = vector.multi_reduction <add>, %575, %cst_203 [1] : vector<8x32xf32> to vector<8xf32>
    %587 = vector.shape_cast %586 : vector<8xf32> to vector<8x1xf32>
    %cst_204 = arith.constant 3.200000e+01 : f32
    %588 = vector.broadcast %cst_204 : f32 to vector<8x1xf32>
    %589 = arith.divf %587, %588 : vector<8x1xf32>
    %590 = vector.broadcast %589 : vector<8x1xf32> to vector<8x32xf32>
    %591 = arith.subf %575, %590 : vector<8x32xf32>
    %592 = arith.mulf %591, %591 : vector<8x32xf32>
    %cst_205 = arith.constant dense<0.000000e+00> : vector<8xf32>
    %593 = vector.multi_reduction <add>, %592, %cst_205 [1] : vector<8x32xf32> to vector<8xf32>
    %594 = vector.shape_cast %593 : vector<8xf32> to vector<8x1xf32>
    %cst_206 = arith.constant 3.200000e+01 : f32
    %595 = vector.broadcast %cst_206 : f32 to vector<8x1xf32>
    %596 = arith.divf %594, %595 : vector<8x1xf32>
    %597 = vector.broadcast %589 : vector<8x1xf32> to vector<8x32xf32>
    %598 = arith.subf %575, %597 : vector<8x32xf32>
    %cst_207 = arith.constant 9.99999996E-13 : f32
    %599 = vector.broadcast %cst_207 : f32 to vector<8x1xf32>
    %600 = arith.addf %596, %599 : vector<8x1xf32>
    %601 = math.rsqrt %600 : vector<8x1xf32>
    %602 = vector.broadcast %601 : vector<8x1xf32> to vector<8x32xf32>
    %603 = arith.mulf %598, %602 : vector<8x32xf32>
    %604 = vector.broadcast %578 : vector<1x32xf32> to vector<8x32xf32>
    %605 = arith.mulf %603, %604 : vector<8x32xf32>
    %606 = vector.broadcast %579 : vector<1x32xf32> to vector<8x32xf32>
    %607 = arith.addf %605, %606 : vector<8x32xf32>
    %c1_208 = arith.constant 1 : index
    %c0_209 = arith.constant 0 : index
    %c0_210 = arith.constant 0 : index
    %608 = vector.load %arg10[%c1_208, %c0_209, %c0_210] : memref<2x192x128xf32, #tpu.memory_space<vmem>>, vector<1x32x96xf32>
    %609 = vector.shape_cast %608 : vector<1x32x96xf32> to vector<32x96xf32>
    %cst_211 = arith.constant dense<0.000000e+00> : vector<8x96xf32>
    %610 = tpu.matmul %607, %609, %cst_211 {dimension_numbers = #tpu.dot_dimension_numbers<[1], [0], [0], [1], [0, 0, 1, 1], [], []>} : vector<8x32xf32>, vector<32x96xf32>, vector<8x96xf32> -> vector<8x96xf32>
    %611 = vector.broadcast %580 : vector<1x96xf32> to vector<8x96xf32>
    %612 = arith.addf %610, %611 : vector<8x96xf32>
    %613 = vector.extract_strided_slice %612 {offsets = [0, 0], sizes = [8, 8], strides = [1, 1]} : vector<8x96xf32> to vector<8x8xf32>
    %614 = vector.extract_strided_slice %612 {offsets = [0, 32], sizes = [8, 8], strides = [1, 1]} : vector<8x96xf32> to vector<8x8xf32>
    %615 = vector.extract_strided_slice %612 {offsets = [0, 64], sizes = [8, 8], strides = [1, 1]} : vector<8x96xf32> to vector<8x8xf32>
    %cst_212 = arith.constant dense<0.000000e+00> : vector<8x8xf32>
    %616 = tpu.matmul %613, %614, %cst_212 {dimension_numbers = #tpu.dot_dimension_numbers<[1], [1], [0], [0], [0, 0, 1, 0], [], []>} : vector<8x8xf32>, vector<8x8xf32>, vector<8x8xf32> -> vector<8x8xf32>
    %cst_213 = arith.constant 0.353553385 : f32
    %617 = vector.broadcast %cst_213 : f32 to vector<8x8xf32>
    %618 = arith.mulf %616, %617 : vector<8x8xf32>
    %cst_214 = arith.constant dense<0xFF800000> : vector<8xf32>
    %619 = vector.multi_reduction <maximumf>, %618, %cst_214 [1] : vector<8x8xf32> to vector<8xf32>
    %620 = vector.shape_cast %619 : vector<8xf32> to vector<8x1xf32>
    %621 = vector.broadcast %620 : vector<8x1xf32> to vector<8x8xf32>
    %622 = arith.subf %618, %621 : vector<8x8xf32>
    %623 = math.exp %622 : vector<8x8xf32>
    %cst_215 = arith.constant dense<0.000000e+00> : vector<8xf32>
    %624 = vector.multi_reduction <add>, %623, %cst_215 [1] : vector<8x8xf32> to vector<8xf32>
    %625 = vector.shape_cast %624 : vector<8xf32> to vector<8x1xf32>
    %626 = tpu.reciprocal %625 {approx = true} : vector<8x1xf32> -> vector<8x1xf32>
    %627 = vector.broadcast %626 : vector<8x1xf32> to vector<8x8xf32>
    %628 = arith.mulf %623, %627 : vector<8x8xf32>
    %cst_216 = arith.constant dense<0.000000e+00> : vector<8x8xf32>
    %629 = tpu.matmul %628, %615, %cst_216 {dimension_numbers = #tpu.dot_dimension_numbers<[1], [0], [0], [1], [0, 0, 1, 1], [], []>} : vector<8x8xf32>, vector<8x8xf32>, vector<8x8xf32> -> vector<8x8xf32>
    %630 = vector.extract_strided_slice %612 {offsets = [0, 8], sizes = [8, 8], strides = [1, 1]} : vector<8x96xf32> to vector<8x8xf32>
    %631 = vector.extract_strided_slice %612 {offsets = [0, 40], sizes = [8, 8], strides = [1, 1]} : vector<8x96xf32> to vector<8x8xf32>
    %632 = vector.extract_strided_slice %612 {offsets = [0, 72], sizes = [8, 8], strides = [1, 1]} : vector<8x96xf32> to vector<8x8xf32>
    %cst_217 = arith.constant dense<0.000000e+00> : vector<8x8xf32>
    %633 = tpu.matmul %630, %631, %cst_217 {dimension_numbers = #tpu.dot_dimension_numbers<[1], [1], [0], [0], [0, 0, 1, 0], [], []>} : vector<8x8xf32>, vector<8x8xf32>, vector<8x8xf32> -> vector<8x8xf32>
    %cst_218 = arith.constant 0.353553385 : f32
    %634 = vector.broadcast %cst_218 : f32 to vector<8x8xf32>
    %635 = arith.mulf %633, %634 : vector<8x8xf32>
    %cst_219 = arith.constant dense<0xFF800000> : vector<8xf32>
    %636 = vector.multi_reduction <maximumf>, %635, %cst_219 [1] : vector<8x8xf32> to vector<8xf32>
    %637 = vector.shape_cast %636 : vector<8xf32> to vector<8x1xf32>
    %638 = vector.broadcast %637 : vector<8x1xf32> to vector<8x8xf32>
    %639 = arith.subf %635, %638 : vector<8x8xf32>
    %640 = math.exp %639 : vector<8x8xf32>
    %cst_220 = arith.constant dense<0.000000e+00> : vector<8xf32>
    %641 = vector.multi_reduction <add>, %640, %cst_220 [1] : vector<8x8xf32> to vector<8xf32>
    %642 = vector.shape_cast %641 : vector<8xf32> to vector<8x1xf32>
    %643 = tpu.reciprocal %642 {approx = true} : vector<8x1xf32> -> vector<8x1xf32>
    %644 = vector.broadcast %643 : vector<8x1xf32> to vector<8x8xf32>
    %645 = arith.mulf %640, %644 : vector<8x8xf32>
    %cst_221 = arith.constant dense<0.000000e+00> : vector<8x8xf32>
    %646 = tpu.matmul %645, %632, %cst_221 {dimension_numbers = #tpu.dot_dimension_numbers<[1], [0], [0], [1], [0, 0, 1, 1], [], []>} : vector<8x8xf32>, vector<8x8xf32>, vector<8x8xf32> -> vector<8x8xf32>
    %647 = vector.extract_strided_slice %612 {offsets = [0, 16], sizes = [8, 8], strides = [1, 1]} : vector<8x96xf32> to vector<8x8xf32>
    %648 = vector.extract_strided_slice %612 {offsets = [0, 48], sizes = [8, 8], strides = [1, 1]} : vector<8x96xf32> to vector<8x8xf32>
    %649 = vector.extract_strided_slice %612 {offsets = [0, 80], sizes = [8, 8], strides = [1, 1]} : vector<8x96xf32> to vector<8x8xf32>
    %cst_222 = arith.constant dense<0.000000e+00> : vector<8x8xf32>
    %650 = tpu.matmul %647, %648, %cst_222 {dimension_numbers = #tpu.dot_dimension_numbers<[1], [1], [0], [0], [0, 0, 1, 0], [], []>} : vector<8x8xf32>, vector<8x8xf32>, vector<8x8xf32> -> vector<8x8xf32>
    %cst_223 = arith.constant 0.353553385 : f32
    %651 = vector.broadcast %cst_223 : f32 to vector<8x8xf32>
    %652 = arith.mulf %650, %651 : vector<8x8xf32>
    %cst_224 = arith.constant dense<0xFF800000> : vector<8xf32>
    %653 = vector.multi_reduction <maximumf>, %652, %cst_224 [1] : vector<8x8xf32> to vector<8xf32>
    %654 = vector.shape_cast %653 : vector<8xf32> to vector<8x1xf32>
    %655 = vector.broadcast %654 : vector<8x1xf32> to vector<8x8xf32>
    %656 = arith.subf %652, %655 : vector<8x8xf32>
    %657 = math.exp %656 : vector<8x8xf32>
    %cst_225 = arith.constant dense<0.000000e+00> : vector<8xf32>
    %658 = vector.multi_reduction <add>, %657, %cst_225 [1] : vector<8x8xf32> to vector<8xf32>
    %659 = vector.shape_cast %658 : vector<8xf32> to vector<8x1xf32>
    %660 = tpu.reciprocal %659 {approx = true} : vector<8x1xf32> -> vector<8x1xf32>
    %661 = vector.broadcast %660 : vector<8x1xf32> to vector<8x8xf32>
    %662 = arith.mulf %657, %661 : vector<8x8xf32>
    %cst_226 = arith.constant dense<0.000000e+00> : vector<8x8xf32>
    %663 = tpu.matmul %662, %649, %cst_226 {dimension_numbers = #tpu.dot_dimension_numbers<[1], [0], [0], [1], [0, 0, 1, 1], [], []>} : vector<8x8xf32>, vector<8x8xf32>, vector<8x8xf32> -> vector<8x8xf32>
    %664 = vector.extract_strided_slice %612 {offsets = [0, 24], sizes = [8, 8], strides = [1, 1]} : vector<8x96xf32> to vector<8x8xf32>
    %665 = vector.extract_strided_slice %612 {offsets = [0, 56], sizes = [8, 8], strides = [1, 1]} : vector<8x96xf32> to vector<8x8xf32>
    %666 = vector.extract_strided_slice %612 {offsets = [0, 88], sizes = [8, 8], strides = [1, 1]} : vector<8x96xf32> to vector<8x8xf32>
    %cst_227 = arith.constant dense<0.000000e+00> : vector<8x8xf32>
    %667 = tpu.matmul %664, %665, %cst_227 {dimension_numbers = #tpu.dot_dimension_numbers<[1], [1], [0], [0], [0, 0, 1, 0], [], []>} : vector<8x8xf32>, vector<8x8xf32>, vector<8x8xf32> -> vector<8x8xf32>
    %cst_228 = arith.constant 0.353553385 : f32
    %668 = vector.broadcast %cst_228 : f32 to vector<8x8xf32>
    %669 = arith.mulf %667, %668 : vector<8x8xf32>
    %cst_229 = arith.constant dense<0xFF800000> : vector<8xf32>
    %670 = vector.multi_reduction <maximumf>, %669, %cst_229 [1] : vector<8x8xf32> to vector<8xf32>
    %671 = vector.shape_cast %670 : vector<8xf32> to vector<8x1xf32>
    %672 = vector.broadcast %671 : vector<8x1xf32> to vector<8x8xf32>
    %673 = arith.subf %669, %672 : vector<8x8xf32>
    %674 = math.exp %673 : vector<8x8xf32>
    %cst_230 = arith.constant dense<0.000000e+00> : vector<8xf32>
    %675 = vector.multi_reduction <add>, %674, %cst_230 [1] : vector<8x8xf32> to vector<8xf32>
    %676 = vector.shape_cast %675 : vector<8xf32> to vector<8x1xf32>
    %677 = tpu.reciprocal %676 {approx = true} : vector<8x1xf32> -> vector<8x1xf32>
    %678 = vector.broadcast %677 : vector<8x1xf32> to vector<8x8xf32>
    %679 = arith.mulf %674, %678 : vector<8x8xf32>
    %cst_231 = arith.constant dense<0.000000e+00> : vector<8x8xf32>
    %680 = tpu.matmul %679, %666, %cst_231 {dimension_numbers = #tpu.dot_dimension_numbers<[1], [0], [0], [1], [0, 0, 1, 1], [], []>} : vector<8x8xf32>, vector<8x8xf32>, vector<8x8xf32> -> vector<8x8xf32>
    %681 = tpu.concatenate %629, %646, %663, %680 in 1 : vector<8x8xf32>, vector<8x8xf32>, vector<8x8xf32>, vector<8x8xf32> -> vector<8x32xf32>
    %c1_232 = arith.constant 1 : index
    %c0_233 = arith.constant 0 : index
    %c96_234 = arith.constant 96 : index
    %682 = vector.load %arg10[%c1_232, %c0_233, %c96_234] : memref<2x192x128xf32, #tpu.memory_space<vmem>>, vector<1x32x32xf32>
    %683 = vector.shape_cast %682 : vector<1x32x32xf32> to vector<32x32xf32>
    %cst_235 = arith.constant dense<0.000000e+00> : vector<8x32xf32>
    %684 = tpu.matmul %681, %683, %cst_235 {dimension_numbers = #tpu.dot_dimension_numbers<[1], [0], [0], [1], [0, 0, 1, 1], [], []>} : vector<8x32xf32>, vector<32x32xf32>, vector<8x32xf32> -> vector<8x32xf32>
    %685 = vector.broadcast %581 : vector<1x32xf32> to vector<8x32xf32>
    %686 = arith.addf %684, %685 : vector<8x32xf32>
    %687 = arith.addf %575, %686 : vector<8x32xf32>
    %cst_236 = arith.constant dense<0.000000e+00> : vector<8xf32>
    %688 = vector.multi_reduction <add>, %687, %cst_236 [1] : vector<8x32xf32> to vector<8xf32>
    %689 = vector.shape_cast %688 : vector<8xf32> to vector<8x1xf32>
    %cst_237 = arith.constant 3.200000e+01 : f32
    %690 = vector.broadcast %cst_237 : f32 to vector<8x1xf32>
    %691 = arith.divf %689, %690 : vector<8x1xf32>
    %692 = vector.broadcast %691 : vector<8x1xf32> to vector<8x32xf32>
    %693 = arith.subf %687, %692 : vector<8x32xf32>
    %694 = arith.mulf %693, %693 : vector<8x32xf32>
    %cst_238 = arith.constant dense<0.000000e+00> : vector<8xf32>
    %695 = vector.multi_reduction <add>, %694, %cst_238 [1] : vector<8x32xf32> to vector<8xf32>
    %696 = vector.shape_cast %695 : vector<8xf32> to vector<8x1xf32>
    %cst_239 = arith.constant 3.200000e+01 : f32
    %697 = vector.broadcast %cst_239 : f32 to vector<8x1xf32>
    %698 = arith.divf %696, %697 : vector<8x1xf32>
    %699 = vector.broadcast %691 : vector<8x1xf32> to vector<8x32xf32>
    %700 = arith.subf %687, %699 : vector<8x32xf32>
    %cst_240 = arith.constant 9.99999996E-13 : f32
    %701 = vector.broadcast %cst_240 : f32 to vector<8x1xf32>
    %702 = arith.addf %698, %701 : vector<8x1xf32>
    %703 = math.rsqrt %702 : vector<8x1xf32>
    %704 = vector.broadcast %703 : vector<8x1xf32> to vector<8x32xf32>
    %705 = arith.mulf %700, %704 : vector<8x32xf32>
    %706 = vector.broadcast %582 : vector<1x32xf32> to vector<8x32xf32>
    %707 = arith.mulf %705, %706 : vector<8x32xf32>
    %708 = vector.broadcast %583 : vector<1x32xf32> to vector<8x32xf32>
    %709 = arith.addf %707, %708 : vector<8x32xf32>
    %c1_241 = arith.constant 1 : index
    %c32_242 = arith.constant 32 : index
    %c0_243 = arith.constant 0 : index
    %710 = vector.load %arg10[%c1_241, %c32_242, %c0_243] : memref<2x192x128xf32, #tpu.memory_space<vmem>>, vector<1x32x128xf32>
    %711 = vector.shape_cast %710 : vector<1x32x128xf32> to vector<32x128xf32>
    %cst_244 = arith.constant dense<0.000000e+00> : vector<8x128xf32>
    %712 = tpu.matmul %709, %711, %cst_244 {dimension_numbers = #tpu.dot_dimension_numbers<[1], [0], [0], [1], [0, 0, 1, 1], [], []>} : vector<8x32xf32>, vector<32x128xf32>, vector<8x128xf32> -> vector<8x128xf32>
    %713 = vector.broadcast %584 : vector<1x128xf32> to vector<8x128xf32>
    %714 = arith.addf %712, %713 : vector<8x128xf32>
    %cst_245 = arith.constant 5.000000e-01 : f32
    %715 = vector.broadcast %cst_245 : f32 to vector<8x128xf32>
    %716 = arith.mulf %715, %714 : vector<8x128xf32>
    %cst_246 = arith.constant 4.471500e-02 : f32
    %717 = vector.broadcast %cst_246 : f32 to vector<8x128xf32>
    %718 = arith.mulf %717, %714 : vector<8x128xf32>
    %719 = arith.mulf %718, %714 : vector<8x128xf32>
    %720 = arith.mulf %719, %714 : vector<8x128xf32>
    %721 = arith.addf %714, %720 : vector<8x128xf32>
    %cst_247 = arith.constant 0.797884583 : f32
    %722 = vector.broadcast %cst_247 : f32 to vector<8x128xf32>
    %723 = arith.mulf %722, %721 : vector<8x128xf32>
    %724 = math.tanh %723 : vector<8x128xf32>
    %cst_248 = arith.constant 1.000000e+00 : f32
    %725 = vector.broadcast %cst_248 : f32 to vector<8x128xf32>
    %726 = arith.addf %725, %724 : vector<8x128xf32>
    %727 = arith.mulf %716, %726 : vector<8x128xf32>
    %c1_249 = arith.constant 1 : index
    %c64_250 = arith.constant 64 : index
    %c0_251 = arith.constant 0 : index
    %728 = vector.load %arg10[%c1_249, %c64_250, %c0_251] : memref<2x192x128xf32, #tpu.memory_space<vmem>>, vector<1x128x32xf32>
    %729 = vector.shape_cast %728 : vector<1x128x32xf32> to vector<128x32xf32>
    %cst_252 = arith.constant dense<0.000000e+00> : vector<8x32xf32>
    %730 = tpu.matmul %727, %729, %cst_252 {dimension_numbers = #tpu.dot_dimension_numbers<[1], [0], [0], [1], [0, 0, 1, 1], [], []>} : vector<8x128xf32>, vector<128x32xf32>, vector<8x32xf32> -> vector<8x32xf32>
    %731 = vector.broadcast %585 : vector<1x32xf32> to vector<8x32xf32>
    %732 = arith.addf %730, %731 : vector<8x32xf32>
    %733 = arith.addf %687, %732 : vector<8x32xf32>
    %c33_253 = arith.constant 33 : index
    %c0_254 = arith.constant 0 : index
    %734 = vector.load %arg12[%c33_253, %c0_254] : memref<35x32xf32, #tpu.memory_space<vmem>>, vector<1x32xf32>
    %c34_255 = arith.constant 34 : index
    %c0_256 = arith.constant 0 : index
    %735 = vector.load %arg12[%c34_255, %c0_256] : memref<35x32xf32, #tpu.memory_space<vmem>>, vector<1x32xf32>
    %cst_257 = arith.constant dense<0.000000e+00> : vector<8xf32>
    %736 = vector.multi_reduction <add>, %733, %cst_257 [1] : vector<8x32xf32> to vector<8xf32>
    %737 = vector.shape_cast %736 : vector<8xf32> to vector<8x1xf32>
    %cst_258 = arith.constant 3.200000e+01 : f32
    %738 = vector.broadcast %cst_258 : f32 to vector<8x1xf32>
    %739 = arith.divf %737, %738 : vector<8x1xf32>
    %740 = vector.broadcast %739 : vector<8x1xf32> to vector<8x32xf32>
    %741 = arith.subf %733, %740 : vector<8x32xf32>
    %742 = arith.mulf %741, %741 : vector<8x32xf32>
    %cst_259 = arith.constant dense<0.000000e+00> : vector<8xf32>
    %743 = vector.multi_reduction <add>, %742, %cst_259 [1] : vector<8x32xf32> to vector<8xf32>
    %744 = vector.shape_cast %743 : vector<8xf32> to vector<8x1xf32>
    %cst_260 = arith.constant 3.200000e+01 : f32
    %745 = vector.broadcast %cst_260 : f32 to vector<8x1xf32>
    %746 = arith.divf %744, %745 : vector<8x1xf32>
    %747 = vector.broadcast %739 : vector<8x1xf32> to vector<8x32xf32>
    %748 = arith.subf %733, %747 : vector<8x32xf32>
    %cst_261 = arith.constant 9.99999996E-13 : f32
    %749 = vector.broadcast %cst_261 : f32 to vector<8x1xf32>
    %750 = arith.addf %746, %749 : vector<8x1xf32>
    %751 = math.rsqrt %750 : vector<8x1xf32>
    %752 = vector.broadcast %751 : vector<8x1xf32> to vector<8x32xf32>
    %753 = arith.mulf %748, %752 : vector<8x32xf32>
    %754 = vector.broadcast %734 : vector<1x32xf32> to vector<8x32xf32>
    %755 = arith.mulf %753, %754 : vector<8x32xf32>
    %756 = vector.broadcast %735 : vector<1x32xf32> to vector<8x32xf32>
    %757 = arith.addf %755, %756 : vector<8x32xf32>
    %c0_262 = arith.constant 0 : index
    %c0_263 = arith.constant 0 : index
    %758 = vector.load %arg12[%c0_262, %c0_263] : memref<35x32xf32, #tpu.memory_space<vmem>>, vector<32x32xf32>
    %cst_264 = arith.constant dense<0.000000e+00> : vector<8x32xf32>
    %759 = tpu.matmul %757, %758, %cst_264 {dimension_numbers = #tpu.dot_dimension_numbers<[1], [0], [0], [1], [0, 0, 1, 1], [], []>} : vector<8x32xf32>, vector<32x32xf32>, vector<8x32xf32> -> vector<8x32xf32>
    %c32_265 = arith.constant 32 : index
    %c0_266 = arith.constant 0 : index
    %760 = vector.load %arg12[%c32_265, %c0_266] : memref<35x32xf32, #tpu.memory_space<vmem>>, vector<1x32xf32>
    %761 = vector.broadcast %760 : vector<1x32xf32> to vector<8x32xf32>
    %762 = arith.addf %759, %761 : vector<8x32xf32>
    %c2_267 = arith.constant 2 : index
    %c0_268 = arith.constant 0 : index
    %763 = vector.load %arg15[%c2_267, %c0_268] : memref<3x32xf32, #tpu.memory_space<vmem>>, vector<1x32xf32>
    %764 = tpu.concatenate %763, %350, %762 in 0 : vector<1x32xf32>, vector<5x32xf32>, vector<8x32xf32> -> vector<14x32xf32>
    %c0_269 = arith.constant 0 : index
    %c0_270 = arith.constant 0 : index
    %c0_271 = arith.constant 0 : index
    %765 = vector.load %arg14[%c0_269, %c0_270, %c0_271] : memref<1x8x128xf32, #tpu.memory_space<vmem>>, vector<1x8x128xf32>
    %766 = vector.shape_cast %765 : vector<1x8x128xf32> to vector<8x128xf32>
    %767 = vector.extract_strided_slice %766 {offsets = [0, 0], sizes = [1, 32], strides = [1, 1]} : vector<8x128xf32> to vector<1x32xf32>
    %768 = vector.extract_strided_slice %766 {offsets = [1, 0], sizes = [1, 32], strides = [1, 1]} : vector<8x128xf32> to vector<1x32xf32>
    %769 = vector.extract_strided_slice %766 {offsets = [2, 0], sizes = [1, 96], strides = [1, 1]} : vector<8x128xf32> to vector<1x96xf32>
    %770 = vector.extract_strided_slice %766 {offsets = [3, 0], sizes = [1, 32], strides = [1, 1]} : vector<8x128xf32> to vector<1x32xf32>
    %771 = vector.extract_strided_slice %766 {offsets = [4, 0], sizes = [1, 32], strides = [1, 1]} : vector<8x128xf32> to vector<1x32xf32>
    %772 = vector.extract_strided_slice %766 {offsets = [5, 0], sizes = [1, 32], strides = [1, 1]} : vector<8x128xf32> to vector<1x32xf32>
    %773 = vector.extract_strided_slice %766 {offsets = [6, 0], sizes = [1, 128], strides = [1, 1]} : vector<8x128xf32> to vector<1x128xf32>
    %774 = vector.extract_strided_slice %766 {offsets = [7, 0], sizes = [1, 32], strides = [1, 1]} : vector<8x128xf32> to vector<1x32xf32>
    %cst_272 = arith.constant dense<0.000000e+00> : vector<14xf32>
    %775 = vector.multi_reduction <add>, %764, %cst_272 [1] : vector<14x32xf32> to vector<14xf32>
    %776 = vector.shape_cast %775 : vector<14xf32> to vector<14x1xf32>
    %cst_273 = arith.constant 3.200000e+01 : f32
    %777 = vector.broadcast %cst_273 : f32 to vector<14x1xf32>
    %778 = arith.divf %776, %777 : vector<14x1xf32>
    %779 = vector.broadcast %778 : vector<14x1xf32> to vector<14x32xf32>
    %780 = arith.subf %764, %779 : vector<14x32xf32>
    %781 = arith.mulf %780, %780 : vector<14x32xf32>
    %cst_274 = arith.constant dense<0.000000e+00> : vector<14xf32>
    %782 = vector.multi_reduction <add>, %781, %cst_274 [1] : vector<14x32xf32> to vector<14xf32>
    %783 = vector.shape_cast %782 : vector<14xf32> to vector<14x1xf32>
    %cst_275 = arith.constant 3.200000e+01 : f32
    %784 = vector.broadcast %cst_275 : f32 to vector<14x1xf32>
    %785 = arith.divf %783, %784 : vector<14x1xf32>
    %786 = vector.broadcast %778 : vector<14x1xf32> to vector<14x32xf32>
    %787 = arith.subf %764, %786 : vector<14x32xf32>
    %cst_276 = arith.constant 9.99999996E-13 : f32
    %788 = vector.broadcast %cst_276 : f32 to vector<14x1xf32>
    %789 = arith.addf %785, %788 : vector<14x1xf32>
    %790 = math.rsqrt %789 : vector<14x1xf32>
    %791 = vector.broadcast %790 : vector<14x1xf32> to vector<14x32xf32>
    %792 = arith.mulf %787, %791 : vector<14x32xf32>
    %793 = vector.broadcast %767 : vector<1x32xf32> to vector<14x32xf32>
    %794 = arith.mulf %792, %793 : vector<14x32xf32>
    %795 = vector.broadcast %768 : vector<1x32xf32> to vector<14x32xf32>
    %796 = arith.addf %794, %795 : vector<14x32xf32>
    %c0_277 = arith.constant 0 : index
    %c0_278 = arith.constant 0 : index
    %c0_279 = arith.constant 0 : index
    %797 = vector.load %arg13[%c0_277, %c0_278, %c0_279] : memref<1x192x128xf32, #tpu.memory_space<vmem>>, vector<1x32x96xf32>
    %798 = vector.shape_cast %797 : vector<1x32x96xf32> to vector<32x96xf32>
    %cst_280 = arith.constant dense<0.000000e+00> : vector<14x96xf32>
    %799 = tpu.matmul %796, %798, %cst_280 {dimension_numbers = #tpu.dot_dimension_numbers<[1], [0], [0], [1], [0, 0, 1, 1], [], []>} : vector<14x32xf32>, vector<32x96xf32>, vector<14x96xf32> -> vector<14x96xf32>
    %800 = vector.broadcast %769 : vector<1x96xf32> to vector<14x96xf32>
    %801 = arith.addf %799, %800 : vector<14x96xf32>
    %802 = vector.extract_strided_slice %801 {offsets = [0, 0], sizes = [14, 8], strides = [1, 1]} : vector<14x96xf32> to vector<14x8xf32>
    %803 = vector.extract_strided_slice %801 {offsets = [0, 32], sizes = [14, 8], strides = [1, 1]} : vector<14x96xf32> to vector<14x8xf32>
    %804 = vector.extract_strided_slice %801 {offsets = [0, 64], sizes = [14, 8], strides = [1, 1]} : vector<14x96xf32> to vector<14x8xf32>
    %cst_281 = arith.constant dense<0.000000e+00> : vector<14x14xf32>
    %805 = tpu.matmul %802, %803, %cst_281 {dimension_numbers = #tpu.dot_dimension_numbers<[1], [1], [0], [0], [0, 0, 1, 0], [], []>} : vector<14x8xf32>, vector<14x8xf32>, vector<14x14xf32> -> vector<14x14xf32>
    %cst_282 = arith.constant 0.353553385 : f32
    %806 = vector.broadcast %cst_282 : f32 to vector<14x14xf32>
    %807 = arith.mulf %805, %806 : vector<14x14xf32>
    %cst_283 = arith.constant dense<0xFF800000> : vector<14xf32>
    %808 = vector.multi_reduction <maximumf>, %807, %cst_283 [1] : vector<14x14xf32> to vector<14xf32>
    %809 = vector.shape_cast %808 : vector<14xf32> to vector<14x1xf32>
    %810 = vector.broadcast %809 : vector<14x1xf32> to vector<14x14xf32>
    %811 = arith.subf %807, %810 : vector<14x14xf32>
    %812 = math.exp %811 : vector<14x14xf32>
    %cst_284 = arith.constant dense<0.000000e+00> : vector<14xf32>
    %813 = vector.multi_reduction <add>, %812, %cst_284 [1] : vector<14x14xf32> to vector<14xf32>
    %814 = vector.shape_cast %813 : vector<14xf32> to vector<14x1xf32>
    %815 = tpu.reciprocal %814 {approx = true} : vector<14x1xf32> -> vector<14x1xf32>
    %816 = vector.broadcast %815 : vector<14x1xf32> to vector<14x14xf32>
    %817 = arith.mulf %812, %816 : vector<14x14xf32>
    %cst_285 = arith.constant dense<0.000000e+00> : vector<14x8xf32>
    %818 = tpu.matmul %817, %804, %cst_285 {dimension_numbers = #tpu.dot_dimension_numbers<[1], [0], [0], [1], [0, 0, 1, 1], [], []>} : vector<14x14xf32>, vector<14x8xf32>, vector<14x8xf32> -> vector<14x8xf32>
    %819 = vector.extract_strided_slice %801 {offsets = [0, 8], sizes = [14, 8], strides = [1, 1]} : vector<14x96xf32> to vector<14x8xf32>
    %820 = vector.extract_strided_slice %801 {offsets = [0, 40], sizes = [14, 8], strides = [1, 1]} : vector<14x96xf32> to vector<14x8xf32>
    %821 = vector.extract_strided_slice %801 {offsets = [0, 72], sizes = [14, 8], strides = [1, 1]} : vector<14x96xf32> to vector<14x8xf32>
    %cst_286 = arith.constant dense<0.000000e+00> : vector<14x14xf32>
    %822 = tpu.matmul %819, %820, %cst_286 {dimension_numbers = #tpu.dot_dimension_numbers<[1], [1], [0], [0], [0, 0, 1, 0], [], []>} : vector<14x8xf32>, vector<14x8xf32>, vector<14x14xf32> -> vector<14x14xf32>
    %cst_287 = arith.constant 0.353553385 : f32
    %823 = vector.broadcast %cst_287 : f32 to vector<14x14xf32>
    %824 = arith.mulf %822, %823 : vector<14x14xf32>
    %cst_288 = arith.constant dense<0xFF800000> : vector<14xf32>
    %825 = vector.multi_reduction <maximumf>, %824, %cst_288 [1] : vector<14x14xf32> to vector<14xf32>
    %826 = vector.shape_cast %825 : vector<14xf32> to vector<14x1xf32>
    %827 = vector.broadcast %826 : vector<14x1xf32> to vector<14x14xf32>
    %828 = arith.subf %824, %827 : vector<14x14xf32>
    %829 = math.exp %828 : vector<14x14xf32>
    %cst_289 = arith.constant dense<0.000000e+00> : vector<14xf32>
    %830 = vector.multi_reduction <add>, %829, %cst_289 [1] : vector<14x14xf32> to vector<14xf32>
    %831 = vector.shape_cast %830 : vector<14xf32> to vector<14x1xf32>
    %832 = tpu.reciprocal %831 {approx = true} : vector<14x1xf32> -> vector<14x1xf32>
    %833 = vector.broadcast %832 : vector<14x1xf32> to vector<14x14xf32>
    %834 = arith.mulf %829, %833 : vector<14x14xf32>
    %cst_290 = arith.constant dense<0.000000e+00> : vector<14x8xf32>
    %835 = tpu.matmul %834, %821, %cst_290 {dimension_numbers = #tpu.dot_dimension_numbers<[1], [0], [0], [1], [0, 0, 1, 1], [], []>} : vector<14x14xf32>, vector<14x8xf32>, vector<14x8xf32> -> vector<14x8xf32>
    %836 = vector.extract_strided_slice %801 {offsets = [0, 16], sizes = [14, 8], strides = [1, 1]} : vector<14x96xf32> to vector<14x8xf32>
    %837 = vector.extract_strided_slice %801 {offsets = [0, 48], sizes = [14, 8], strides = [1, 1]} : vector<14x96xf32> to vector<14x8xf32>
    %838 = vector.extract_strided_slice %801 {offsets = [0, 80], sizes = [14, 8], strides = [1, 1]} : vector<14x96xf32> to vector<14x8xf32>
    %cst_291 = arith.constant dense<0.000000e+00> : vector<14x14xf32>
    %839 = tpu.matmul %836, %837, %cst_291 {dimension_numbers = #tpu.dot_dimension_numbers<[1], [1], [0], [0], [0, 0, 1, 0], [], []>} : vector<14x8xf32>, vector<14x8xf32>, vector<14x14xf32> -> vector<14x14xf32>
    %cst_292 = arith.constant 0.353553385 : f32
    %840 = vector.broadcast %cst_292 : f32 to vector<14x14xf32>
    %841 = arith.mulf %839, %840 : vector<14x14xf32>
    %cst_293 = arith.constant dense<0xFF800000> : vector<14xf32>
    %842 = vector.multi_reduction <maximumf>, %841, %cst_293 [1] : vector<14x14xf32> to vector<14xf32>
    %843 = vector.shape_cast %842 : vector<14xf32> to vector<14x1xf32>
    %844 = vector.broadcast %843 : vector<14x1xf32> to vector<14x14xf32>
    %845 = arith.subf %841, %844 : vector<14x14xf32>
    %846 = math.exp %845 : vector<14x14xf32>
    %cst_294 = arith.constant dense<0.000000e+00> : vector<14xf32>
    %847 = vector.multi_reduction <add>, %846, %cst_294 [1] : vector<14x14xf32> to vector<14xf32>
    %848 = vector.shape_cast %847 : vector<14xf32> to vector<14x1xf32>
    %849 = tpu.reciprocal %848 {approx = true} : vector<14x1xf32> -> vector<14x1xf32>
    %850 = vector.broadcast %849 : vector<14x1xf32> to vector<14x14xf32>
    %851 = arith.mulf %846, %850 : vector<14x14xf32>
    %cst_295 = arith.constant dense<0.000000e+00> : vector<14x8xf32>
    %852 = tpu.matmul %851, %838, %cst_295 {dimension_numbers = #tpu.dot_dimension_numbers<[1], [0], [0], [1], [0, 0, 1, 1], [], []>} : vector<14x14xf32>, vector<14x8xf32>, vector<14x8xf32> -> vector<14x8xf32>
    %853 = vector.extract_strided_slice %801 {offsets = [0, 24], sizes = [14, 8], strides = [1, 1]} : vector<14x96xf32> to vector<14x8xf32>
    %854 = vector.extract_strided_slice %801 {offsets = [0, 56], sizes = [14, 8], strides = [1, 1]} : vector<14x96xf32> to vector<14x8xf32>
    %855 = vector.extract_strided_slice %801 {offsets = [0, 88], sizes = [14, 8], strides = [1, 1]} : vector<14x96xf32> to vector<14x8xf32>
    %cst_296 = arith.constant dense<0.000000e+00> : vector<14x14xf32>
    %856 = tpu.matmul %853, %854, %cst_296 {dimension_numbers = #tpu.dot_dimension_numbers<[1], [1], [0], [0], [0, 0, 1, 0], [], []>} : vector<14x8xf32>, vector<14x8xf32>, vector<14x14xf32> -> vector<14x14xf32>
    %cst_297 = arith.constant 0.353553385 : f32
    %857 = vector.broadcast %cst_297 : f32 to vector<14x14xf32>
    %858 = arith.mulf %856, %857 : vector<14x14xf32>
    %cst_298 = arith.constant dense<0xFF800000> : vector<14xf32>
    %859 = vector.multi_reduction <maximumf>, %858, %cst_298 [1] : vector<14x14xf32> to vector<14xf32>
    %860 = vector.shape_cast %859 : vector<14xf32> to vector<14x1xf32>
    %861 = vector.broadcast %860 : vector<14x1xf32> to vector<14x14xf32>
    %862 = arith.subf %858, %861 : vector<14x14xf32>
    %863 = math.exp %862 : vector<14x14xf32>
    %cst_299 = arith.constant dense<0.000000e+00> : vector<14xf32>
    %864 = vector.multi_reduction <add>, %863, %cst_299 [1] : vector<14x14xf32> to vector<14xf32>
    %865 = vector.shape_cast %864 : vector<14xf32> to vector<14x1xf32>
    %866 = tpu.reciprocal %865 {approx = true} : vector<14x1xf32> -> vector<14x1xf32>
    %867 = vector.broadcast %866 : vector<14x1xf32> to vector<14x14xf32>
    %868 = arith.mulf %863, %867 : vector<14x14xf32>
    %cst_300 = arith.constant dense<0.000000e+00> : vector<14x8xf32>
    %869 = tpu.matmul %868, %855, %cst_300 {dimension_numbers = #tpu.dot_dimension_numbers<[1], [0], [0], [1], [0, 0, 1, 1], [], []>} : vector<14x14xf32>, vector<14x8xf32>, vector<14x8xf32> -> vector<14x8xf32>
    %870 = tpu.concatenate %818, %835, %852, %869 in 1 : vector<14x8xf32>, vector<14x8xf32>, vector<14x8xf32>, vector<14x8xf32> -> vector<14x32xf32>
    %c0_301 = arith.constant 0 : index
    %c0_302 = arith.constant 0 : index
    %c96_303 = arith.constant 96 : index
    %871 = vector.load %arg13[%c0_301, %c0_302, %c96_303] : memref<1x192x128xf32, #tpu.memory_space<vmem>>, vector<1x32x32xf32>
    %872 = vector.shape_cast %871 : vector<1x32x32xf32> to vector<32x32xf32>
    %cst_304 = arith.constant dense<0.000000e+00> : vector<14x32xf32>
    %873 = tpu.matmul %870, %872, %cst_304 {dimension_numbers = #tpu.dot_dimension_numbers<[1], [0], [0], [1], [0, 0, 1, 1], [], []>} : vector<14x32xf32>, vector<32x32xf32>, vector<14x32xf32> -> vector<14x32xf32>
    %874 = vector.broadcast %770 : vector<1x32xf32> to vector<14x32xf32>
    %875 = arith.addf %873, %874 : vector<14x32xf32>
    %876 = arith.addf %764, %875 : vector<14x32xf32>
    %cst_305 = arith.constant dense<0.000000e+00> : vector<14xf32>
    %877 = vector.multi_reduction <add>, %876, %cst_305 [1] : vector<14x32xf32> to vector<14xf32>
    %878 = vector.shape_cast %877 : vector<14xf32> to vector<14x1xf32>
    %cst_306 = arith.constant 3.200000e+01 : f32
    %879 = vector.broadcast %cst_306 : f32 to vector<14x1xf32>
    %880 = arith.divf %878, %879 : vector<14x1xf32>
    %881 = vector.broadcast %880 : vector<14x1xf32> to vector<14x32xf32>
    %882 = arith.subf %876, %881 : vector<14x32xf32>
    %883 = arith.mulf %882, %882 : vector<14x32xf32>
    %cst_307 = arith.constant dense<0.000000e+00> : vector<14xf32>
    %884 = vector.multi_reduction <add>, %883, %cst_307 [1] : vector<14x32xf32> to vector<14xf32>
    %885 = vector.shape_cast %884 : vector<14xf32> to vector<14x1xf32>
    %cst_308 = arith.constant 3.200000e+01 : f32
    %886 = vector.broadcast %cst_308 : f32 to vector<14x1xf32>
    %887 = arith.divf %885, %886 : vector<14x1xf32>
    %888 = vector.broadcast %880 : vector<14x1xf32> to vector<14x32xf32>
    %889 = arith.subf %876, %888 : vector<14x32xf32>
    %cst_309 = arith.constant 9.99999996E-13 : f32
    %890 = vector.broadcast %cst_309 : f32 to vector<14x1xf32>
    %891 = arith.addf %887, %890 : vector<14x1xf32>
    %892 = math.rsqrt %891 : vector<14x1xf32>
    %893 = vector.broadcast %892 : vector<14x1xf32> to vector<14x32xf32>
    %894 = arith.mulf %889, %893 : vector<14x32xf32>
    %895 = vector.broadcast %771 : vector<1x32xf32> to vector<14x32xf32>
    %896 = arith.mulf %894, %895 : vector<14x32xf32>
    %897 = vector.broadcast %772 : vector<1x32xf32> to vector<14x32xf32>
    %898 = arith.addf %896, %897 : vector<14x32xf32>
    %c0_310 = arith.constant 0 : index
    %c32_311 = arith.constant 32 : index
    %c0_312 = arith.constant 0 : index
    %899 = vector.load %arg13[%c0_310, %c32_311, %c0_312] : memref<1x192x128xf32, #tpu.memory_space<vmem>>, vector<1x32x128xf32>
    %900 = vector.shape_cast %899 : vector<1x32x128xf32> to vector<32x128xf32>
    %cst_313 = arith.constant dense<0.000000e+00> : vector<14x128xf32>
    %901 = tpu.matmul %898, %900, %cst_313 {dimension_numbers = #tpu.dot_dimension_numbers<[1], [0], [0], [1], [0, 0, 1, 1], [], []>} : vector<14x32xf32>, vector<32x128xf32>, vector<14x128xf32> -> vector<14x128xf32>
    %902 = vector.broadcast %773 : vector<1x128xf32> to vector<14x128xf32>
    %903 = arith.addf %901, %902 : vector<14x128xf32>
    %cst_314 = arith.constant 5.000000e-01 : f32
    %904 = vector.broadcast %cst_314 : f32 to vector<14x128xf32>
    %905 = arith.mulf %904, %903 : vector<14x128xf32>
    %cst_315 = arith.constant 4.471500e-02 : f32
    %906 = vector.broadcast %cst_315 : f32 to vector<14x128xf32>
    %907 = arith.mulf %906, %903 : vector<14x128xf32>
    %908 = arith.mulf %907, %903 : vector<14x128xf32>
    %909 = arith.mulf %908, %903 : vector<14x128xf32>
    %910 = arith.addf %903, %909 : vector<14x128xf32>
    %cst_316 = arith.constant 0.797884583 : f32
    %911 = vector.broadcast %cst_316 : f32 to vector<14x128xf32>
    %912 = arith.mulf %911, %910 : vector<14x128xf32>
    %913 = math.tanh %912 : vector<14x128xf32>
    %cst_317 = arith.constant 1.000000e+00 : f32
    %914 = vector.broadcast %cst_317 : f32 to vector<14x128xf32>
    %915 = arith.addf %914, %913 : vector<14x128xf32>
    %916 = arith.mulf %905, %915 : vector<14x128xf32>
    %c0_318 = arith.constant 0 : index
    %c64_319 = arith.constant 64 : index
    %c0_320 = arith.constant 0 : index
    %917 = vector.load %arg13[%c0_318, %c64_319, %c0_320] : memref<1x192x128xf32, #tpu.memory_space<vmem>>, vector<1x128x32xf32>
    %918 = vector.shape_cast %917 : vector<1x128x32xf32> to vector<128x32xf32>
    %cst_321 = arith.constant dense<0.000000e+00> : vector<14x32xf32>
    %919 = tpu.matmul %916, %918, %cst_321 {dimension_numbers = #tpu.dot_dimension_numbers<[1], [0], [0], [1], [0, 0, 1, 1], [], []>} : vector<14x128xf32>, vector<128x32xf32>, vector<14x32xf32> -> vector<14x32xf32>
    %920 = vector.broadcast %774 : vector<1x32xf32> to vector<14x32xf32>
    %921 = arith.addf %919, %920 : vector<14x32xf32>
    %922 = arith.addf %876, %921 : vector<14x32xf32>
    %c0_322 = arith.constant 0 : index
    %c0_323 = arith.constant 0 : index
    %923 = vector.load %arg15[%c0_322, %c0_323] : memref<3x32xf32, #tpu.memory_space<vmem>>, vector<1x32xf32>
    %c1_324 = arith.constant 1 : index
    %c0_325 = arith.constant 0 : index
    %924 = vector.load %arg15[%c1_324, %c0_325] : memref<3x32xf32, #tpu.memory_space<vmem>>, vector<1x32xf32>
    %cst_326 = arith.constant dense<0.000000e+00> : vector<14xf32>
    %925 = vector.multi_reduction <add>, %922, %cst_326 [1] : vector<14x32xf32> to vector<14xf32>
    %926 = vector.shape_cast %925 : vector<14xf32> to vector<14x1xf32>
    %cst_327 = arith.constant 3.200000e+01 : f32
    %927 = vector.broadcast %cst_327 : f32 to vector<14x1xf32>
    %928 = arith.divf %926, %927 : vector<14x1xf32>
    %929 = vector.broadcast %928 : vector<14x1xf32> to vector<14x32xf32>
    %930 = arith.subf %922, %929 : vector<14x32xf32>
    %931 = arith.mulf %930, %930 : vector<14x32xf32>
    %cst_328 = arith.constant dense<0.000000e+00> : vector<14xf32>
    %932 = vector.multi_reduction <add>, %931, %cst_328 [1] : vector<14x32xf32> to vector<14xf32>
    %933 = vector.shape_cast %932 : vector<14xf32> to vector<14x1xf32>
    %cst_329 = arith.constant 3.200000e+01 : f32
    %934 = vector.broadcast %cst_329 : f32 to vector<14x1xf32>
    %935 = arith.divf %933, %934 : vector<14x1xf32>
    %936 = vector.broadcast %928 : vector<14x1xf32> to vector<14x32xf32>
    %937 = arith.subf %922, %936 : vector<14x32xf32>
    %cst_330 = arith.constant 9.99999996E-13 : f32
    %938 = vector.broadcast %cst_330 : f32 to vector<14x1xf32>
    %939 = arith.addf %935, %938 : vector<14x1xf32>
    %940 = math.rsqrt %939 : vector<14x1xf32>
    %941 = vector.broadcast %940 : vector<14x1xf32> to vector<14x32xf32>
    %942 = arith.mulf %937, %941 : vector<14x32xf32>
    %943 = vector.broadcast %923 : vector<1x32xf32> to vector<14x32xf32>
    %944 = arith.mulf %942, %943 : vector<14x32xf32>
    %945 = vector.broadcast %924 : vector<1x32xf32> to vector<14x32xf32>
    %946 = arith.addf %944, %945 : vector<14x32xf32>
    %c0_331 = arith.constant 0 : index
    %c0_332 = arith.constant 0 : index
    %c0_333 = arith.constant 0 : index
    %947 = vector.load %arg16[%c0_331, %c0_332, %c0_333] : memref<1x14x32xf32, #tpu.memory_space<vmem>>, vector<1x14x32xf32>
    %948 = vector.shape_cast %947 : vector<1x14x32xf32> to vector<14x32xf32>
    %949 = vector.shape_cast %946 : vector<14x32xf32> to vector<1x14x32xf32>
    tpu.vector_store %arg16[%c0_331, %c0_332, %c0_333], %949 {strides = array<i32>} : memref<1x14x32xf32, #tpu.memory_space<vmem>>, vector<1x14x32xf32>,
    return
  }
  func.func @transform_0(%arg0: i32, %arg1: memref<2x8xi32, #tpu.memory_space<smem>>) -> (i32, i32, i32) {
    %c0_i32 = arith.constant 0 : i32
    %c0_i32_0 = arith.constant 0 : i32
    %c0_i32_1 = arith.constant 0 : i32
    return %arg0, %c0_i32, %c0_i32_0 : i32, i32, i32
  }
  func.func @transform_1(%arg0: i32, %arg1: memref<2x8xi32, #tpu.memory_space<smem>>) -> (i32, i32) {
    %c0_i32 = arith.constant 0 : i32
    %c0_i32_0 = arith.constant 0 : i32
    %c0_i32_1 = arith.constant 0 : i32
    return %c0_i32, %c0_i32_0 : i32, i32
  }
  func.func @transform_2(%arg0: i32, %arg1: memref<2x8xi32, #tpu.memory_space<smem>>) -> (i32, i32) {
    %c0_i32 = arith.constant 0 : i32
    %c0_i32_0 = arith.constant 0 : i32
    %c0_i32_1 = arith.constant 0 : i32
    return %c0_i32, %c0_i32_0 : i32, i32
  }
  func.func @transform_3(%arg0: i32, %arg1: memref<2x8xi32, #tpu.memory_space<smem>>) -> (i32, i32, i32) {
    %c0_i32 = arith.constant 0 : i32
    %c0_i32_0 = arith.constant 0 : i32
    %c0_i32_1 = arith.constant 0 : i32
    %c0_i32_2 = arith.constant 0 : i32
    return %c0_i32, %c0_i32_0, %c0_i32_1 : i32, i32, i32
  }
  func.func @transform_4(%arg0: i32, %arg1: memref<2x8xi32, #tpu.memory_space<smem>>) -> (i32, i32, i32) {
    %c0_i32 = arith.constant 0 : i32
    %c0_i32_0 = arith.constant 0 : i32
    %c0_i32_1 = arith.constant 0 : i32
    %c0_i32_2 = arith.constant 0 : i32
    return %c0_i32, %c0_i32_0, %c0_i32_1 : i32, i32, i32
  }
  func.func @transform_5(%arg0: i32, %arg1: memref<2x8xi32, #tpu.memory_space<smem>>) -> (i32, i32) {
    %c0_i32 = arith.constant 0 : i32
    %c0_i32_0 = arith.constant 0 : i32
    %c0_i32_1 = arith.constant 0 : i32
    return %c0_i32, %c0_i32_0 : i32, i32
  }
  func.func @transform_6(%arg0: i32, %arg1: memref<2x8xi32, #tpu.memory_space<smem>>) -> (i32, i32, i32) {
    %c0_i32 = arith.constant 0 : i32
    %c0_i32_0 = arith.constant 0 : i32
    %c0_i32_1 = arith.constant 0 : i32
    %c0_i32_2 = arith.constant 0 : i32
    return %c0_i32, %c0_i32_0, %c0_i32_1 : i32, i32, i32
  }
  func.func @transform_7(%arg0: i32, %arg1: memref<2x8xi32, #tpu.memory_space<smem>>) -> (i32, i32) {
    %c0_i32 = arith.constant 0 : i32
    %c0_i32_0 = arith.constant 0 : i32
    %c0_i32_1 = arith.constant 0 : i32
    return %c0_i32, %c0_i32_0 : i32, i32
  }
  func.func @transform_8(%arg0: i32, %arg1: memref<2x8xi32, #tpu.memory_space<smem>>) -> (i32, i32, i32) {
    %c0_i32 = arith.constant 0 : i32
    %c0_i32_0 = arith.constant 0 : i32
    %c0_i32_1 = arith.constant 0 : i32
    %c0_i32_2 = arith.constant 0 : i32
    return %c0_i32, %c0_i32_0, %c0_i32_1 : i32, i32, i32
  }
  func.func @transform_9(%arg0: i32, %arg1: memref<2x8xi32, #tpu.memory_space<smem>>) -> (i32, i32, i32) {
    %c0_i32 = arith.constant 0 : i32
    %c0_i32_0 = arith.constant 0 : i32
    %c0_i32_1 = arith.constant 0 : i32
    %c0_i32_2 = arith.constant 0 : i32
    return %c0_i32, %c0_i32_0, %c0_i32_1 : i32, i32, i32
  }
  func.func @transform_10(%arg0: i32, %arg1: memref<2x8xi32, #tpu.memory_space<smem>>) -> (i32, i32) {
    %c0_i32 = arith.constant 0 : i32
    %c0_i32_0 = arith.constant 0 : i32
    %c0_i32_1 = arith.constant 0 : i32
    return %c0_i32, %c0_i32_0 : i32, i32
  }
  func.func @transform_11(%arg0: i32, %arg1: memref<2x8xi32, #tpu.memory_space<smem>>) -> (i32, i32, i32) {
    %c0_i32 = arith.constant 0 : i32
    %c0_i32_0 = arith.constant 0 : i32
    %c0_i32_1 = arith.constant 0 : i32
    %c0_i32_2 = arith.constant 0 : i32
    return %c0_i32, %c0_i32_0, %c0_i32_1 : i32, i32, i32
  }
  func.func @transform_12(%arg0: i32, %arg1: memref<2x8xi32, #tpu.memory_space<smem>>) -> (i32, i32, i32) {
    %c0_i32 = arith.constant 0 : i32
    %c0_i32_0 = arith.constant 0 : i32
    %c0_i32_1 = arith.constant 0 : i32
    %c0_i32_2 = arith.constant 0 : i32
    return %c0_i32, %c0_i32_0, %c0_i32_1 : i32, i32, i32
  }
  func.func @transform_13(%arg0: i32, %arg1: memref<2x8xi32, #tpu.memory_space<smem>>) -> (i32, i32) {
    %c0_i32 = arith.constant 0 : i32
    %c0_i32_0 = arith.constant 0 : i32
    %c0_i32_1 = arith.constant 0 : i32
    return %c0_i32, %c0_i32_0 : i32, i32
  }
  func.func @transform_14(%arg0: i32, %arg1: memref<2x8xi32, #tpu.memory_space<smem>>) -> (i32, i32, i32) {
    %c0_i32 = arith.constant 0 : i32
    %c0_i32_0 = arith.constant 0 : i32
    %c0_i32_1 = arith.constant 0 : i32
    return %arg0, %c0_i32, %c0_i32_0 : i32, i32, i32
  }
}

</mosaic_0001>

<bundles_post_ra>
// kernel: flava_forward.1
= control target key start
LH: loop header
LB: loop body
LE: loop exit
PB: predicated region body
PF: predicated region fallthrough
CT: control target
= control target key end

     0   :  { %s9561_s0 = inlined_call_operand.vmem [shape: s32[2,8], index: 0, kind: input, shape index: {}]   ;;  %s9562_s1 = inlined_call_operand.vmem [shape: f32[2,5,192], index: 1, kind: input, shape index: {}]   ;;  %s9563_s2 = inlined_call_operand.vmem [shape: f32[192,32], index: 2, kind: input, shape index: {}]   ;;  %s9564_s3 = inlined_call_operand.vmem [shape: f32[5,32], index: 3, kind: input, shape index: {}]   ;;  %s9565_s4 = inlined_call_operand.vmem [shape: f32[2,192,128], index: 4, kind: input, shape index: {}]   ;;  %s9566_s5 = inlined_call_operand.vmem [shape: f32[2,8,128], index: 5, kind: input, shape index: {}]   ;;  %s9567_s6 = inlined_call_operand.vmem [shape: f32[35,32], index: 6, kind: input, shape index: {}]   ;;  %s9568_s7 = inlined_call_operand.vmem [shape: f32[100,1,32], index: 7, kind: input, shape index: {}]   ;;  %s9569_s8 = inlined_call_operand.vmem [shape: f32[10,32], index: 8, kind: input, shape index: {}]   ;;  %s9570_s9 = inlined_call_operand.vmem [shape: f32[2,192,128], index: 9, kind: input, shape index: {}]   ;;  %s9571_s10 = inlined_call_operand.vmem [shape: f32[2,8,128], index: 10, kind: input, shape index: {}]   ;;  %s9572_s11 = inlined_call_operand.vmem [shape: f32[35,32], index: 11, kind: input, shape index: {}]   ;;  %s9573_s12 = inlined_call_operand.vmem [shape: f32[1,192,128], index: 12, kind: input, shape index: {}]   ;;  %s9574_s13 = inlined_call_operand.vmem [shape: f32[1,8,128], index: 13, kind: input, shape index: {}]   ;;  %s9575_s14 = inlined_call_operand.vmem [shape: f32[3,32], index: 14, kind: input, shape index: {}]   ;;  %s9576_s15 = inlined_call_operand.vmem [shape: f32[2,14,32], index: 15, kind: output, shape index: {}]  }
   0x1   :  { %9614 = sst [smem:[#allocation7_spill]] %s9562_s1  ;;  %s20_s20 = sshll.u32 %s9561_s0, 4  ;;  %s21_s20 = int_to_ptr.vmem [resolvable:$true] %s20_s20 }
   0x2   :  { %9615 = sst [smem:[#allocation8_spill]] %s9563_s2  ;;  %s7881_s21 = scalar_lea.vmem %s21_s20, 32 }
   0x3   :  { %9616 = sst [smem:[#allocation9_spill]] %s9564_s3  ;;  %p7882_p0 = scmp.ne.s32.totalorder %s21_s20, %s7881_s21 }
   0x4   :  { %9617 = sst [smem:[#allocation10_spill]] %s9566_s5  ;;  %p7886_p1 = scmp.lt.s32.totalorder %s21_s20, %s21_s20 }
   0x5   :  { %9618 = sst [smem:[#allocation11_spill]] %s9572_s11  ;;  %p7887_p2 = scmp.lt.s32.totalorder %s7881_s21, %s7881_s21 }
   0x6   :  { %9619 = sst [smem:[#allocation12_spill]] %s9573_s12 }
   0x7   :  { %9620 = sst [smem:[#allocation13_spill]] %s9574_s13  ;;  %p7888_p3 = por %p7887_p2, %p7886_p1 }
   0x8   :  { %9621 = sst [smem:[#allocation14_spill]] %s9575_s14 }
   0x9   :  { %9622 = sst [smem:[#allocation15_spill]] %s9576_s15  ;;  %p7889_p4 = pnand %p7888_p3, %p7882_p0 }
   0xb   :  { %7892 = shalt.err (!%p7889_p4)  }
   0xc   :  { %s7903_s22 = smov [#allocation3]  }
   0xd   :  { %23 = dma.vmem_to_smem %s21_s20, 32, %s7903_s22, [#allocation2] }
   0xe   :  { %7897 = dma.done.wait [#allocation2], 32 }
   0xf   :  { %7898 = vsyncadd [#allocation2], 4294967264 }
  0x10   :  { %25 = sfence }
  0x11   :  { %s8004_s23 = smov 0  }
  0x12 LB: > { %9623 = sst [smem:[#allocation5_spill]] %s7901_s23  ;;  %s8010_s0 = sadd.s32 4294967295, %s7901_s23   ;;  %s7901_s23 = sphi %s8004_s23, %s31_s23  }
  0x13   : > { %p6683_p5 = scmp.ge.s32.totalorder %s7901_s23, 1  ;;  %p419_p6 = scmp.lt.s32.totalorder %s7901_s23, 3 }
  0x15   : > { %p420_p7 = pnand %p6683_p5, %p419_p6 }
  0x17   : > { %423 = sbr.rel (%p420_p7) target bundleno = 18639 (0x48cf), region = 76 }
  0x1c   : > { %s9624_s2 = sld [smem:[#allocation8_spill]]  ;;  %p465_p8 = scmp.lt.s32.totalorder %s8010_s0, 1  ;;  %v7904_v1 = vmov 0.0   ;;  %vm502_vm0 = vcmask 523264   ;;  %vm577_vm1 = vcmask 258048   ;;  %v8138_v37 = vld [vmem:[%s9565_s4 + $0x18] sm:$0xff]  ;;  %v592_v44 = vlaneseq }
  0x1d   : > { %506 = vmatprep.subr.mxu0 %v7904_v1  ;;  %7135 = vmatprep.subr.mxu1 %v7904_v1  ;;  %s9626_s1 = sld [smem:[#allocation7_spill]]  ;;  %v8143_v38 = vld [vmem:[%s9565_s4 + $0x10] sm:$0xff]  ;;  %vm7905_vm2 = vmmov 0   ;;  %v8152_v39 = vld [vmem:[%s9565_s4 + $0x8] sm:$0xff]  ;;  %v8161_v40 = vld [vmem:[%s9565_s4] sm:$0xff]  ;;  %vm610_vm3 = vcmask 261120  }
  0x1e   : > { %s8024_s28 = scalar_select %p465_p8, %s8010_s0, 1  ;;  %7136 = vmatpush3.msra.mxu1 %v8138_v37  ;;  %7143 = vmatprep.mubr.msk.f32.mxu1 %vm7905_vm2, %v7904_v1  ;;  %v8167_v45 = vshrl.u32 %v592_v44, 7  ;;  %vm687_vm4 = vcmask 64512   ;;  %vm781_vm5 = vcmask 1044480   ;;  %vm763_vm6 = vcmask 36864  }
  0x1f   : > { %s9627_s3 = sld [smem:[#allocation9_spill]]  ;;  %7137 = vmatprep.subr.mxu1 %v7904_v1  ;;  %s9600_s17 = smov 64   ;;  %vm777_vm7 = vcmask 39936   ;;  %vm1368_vm8 = vcmask 130048   ;;  %vm1370_vm9 = vcmask 195584   ;;  %vm2938_vm10 = vcmask 1040384  }
  0x20   : > { %9625 = sst [smem:[#allocation6_spill]] %s8024_s28  ;;  %s9577_s16 = sshll.u32 %s8024_s28, 4  ;;  %7138 = vmatpush3.msra.mxu1 %v8143_v38  ;;  %v8170_v46 = vsub.s32 0, %v8167_v45  ;;  %v8178_v48 = vsub.s32 1, %v8167_v45  ;;  %v8188_v55 = vsub.s32 2, %v8167_v45  ;;  %vm2940_vm11 = vcmask 1041408  }
  0x21   : > { %7139 = vmatprep.subr.mxu1 %v7904_v1  ;;  %s9628_s5 = sld [smem:[#allocation10_spill]]  ;;  %s9606_s18 = smov 96   ;;  %vm2942_vm12 = vcmask 1042432   ;;  %vm2944_vm13 = vcmask 1043456   ;;  %vm2947_vm14 = vcmask 1045504   ;;  %vm2949_vm15 = vcmask 1046528  }
  0x22   : > { %v492_v0 = vld [vmem:[%s9624_s2 + $0x78] sm:$0xff]  ;;  %v491_v2 = vld [vmem:[%s9624_s2 + $0x70] sm:$0xff]  ;;  %v490_v3 = vld [vmem:[%s9624_s2 + $0x68] sm:$0xff]  ;;  %7140 = vmatpush3.msra.mxu1 %v8152_v39  ;;  %s9602_s19 = smov 120   ;;  %s9592_s20 = smov 56  }
  0x23   : > { %507 = vmatpush1.msra.mxu0 %v492_v0  ;;  %v489_v4 = vld [vmem:[%s9624_s2 + $0x60] sm:$0xff]  ;;  %s8040_s21 = scalar_lea.vmem %s9626_s1, %s9577_s16  ;;  %v488_v5 = vld [vmem:[%s9624_s2 + $0x58] sm:$0xff]  ;;  %v487_v7 = vld [vmem:[%s9624_s2 + $0x50] sm:$0xff]  ;;  %7141 = vmatprep.subr.mxu1 %v7904_v1  ;;  %s9598_s22 = smov 80  }
  0x24   : > { %508 = vmatprep.subr.mxu0 %v7904_v1  ;;  %v476_v6 = vld [vmem:[%s8040_s21 + $0x8] sm:$0x1f]  ;;  %v485_v9 = vld [vmem:[%s9624_s2 + $0x40] sm:$0xff]  ;;  %v484_v10 = vld [vmem:[%s9624_s2 + $0x38] sm:$0xff]  ;;  %7142 = vmatpush3.msra.mxu1 %v8161_v40  ;;  %s9596_s24 = smov 112   ;;  %s9578_s25 = smov 48  }
  0x25   : > { %509 = vmatpush1.msra.mxu0 %v491_v2  ;;  %6688 = vmatprep.mubr.msk.f32.mxu0 %vm502_vm0, %v476_v6  ;;  %v486_v8 = vld [vmem:[%s9624_s2 + $0x48] sm:$0xff]  ;;  %v483_v11 = vld [vmem:[%s9624_s2 + $0x30] sm:$0xff]  ;;  %v481_v13 = vld [vmem:[%s9624_s2 + $0x20] sm:$0xff]  ;;  %s9590_s26 = smov 72   ;;  %s9594_s27 = smov 104   ;;  %vm5262_vm0 = vcmask 259072  }
  0x26   : > { %510 = vmatprep.subr.mxu0 %v7904_v1  ;;  %v482_v12 = vld [vmem:[%s9624_s2 + $0x28] sm:$0xff]  ;;  %v480_v14 = vld [vmem:[%s9624_s2 + $0x18] sm:$0xff]  ;;  %v479_v15 = vld [vmem:[%s9624_s2 + $0x10] sm:$0xff]  ;;  %7146 = vmatprep.subr.mxu1 %v7904_v1  ;;  %s9586_s29 = smov 40   ;;  %s9588_s30 = smov 32  }
  0x27   : > { %511 = vmatpush1.msra.mxu0 %v490_v3  ;;  %v478_v16 = vld [vmem:[%s9624_s2 + $0x8] sm:$0xff]  ;;  %v477_v17 = vld [vmem:[%s9624_s2] sm:$0xff]  ;;  %v500_v18 = vld [vmem:[%s9624_s2 + $0xb8] sm:$0xff]  ;;  %s9584_s16 = smov 8  }
  0x28   : > { %512 = vmatprep.subr.mxu0 %v7904_v1  ;;  %v499_v19 = vld [vmem:[%s9624_s2 + $0xb0] sm:$0xff]  ;;  %v498_v20 = vld [vmem:[%s9624_s2 + $0xa8] sm:$0xff]  ;;  %v497_v21 = vld [vmem:[%s9624_s2 + $0xa0] sm:$0xff] }
  0x29   : > { %513 = vmatpush1.msra.mxu0 %v489_v4  ;;  %v496_v22 = vld [vmem:[%s9624_s2 + $0x98] sm:$0xff]  ;;  %v495_v23 = vld [vmem:[%s9624_s2 + $0x90] sm:$0xff]  ;;  %v494_v24 = vld [vmem:[%s9624_s2 + $0x88] sm:$0xff] }
  0x2a   : > { %514 = vmatprep.subr.mxu0 %v7904_v1  ;;  %v493_v25 = vld [vmem:[%s9624_s2 + $0x80] sm:$0xff] }
  0x2b   : > { %515 = vmatpush1.msra.mxu0 %v488_v5  ;;  %v475_v26 = vld [vmem:[%s8040_s21] sm:$0x1f]  ;;  %s9604_s21 = smov 88  }
  0x2c   : > { %516 = vmatprep.subr.mxu0 %v7904_v1  ;;  %v501_v27 = vld [vmem:[%s9627_s3] sm:$0x1f] }
  0x2d   : > { %517 = vmatpush1.msra.mxu0 %v487_v7  ;;  %v8175_v47 = vld [vmem:[%s9628_s5] sm:$0xff] }
  0x2e   : > { %518 = vmatprep.subr.mxu0 %v7904_v1  ;;  %v595_v49 = vrot.slane %v8175_v47, %v8170_v46  ;;  %v600_v52 = vrot.slane %v8175_v47, %v8178_v48  ;;  %v609_v56 = vrot.slane %v8175_v47, %v8188_v55 }
  0x2f   : > { %519 = vmatpush1.msra.mxu0 %v486_v8 }
  0x30   : > { %520 = vmatprep.subr.mxu0 %v7904_v1 }
  0x31   : > { %521 = vmatpush1.msra.mxu0 %v485_v9 }
  0x32   : > { %522 = vmatprep.subr.mxu0 %v7904_v1 }
  0x33   : > { %523 = vmatpush1.msra.mxu0 %v484_v10 }
  0x34   : > { %524 = vmatprep.subr.mxu0 %v7904_v1 }
  0x35   : > { %525 = vmatpush1.msra.mxu0 %v483_v11 }
  0x36   : > { %526 = vmatprep.subr.mxu0 %v7904_v1 }
  0x37   : > { %527 = vmatpush1.msra.mxu0 %v482_v12 }
  0x38   : > { %528 = vmatprep.subr.mxu0 %v7904_v1 }
  0x39   : > { %529 = vmatpush1.msra.mxu0 %v481_v13 }
  0x3a   : > { %530 = vmatprep.subr.mxu0 %v7904_v1 }
  0x3b   : > { %531 = vmatpush1.msra.mxu0 %v480_v14 }
  0x3c   : > { %532 = vmatprep.subr.mxu0 %v7904_v1 }
  0x3d   : > { %533 = vmatpush1.msra.mxu0 %v479_v15 }
  0x3e   : > { %534 = vmatprep.subr.mxu0 %v7904_v1 }
  0x3f   : > { %535 = vmatpush1.msra.mxu0 %v478_v16 }
  0x40   : > { %536 = vmatprep.subr.mxu0 %v7904_v1 }
  0x41   : > { %537 = vmatpush1.msra.mxu0 %v477_v17 }
  0x42   : > { %554 = vmatprep.subr.mxu0 %v7904_v1 }
  0x43   : > { %555 = vmatpush2.msra.mxu0 %v500_v18 }
  0x44   : > { %556 = vmatprep.subr.mxu0 %v7904_v1 }
  0x45   : > { %557 = vmatpush2.msra.mxu0 %v499_v19 }
  0x46   : > { %558 = vmatprep.subr.mxu0 %v7904_v1 }
  0x47   : > { %559 = vmatpush2.msra.mxu0 %v498_v20 }
  0x48   : > { %560 = vmatprep.subr.mxu0 %v7904_v1 }
  0x49   : > { %561 = vmatpush2.msra.mxu0 %v497_v21 }
  0x4a   : > { %562 = vmatprep.subr.mxu0 %v7904_v1 }
  0x4b   : > { %563 = vmatpush2.msra.mxu0 %v496_v22 }
  0x4c   : > { %564 = vmatprep.subr.mxu0 %v7904_v1 }
  0x4d   : > { %565 = vmatpush2.msra.mxu0 %v495_v23 }
  0x4e   : > { %566 = vmatprep.subr.mxu0 %v7904_v1 }
  0x4f   : > { %567 = vmatpush2.msra.mxu0 %v494_v24 }
  0x50   : > { %568 = vmatprep.subr.mxu0 %v7904_v1 }
  0x51   : > { %569 = vmatpush2.msra.mxu0 %v493_v25 }
  0x52   : > { %571 = vmatmul.mubr.f32.vlgmr.msra.gmra.mxu0 %v475_v26  ;;  %7254 = vmatprep.subr.mxu0 %v7904_v1 }
  0x53   : > { %7256 = vmatprep.mubr.msk.f32.mxu0 %vm7905_vm2, %v7904_v1 }
 0x112   : > { %v572_v28 = vpop.f32.mrf.mxu0 }
 0x113   : > { %v8129_v29 = vadd.f32 %v572_v28, %v501_v27 }
 0x114   : > { %v574_v30 = vpop.f32.mrf.mxu0 }
 0x115   : > { %v578_v31 = vsel %vm577_vm1, %v8129_v29, 0.0 }
 0x116   : > { %579 = vadd.xlane.f32.xlu0 %v578_v31 }
 0x19f   : > { %v580_v32 = vpop.xlane.xlu0 %579 }
 0x1a0   : > { %v582_v33 = vmul.f32 0.03125, %v580_v32 }
 0x1a2   : > { %v583_v34 = vsub.f32 %v8129_v29, %v582_v33 }
 0x1a4   : > { %v584_v35 = vmul.f32 %v583_v34, %v583_v34 }
 0x1a6   : > { %v585_v36 = vsel %vm577_vm1, %v584_v35, 0.0 }
 0x1a7   : > { %586 = vadd.xlane.f32.xlu0 %v585_v36 }
 0x230   : > { %v587_v41 = vpop.xlane.xlu0 %586 }
 0x231   : > { %v588_v42 = vmul.f32 0.03125, %v587_v41 }
 0x233   : > { %v589_v43 = vadd.f32 1e-12, %v588_v42 }
 0x235   : > { %7739 = vrsqrt.f32 %v589_v43 }
 0x242   : > { %v7740_v50 = vpop.eup %7739 }
 0x243   : > { %v591_v51 = vmul.f32 %v7740_v50, %v583_v34 }
 0x245   : > { %v596_v53 = vmul.f32 %v595_v49, %v591_v51 }
 0x247   : > { %v601_v54 = vadd.f32 %v600_v52, %v596_v53 }
 0x249   : > { %7144 = vmatmul.mubr.msk.f32.vlgmr.msra.gmra.mxu1 %vm610_vm3, %v601_v54 }
 0x24a   : > { %7148 = vmatprep.mubr.msk.f32.mxu1 %vm7905_vm2, %v7904_v1 }
 0x309   : > { %v680_v57 = vpop.f32.mrf.mxu1 }
 0x30a   : > { %v8192_v58 = vadd.f32 %v680_v57, %v609_v56 }
 0x30b   : > { %v7145_v59 = vpop.f32.mrf.mxu1 }
 0x30c   : > { %775 = vrot.lane.b32.xlu0 %v8192_v58, %s9600_s17  ;;  %685 = vrot.lane.b32.xlu1 %v8192_v58, %s9606_s18 }
 0x37e   : > { %v686_v60 = vpop.permute.xlu1 %685  ;;  %v776_v61 = vpop.permute.xlu0 %775 }
 0x37f   : > { %7147 = vmatpush3.xpose.msk.msra.mxu1 %vm687_vm4, %v686_v60 }
 0x380   : > { %7151 = vmatprep.subr.mxu1 %v7904_v1 }
 0x382   : > { %7149 = vmatmul.mubr.msk.f32.vlgmr.msra.gmra.mxu1 %vm687_vm4, %v8192_v58 }
 0x383   : > { %7152 = vmatpush3.msk.msra.mxu1 %vm781_vm5, %v776_v61  ;;  %7153 = vmatprep.mubr.msk.f32.mxu1 %vm7905_vm2, %v7904_v1 }
 0x384   : > { %7156 = vmatprep.subr.mxu1 %v7904_v1 }
 0x442   : > { %v758_v62 = vpop.f32.mrf.mxu1 }
 0x443   : > { %v762_v63 = vmul.f32 0.35355338, %v758_v62 }
 0x444   : > { %v7150_v0 = vpop.f32.mrf.mxu1 }
 0x445   : > { %v764_v2 = vsel %vm763_vm6, %v762_v63, -inf }
 0x446   : > { %765 = vmax.xlane.f32.xlu1 %v764_v2 }
 0x4cf   : > { %v766_v3 = vpop.xlane.xlu1 %765 }
 0x4d0   : > { %v767_v4 = vsub.f32 %v762_v63, %v766_v3 }
 0x4d2   : > { %v768_v5 = vmul.f32 1.442695, %v767_v4 }
 0x4d4   : > { %7741 = vpow2.f32 %v768_v5 }
 0x4e1   : > { %v7742_v6 = vpop.eup %7741 }
 0x4e2   : > { %v770_v7 = vsel %vm763_vm6, %v7742_v6, 0.0 }
 0x4e3   : > { %771 = vadd.xlane.f32.xlu0 %v770_v7 }
 0x4f9   : > { %856 = vrot.lane.b32.xlu0 %v8192_v58, %s9604_s21 }
 0x4fd   : > { %854 = vrot.lane.b32.xlu0 %v8192_v58, %s9602_s19 }
 0x56c   : > { %v772_v8 = vpop.xlane.xlu0 %771 }
 0x56d   : > { %7743 = vrcp.f32 %v772_v8 }
 0x570   : > { %v857_v10 = vpop.permute.xlu0 %856 }
 0x574   : > { %v855_v12 = vpop.permute.xlu0 %854 }
 0x57a   : > { %v7744_v9 = vpop.eup %7743 }
 0x57b   : > { %v774_v11 = vmul.f32 %v7744_v9, %v7742_v6 }
 0x57d   : > { %7154 = vmatmul.mubr.msk.f32.vlgmr.msra.gmra.mxu1 %vm777_vm7, %v774_v11 }
 0x57e   : > { %7157 = vmatpush3.xpose.msk.msra.mxu1 %vm687_vm4, %v857_v10  ;;  %7158 = vmatprep.mubr.msk.f32.mxu1 %vm7905_vm2, %v7904_v1 }
 0x57f   : > { %7161 = vmatprep.subr.mxu1 %v7904_v1 }
 0x581   : > { %7159 = vmatmul.mubr.msk.f32.vlgmr.msra.gmra.mxu1 %vm687_vm4, %v855_v12 }
 0x582   : > { %7163 = vmatprep.mubr.msk.f32.mxu1 %vm7905_vm2, %v7904_v1 }
 0x63d   : > { %v8220_v13 = vpop.f32.mrf.mxu1 }
 0x63f   : > { %v7155_v14 = vpop.f32.mrf.mxu1 }
 0x641   : > { %v928_v15 = vpop.f32.mrf.mxu1 }
 0x642   : > { %v932_v16 = vmul.f32 0.35355338, %v928_v15 }
 0x643   : > { %v7160_v17 = vpop.f32.mrf.mxu1 }
 0x644   : > { %v933_v18 = vsel %vm763_vm6, %v932_v16, -inf }
 0x645   : > { %934 = vmax.xlane.f32.xlu1 %v933_v18 }
 0x656   : > { %944 = vrot.lane.b32.xlu1 %v8192_v58, %s9592_s20  ;;  %s9636_s20 = smov 8  }
 0x65a   : > { %1023 = vrot.lane.b32.xlu1 %v8192_v58, %s9598_s22 }
 0x65e   : > { %1021 = vrot.lane.b32.xlu1 %v8192_v58, %s9596_s24  ;;  %s9629_s24 = smov 112  }
 0x6ce   : > { %v935_v19 = vpop.xlane.xlu1 %934 }
 0x6cf   : > { %v936_v20 = vsub.f32 %v932_v16, %v935_v19 }
 0x6d1   : > { %v937_v21 = vmul.f32 1.442695, %v936_v20 }
 0x6d2   : > { %v945_v22 = vpop.permute.xlu1 %944 }
 0x6d3   : > { %7745 = vpow2.f32 %v937_v21  ;;  %7162 = vmatpush3.msk.msra.mxu1 %vm781_vm5, %v945_v22 }
 0x6d4   : > { %7166 = vmatprep.subr.mxu1 %v7904_v1 }
 0x6d6   : > { %v1024_v27 = vpop.permute.xlu1 %1023 }
 0x6da   : > { %v1022_v30 = vpop.permute.xlu1 %1021 }
 0x6e0   : > { %v7746_v23 = vpop.eup %7745 }
 0x6e1   : > { %v939_v24 = vsel %vm763_vm6, %v7746_v23, 0.0 }
 0x6e2   : > { %940 = vadd.xlane.f32.xlu0 %v939_v24 }
 0x6f8   : > { %1111 = vrot.lane.b32.xlu0 %v8192_v58, %s9578_s25  ;;  %s9580_s25 = smov 16  }
 0x76b   : > { %v941_v25 = vpop.xlane.xlu0 %940 }
 0x76c   : > { %7747 = vrcp.f32 %v941_v25 }
 0x76f   : > { %v1112_v31 = vpop.permute.xlu0 %1111 }
 0x779   : > { %v7748_v26 = vpop.eup %7747 }
 0x77a   : > { %v943_v28 = vmul.f32 %v7748_v26, %v7746_v23 }
 0x77c   : > { %7164 = vmatmul.mubr.msk.f32.vlgmr.msra.gmra.mxu1 %vm777_vm7, %v943_v28 }
 0x77d   : > { %7167 = vmatpush3.xpose.msk.msra.mxu1 %vm687_vm4, %v1024_v27  ;;  %7168 = vmatprep.mubr.msk.f32.mxu1 %vm7905_vm2, %v7904_v1 }
 0x77e   : > { %7171 = vmatprep.subr.mxu1 %v7904_v1 }
 0x780   : > { %7169 = vmatmul.mubr.msk.f32.vlgmr.msra.gmra.mxu1 %vm687_vm4, %v1022_v30  ;;  %v1492_v30 = vld [vmem:[%s9565_s4 + $0x38] sm:$0xff] }
 0x781   : > { %7172 = vmatpush3.msk.msra.mxu1 %vm781_vm5, %v1112_v31  ;;  %7173 = vmatprep.mubr.msk.f32.mxu1 %vm7905_vm2, %v7904_v1  ;;  %v1490_v31 = vld [vmem:[%s9565_s4 + $0x28] sm:$0xff] }
 0x782   : > { %7176 = vmatprep.subr.mxu1 %v7904_v1 }
 0x83c   : > { %v1017_v32 = vpop.f32.mrf.mxu1 }
 0x83e   : > { %v7165_v33 = vpop.f32.mrf.mxu1 }
 0x840   : > { %v1095_v34 = vpop.f32.mrf.mxu1 }
 0x841   : > { %v1099_v35 = vmul.f32 0.35355338, %v1095_v34 }
 0x842   : > { %v7170_v36 = vpop.f32.mrf.mxu1 }
 0x843   : > { %v1100_v41 = vsel %vm763_vm6, %v1099_v35, -inf  ;;  %v8318_v36 = vsub.s32 4, %v8167_v45 }
 0x844   : > { %1101 = vmax.xlane.f32.xlu1 %v1100_v41  ;;  %v8321_v41 = vsub.s32 5, %v8167_v45 }
 0x8cd   : > { %v1102_v42 = vpop.xlane.xlu1 %1101 }
 0x8ce   : > { %v1103_v43 = vsub.f32 %v1099_v35, %v1102_v42  ;;  %v1482_v42 = vrot.slane %v8175_v47, %v8318_v36 }
 0x8d0   : > { %v1104_v44 = vmul.f32 1.442695, %v1103_v43 }
 0x8d2   : > { %7749 = vpow2.f32 %v1104_v44 }
 0x8df   : > { %v7750_v49 = vpop.eup %7749 }
 0x8e0   : > { %v1106_v50 = vsel %vm763_vm6, %v7750_v49, 0.0 }
 0x8e1   : > { %1107 = vadd.xlane.f32.xlu0 %v1106_v50 }
 0x8f7   : > { %1190 = vrot.lane.b32.xlu0 %v8192_v58, %s9590_s26  ;;  %s9631_s26 = smov 56  }
 0x8fb   : > { %1188 = vrot.lane.b32.xlu0 %v8192_v58, %s9594_s27  ;;  %s9632_s27 = smov 72  }
 0x96a   : > { %v1108_v51 = vpop.xlane.xlu0 %1107 }
 0x96b   : > { %7751 = vrcp.f32 %v1108_v51 }
 0x96e   : > { %v1191_v53 = vpop.permute.xlu0 %1190 }
 0x972   : > { %v1189_v56 = vpop.permute.xlu0 %1188 }
 0x978   : > { %v7752_v52 = vpop.eup %7751 }
 0x979   : > { %v1110_v54 = vmul.f32 %v7752_v52, %v7750_v49  ;;  %v1487_v49 = vrot.slane %v8175_v47, %v8321_v41  ;;  %v1594_v52 = vld [vmem:[%s9565_s4 + $0xb8] sm:$0xff] }
 0x97b   : > { %7174 = vmatmul.mubr.msk.f32.vlgmr.msra.gmra.mxu1 %vm777_vm7, %v1110_v54  ;;  %v1592_v54 = vld [vmem:[%s9565_s4 + $0xa8] sm:$0xff] }
 0x97c   : > { %7177 = vmatpush3.xpose.msk.msra.mxu1 %vm687_vm4, %v1191_v53  ;;  %7178 = vmatprep.mubr.msk.f32.mxu1 %vm7905_vm2, %v7904_v1  ;;  %v1593_v53 = vld [vmem:[%s9565_s4 + $0xb0] sm:$0xff] }
 0x97d   : > { %7181 = vmatprep.subr.mxu1 %v7904_v1 }
 0x97f   : > { %7179 = vmatmul.mubr.msk.f32.vlgmr.msra.gmra.mxu1 %vm687_vm4, %v1189_v56  ;;  %v1591_v56 = vld [vmem:[%s9565_s4 + $0xa0] sm:$0xff] }
 0x980   : > { %7183 = vmatprep.mubr.msk.f32.mxu1 %vm7905_vm2, %v7904_v1 }
 0xa3b   : > { %v1184_v57 = vpop.f32.mrf.mxu1 }
 0xa3d   : > { %v7175_v59 = vpop.f32.mrf.mxu1 }
 0xa3e   : > { %v1589_v59 = vld [vmem:[%s9565_s4 + $0x90] sm:$0xff] }
 0xa3f   : > { %v1262_v60 = vpop.f32.mrf.mxu1 }
 0xa40   : > { %v1266_v61 = vmul.f32 0.35355338, %v1262_v60  ;;  %v1588_v60 = vld [vmem:[%s9565_s4 + $0x88] sm:$0xff] }
 0xa41   : > { %v7180_v62 = vpop.f32.mrf.mxu1 }
 0xa42   : > { %v1267_v63 = vsel %vm763_vm6, %v1266_v61, -inf  ;;  %v1586_v62 = vld [vmem:[%s9565_s4 + $0x78] sm:$0xff] }
 0xa43   : > { %1268 = vmax.xlane.f32.xlu1 %v1267_v63  ;;  %v1585_v63 = vld [vmem:[%s9565_s4 + $0x70] sm:$0xff] }
 0xa54   : > { %1278 = vrot.lane.b32.xlu1 %v8192_v58, %s9586_s29  ;;  %s9633_s29 = smov 48  }
 0xa58   : > { %1386 = vrot.lane.b32.xlu1 %v8138_v37, %s9588_s30 }
 0xa5c   : > { %1384 = vrot.lane.b32.xlu1 %v8143_v38, %s9588_s30 }
 0xa60   : > { %1356 = vrot.lane.b32.xlu1 %v1017_v32, %s9584_s16  ;;  %v1489_v32 = vld [vmem:[%s9565_s4 + $0x20] sm:$0xff]  ;;  %s9635_s16 = smov 40  }
 0xa64   : > { %1360 = vrot.lane.b32.xlu1 %v1184_v57, %s9580_s25  ;;  %s9582_s25 = smov 24   ;;  %v1590_v57 = vld [vmem:[%s9565_s4 + $0x98] sm:$0xff] }
 0xacc   : > { %v1269_v0 = vpop.xlane.xlu1 %1268 }
 0xacd   : > { %v1270_v2 = vsub.f32 %v1266_v61, %v1269_v0  ;;  %v1587_v61 = vld [vmem:[%s9565_s4 + $0x80] sm:$0xff]  ;;  %v1584_v0 = vld [vmem:[%s9565_s4 + $0x68] sm:$0xff] }
 0xacf   : > { %v1271_v3 = vmul.f32 1.442695, %v1270_v2  ;;  %v1583_v2 = vld [vmem:[%s9565_s4 + $0x60] sm:$0xff] }
 0xad0   : > { %v1279_v4 = vpop.permute.xlu1 %1278 }
 0xad1   : > { %7753 = vpow2.f32 %v1271_v3  ;;  %7182 = vmatpush3.msk.msra.mxu1 %vm781_vm5, %v1279_v4  ;;  %v1582_v3 = vld [vmem:[%s9565_s4 + $0x58] sm:$0xff]  ;;  %v1581_v4 = vld [vmem:[%s9565_s4 + $0x50] sm:$0xff] }
 0xad2   : > { %7186 = vmatprep.subr.mxu1 %v7904_v1 }
 0xad4   : > { %v1387_v5 = vpop.permute.xlu1 %1386 }
 0xad8   : > { %v1385_v8 = vpop.permute.xlu1 %1384 }
 0xadc   : > { %v1357_v11 = vpop.permute.xlu1 %1356 }
 0xadd   : > { %v1367_v15 = vsel %vm687_vm4, %v8220_v13, %v1357_v11 }
 0xade   : > { %v7754_v58 = vpop.eup %7753 }
 0xadf   : > { %v1273_v37 = vsel %vm763_vm6, %v7754_v58, 0.0 }
 0xae0   : > { %1274 = vadd.xlane.f32.xlu0 %v1273_v37  ;;  %v1361_v12 = vpop.permute.xlu1 %1360  ;;  %v1579_v37 = vld [vmem:[%s9565_s4 + $0x40] sm:$0xff] }
 0xae1   : > { %v1369_v16 = vsel %vm1368_vm8, %v1367_v15, %v1361_v12 }
 0xaf6   : > { %1382 = vrot.lane.b32.xlu0 %v8152_v39, %s9588_s30 }
 0xb69   : > { %v1275_v38 = vpop.xlane.xlu0 %1274 }
 0xb6a   : > { %7755 = vrcp.f32 %v1275_v38  ;;  %v8395_v38 = vsub.s32 6, %v8167_v45 }
 0xb6d   : > { %v1383_v9 = vpop.permute.xlu0 %1382 }
 0xb77   : > { %v7756_v6 = vpop.eup %7755 }
 0xb78   : > { %v1277_v7 = vmul.f32 %v7756_v6, %v7754_v58  ;;  %v1580_v58 = vld [vmem:[%s9565_s4 + $0x48] sm:$0xff] }
 0xb7a   : > { %7184 = vmatmul.mubr.msk.f32.vlgmr.msra.gmra.mxu1 %vm777_vm7, %v1277_v7 }
 0xb7b   : > { %7187 = vmatpush3.msra.mxu1 %v1387_v5  ;;  %7194 = vmatprep.mubr.msk.f32.mxu1 %vm7905_vm2, %v7904_v1  ;;  %v1496_v5 = vrot.slane %v8175_v47, %v8395_v38 }
 0xb7c   : > { %7188 = vmatprep.subr.mxu1 %v7904_v1 }
 0xb7d   : > { %7189 = vmatpush3.msra.mxu1 %v1385_v8 }
 0xb7e   : > { %7190 = vmatprep.subr.mxu1 %v7904_v1 }
 0xb7f   : > { %7191 = vmatpush3.msra.mxu1 %v1383_v9 }
 0xb80   : > { %7192 = vmatprep.subr.mxu1 %v7904_v1 }
 0xc3a   : > { %v1351_v39 = vpop.f32.mrf.mxu1 }
 0xc3b   : > { %1364 = vrot.lane.b32.xlu1 %v1351_v39, %s9582_s25  ;;  %s9630_s25 = smov 104  }
 0xc3c   : > { %v7185_v10 = vpop.f32.mrf.mxu1 }
 0xc3f   : > { %1380 = vrot.lane.b32.xlu1 %v8161_v40, %s9588_s30  ;;  %v8290_v40 = vsub.s32 3, %v8167_v45  ;;  %s9634_s30 = smov 32  }
 0xc41   : > { %v1375_v19 = vrot.slane %v8175_v47, %v8290_v40 }
 0xcad   : > { %v1365_v14 = vpop.permute.xlu1 %1364 }
 0xcae   : > { %v1371_v18 = vsel %vm1370_vm9, %v1369_v16, %v1365_v14 }
 0xcb1   : > { %v1381_v17 = vpop.permute.xlu1 %1380 }
 0xcb2   : > { %7193 = vmatpush3.msra.mxu1 %v1381_v17 }
 0xcb3   : > { %7195 = vmatmul.mubr.msk.f32.vlgmr.msra.gmra.mxu1 %vm610_vm3, %v1371_v18  ;;  %7197 = vmatprep.subr.mxu1 %v7904_v1  ;;  %v8402_v18 = vsub.s32 7, %v8167_v45 }
 0xcb4   : > { %7205 = vmatprep.mubr.msk.f32.mxu1 %vm7905_vm2, %v7904_v1  ;;  %7198 = vmatpush3.msra.mxu1 %v1492_v30  ;;  %v8428_v30 = vld [vmem:[%s9565_s4 + $0xc8] sm:$0xff] }
 0xcb5   : > { %7199 = vmatprep.subr.mxu1 %v7904_v1 }
 0xd73   : > { %v1461_v13 = vpop.f32.mrf.mxu1 }
 0xd74   : > { %v1462_v20 = vadd.f32 %v1461_v13, %v1375_v19  ;;  %v1598_v19 = vrot.slane %v8175_v47, %v8402_v18  ;;  %v8416_v47 = vld [vmem:[%s9565_s4 + $0xd8] sm:$0xff] }
 0xd75   : > { %v7196_v21 = vpop.f32.mrf.mxu1 }
 0xd76   : > { %v8295_v22 = vadd.f32 %v1462_v20, %v8129_v29  ;;  %v1491_v29 = vld [vmem:[%s9565_s4 + $0x30] sm:$0xff] }
 0xd77   : > { %7200 = vmatpush3.msra.mxu1 %v1491_v29  ;;  %v8435_v29 = vld [vmem:[%s9565_s4 + $0xc0] sm:$0xff] }
 0xd78   : > { %v1466_v23 = vsel %vm577_vm1, %v8295_v22, 0.0  ;;  %7201 = vmatprep.subr.mxu1 %v7904_v1 }
 0xd79   : > { %1467 = vadd.xlane.f32.xlu1 %v1466_v23  ;;  %7202 = vmatpush3.msra.mxu1 %v1490_v31 }
 0xd7a   : > { %7203 = vmatprep.subr.mxu1 %v7904_v1 }
 0xd7b   : > { %7204 = vmatpush3.msra.mxu1 %v1489_v32 }
 0xd7c   : > { %7208 = vmatprep.subr.mxu1 %v7904_v1 }
 0xe02   : > { %v1468_v24 = vpop.xlane.xlu1 %1467 }
 0xe03   : > { %v1469_v25 = vmul.f32 0.03125, %v1468_v24 }
 0xe05   : > { %v1470_v26 = vsub.f32 %v8295_v22, %v1469_v25 }
 0xe07   : > { %v1471_v27 = vmul.f32 %v1470_v26, %v1470_v26 }
 0xe09   : > { %v1472_v28 = vsel %vm577_vm1, %v1471_v27, 0.0 }
 0xe0a   : > { %1473 = vadd.xlane.f32.xlu0 %v1472_v28 }
 0xe93   : > { %v1474_v33 = vpop.xlane.xlu0 %1473 }
 0xe94   : > { %v1475_v34 = vmul.f32 0.03125, %v1474_v33 }
 0xe96   : > { %v1476_v35 = vadd.f32 1e-12, %v1475_v34  ;;  %v8444_v34 = vld [vmem:[%s9628_s5 + $0x8] sm:$0xff] }
 0xe98   : > { %7757 = vrsqrt.f32 %v1476_v35  ;;  %v1688_v35 = vrot.slane %v8444_v34, %v8170_v46 }
 0xea5   : > { %v7758_v43 = vpop.eup %7757 }
 0xea6   : > { %v1478_v44 = vmul.f32 %v7758_v43, %v1470_v26 }
 0xea8   : > { %v1483_v50 = vmul.f32 %v1482_v42, %v1478_v44  ;;  %v1693_v44 = vrot.slane %v8444_v34, %v8178_v48 }
 0xeaa   : > { %v1488_v51 = vadd.f32 %v1487_v49, %v1483_v50 }
 0xeac   : > { %7206 = vmatmul.mubr.msk.f32.vlgmr.msra.gmra.mxu1 %vm610_vm3, %v1488_v51  ;;  %v1703_v51 = vrot.slane %v8444_v34, %v8188_v55 }
 0xead   : > { %7240 = vmatprep.mubr.msk.f32.mxu1 %vm7905_vm2, %v7904_v1  ;;  %7209 = vmatpush3.msra.mxu1 %v1594_v52 }
 0xeae   : > { %7210 = vmatprep.subr.mxu1 %v7904_v1 }
 0xeaf   : > { %7211 = vmatpush3.msra.mxu1 %v1593_v53 }
 0xeb0   : > { %7212 = vmatprep.subr.mxu1 %v7904_v1 }
 0xeb1   : > { %7213 = vmatpush3.msra.mxu1 %v1592_v54 }
 0xeb2   : > { %7214 = vmatprep.subr.mxu1 %v7904_v1 }
 0xeb3   : > { %7215 = vmatpush3.msra.mxu1 %v1591_v56 }
 0xeb4   : > { %7216 = vmatprep.subr.mxu1 %v7904_v1 }
 0xeb5   : > { %7217 = vmatpush3.msra.mxu1 %v1590_v57 }
 0xeb6   : > { %7218 = vmatprep.subr.mxu1 %v7904_v1 }
 0xeb7   : > { %7219 = vmatpush3.msra.mxu1 %v1589_v59 }
 0xeb8   : > { %7220 = vmatprep.subr.mxu1 %v7904_v1 }
 0xeb9   : > { %7221 = vmatpush3.msra.mxu1 %v1588_v60 }
 0xeba   : > { %7222 = vmatprep.subr.mxu1 %v7904_v1 }
 0xebb   : > { %7223 = vmatpush3.msra.mxu1 %v1587_v61 }
 0xebc   : > { %7224 = vmatprep.subr.mxu1 %v7904_v1 }
 0xebd   : > { %7225 = vmatpush3.msra.mxu1 %v1586_v62 }
 0xebe   : > { %7226 = vmatprep.subr.mxu1 %v7904_v1 }
 0xebf   : > { %7227 = vmatpush3.msra.mxu1 %v1585_v63 }
 0xec0   : > { %7228 = vmatprep.subr.mxu1 %v7904_v1 }
 0xec1   : > { %7229 = vmatpush3.msra.mxu1 %v1584_v0 }
 0xec2   : > { %7230 = vmatprep.subr.mxu1 %v7904_v1 }
 0xec3   : > { %7231 = vmatpush3.msra.mxu1 %v1583_v2 }
 0xec4   : > { %7232 = vmatprep.subr.mxu1 %v7904_v1 }
 0xec5   : > { %7233 = vmatpush3.msra.mxu1 %v1582_v3 }
 0xec6   : > { %7234 = vmatprep.subr.mxu1 %v7904_v1 }
 0xec7   : > { %7235 = vmatpush3.msra.mxu1 %v1581_v4 }
 0xec8   : > { %7236 = vmatprep.subr.mxu1 %v7904_v1 }
 0xec9   : > { %7237 = vmatpush3.msra.mxu1 %v1580_v58 }
 0xeca   : > { %7238 = vmatprep.subr.mxu1 %v7904_v1 }
 0xecb   : > { %7239 = vmatpush3.msra.mxu1 %v1579_v37 }
 0xecc   : > { %7243 = vmatprep.subr.mxu1 %v7904_v1 }
 0xf6c   : > { %v1566_v6 = vpop.f32.mrf.mxu1 }
 0xf6d   : > { %v1567_v7 = vadd.f32 %v1566_v6, %v1496_v5 }
 0xf6e   : > { %v7207_v8 = vpop.f32.mrf.mxu1 }
 0xf6f   : > { %v1571_v9 = vmul.f32 0.044715, %v1567_v7  ;;  %v1570_v15 = vmul.f32 0.5, %v1567_v7 }
 0xf71   : > { %v1572_v39 = vmul.f32 %v1571_v9, %v1567_v7 }
 0xf73   : > { %v1573_v10 = vmul.f32 %v1572_v39, %v1567_v7 }
 0xf75   : > { %v1574_v11 = vadd.f32 %v1573_v10, %v1567_v7 }
 0xf77   : > { %v1575_v12 = vmul.f32 0.7978846, %v1574_v11 }
 0xf79   : > { %7759 = vtanh.f32 %v1575_v12 }
 0xf86   : > { %v7760_v14 = vpop.eup %7759 }
 0xf87   : > { %v1577_v16 = vadd.f32 1.0, %v7760_v14 }
 0xf89   : > { %v1578_v17 = vmul.f32 %v1577_v16, %v1570_v15 }
 0xf8b   : > { %7241 = vmatmul.mubr.f32.vlgmr.msra.gmra.mxu1 %v1578_v17 }
 0xf8c   : > { %7251 = vmatprep.mubr.msk.f32.mxu1 %vm7905_vm2, %v7904_v1  ;;  %7244 = vmatpush3.msra.mxu1 %v8416_v47 }
 0xf8d   : > { %7245 = vmatprep.subr.mxu1 %v7904_v1 }
0x104b   : > { %v1665_v13 = vpop.f32.mrf.mxu1 }
0x104c   : > { %v1666_v20 = vadd.f32 %v1665_v13, %v1598_v19 }
0x104d   : > { %v7242_v21 = vpop.f32.mrf.mxu1 }
0x104e   : > { %v8407_v23 = vadd.f32 %v1666_v20, %v8295_v22  ;;  %v8421_v22 = vld [vmem:[%s9565_s4 + $0xd0] sm:$0xff] }
0x104f   : > { %7246 = vmatpush3.msra.mxu1 %v8421_v22 }
0x1050   : > { %v1672_v24 = vsel %vm577_vm1, %v8407_v23, 0.0  ;;  %7247 = vmatprep.subr.mxu1 %v7904_v1 }
0x1051   : > { %1673 = vadd.xlane.f32.xlu1 %v1672_v24  ;;  %7248 = vmatpush3.msra.mxu1 %v8428_v30 }
0x1052   : > { %7249 = vmatprep.subr.mxu1 %v7904_v1 }
0x1053   : > { %7250 = vmatpush3.msra.mxu1 %v8435_v29 }
0x1054   : > { %7279 = vmatprep.subr.mxu1 %v7904_v1 }
0x10da   : > { %v1674_v25 = vpop.xlane.xlu1 %1673 }
0x10db   : > { %v1675_v26 = vmul.f32 0.03125, %v1674_v25 }
0x10dd   : > { %v1676_v27 = vsub.f32 %v8407_v23, %v1675_v26 }
0x10df   : > { %v1677_v28 = vmul.f32 %v1676_v27, %v1676_v27 }
0x10e1   : > { %v1678_v45 = vsel %vm577_vm1, %v1677_v28, 0.0 }
0x10e2   : > { %1679 = vadd.xlane.f32.xlu1 %v1678_v45 }
0x116b   : > { %v1680_v31 = vpop.xlane.xlu1 %1679 }
0x116c   : > { %v1681_v32 = vmul.f32 0.03125, %v1680_v31 }
0x116e   : > { %v1682_v33 = vadd.f32 1e-12, %v1681_v32 }
0x1170   : > { %7761 = vrsqrt.f32 %v1682_v33 }
0x117d   : > { %v7762_v42 = vpop.eup %7761 }
0x117e   : > { %v1684_v43 = vmul.f32 %v7762_v42, %v1676_v27 }
0x1180   : > { %v1689_v49 = vmul.f32 %v1688_v35, %v1684_v43 }
0x1182   : > { %v1694_v50 = vadd.f32 %v1693_v44, %v1689_v49 }
0x1184   : > { %7252 = vmatmul.mubr.msk.f32.vlgmr.msra.gmra.mxu1 %vm610_vm3, %v1694_v50 }
0x1185   : > { %7281 = vmatprep.mubr.msk.f32.mxu1 %vm7905_vm2, %v7904_v1 }
0x1244   : > { %v1773_v52 = vpop.f32.mrf.mxu1 }
0x1245   : > { %v8455_v53 = vadd.f32 %v1773_v52, %v1703_v51 }
0x1246   : > { %v7253_v54 = vpop.f32.mrf.mxu1 }
0x1247   : > { %1778 = vrot.lane.b32.xlu0 %v8455_v53, %s9606_s18 }
0x124b   : > { %1945 = vrot.lane.b32.xlu0 %v8455_v53, %s9604_s21 }
0x124f   : > { %1943 = vrot.lane.b32.xlu0 %v8455_v53, %s9602_s19  ;;  %s8560_s19 = sshll.u32 %s8010_s0, 7 }
0x1250   : > { %s2868_s21 = sadd.s32 1, %s8560_s19  ;;  %s2865_s18 = sld [smem:[#allocation3 + %s8560_s19]] }
0x1251   : > { %s2869_s1 = sld [smem:[#allocation3 + %s2868_s21]]  ;;  %s2872_s2 = sadd.s32 2, %s8560_s19 }
0x1252   : > { %s2873_s3 = sld [smem:[#allocation3 + %s2872_s2]]  ;;  %s2876_s5 = sadd.s32 3, %s8560_s19 }
0x1253   : > { %s2877_s23 = sld [smem:[#allocation3 + %s2876_s5]]  ;;  %s2880_s15 = sadd.s32 4, %s8560_s19 }
0x1254   : > { %s2892_s12 = sadd.s32 7, %s8560_s19  ;;  %s9649_s21 = sld [smem:[#allocation11_spill]] }
0x1256   : > { %s2866_s0 = scalar_lea.vmem %s9568_s7, %s2865_s18  ;;  %s9642_s18 = smov 64  }
0x1257   : > { %s2870_s11 = scalar_lea.vmem %s9568_s7, %s2869_s1 }
0x1258   : > { %s2874_s2 = scalar_lea.vmem %s9568_s7, %s2873_s3  ;;  %s2893_s3 = sld [smem:[#allocation3 + %s2892_s12]] }
0x1259   : > { %s2878_s28 = scalar_lea.vmem %s9568_s7, %s2877_s23  ;;  %s9645_s23 = smov 40  }
0x12b9   : > { %v1779_v56 = vpop.permute.xlu0 %1778 }
0x12ba   : > { %7255 = vmatpush3.xpose.msk.msra.mxu0 %vm687_vm4, %v1779_v56 }
0x12bb   : > { %7259 = vmatprep.subr.mxu0 %v7904_v1 }
0x12bd   : > { %7257 = vmatmul.mubr.msk.f32.vlgmr.msra.gmra.mxu0 %vm687_vm4, %v8455_v53  ;;  %v1946_v5 = vpop.permute.xlu0 %1945 }
0x12be   : > { %7261 = vmatprep.mubr.msk.f32.mxu0 %vm7905_vm2, %v7904_v1 }
0x12c1   : > { %v1944_v7 = vpop.permute.xlu0 %1943 }
0x137d   : > { %v1850_v57 = vpop.f32.mrf.mxu0 }
0x137e   : > { %v1854_v59 = vmul.f32 0.35355338, %v1850_v57 }
0x137f   : > { %v7258_v60 = vpop.f32.mrf.mxu0 }
0x1380   : > { %v1855_v61 = vsel %vm763_vm6, %v1854_v59, -inf }
0x1381   : > { %1856 = vmax.xlane.f32.xlu1 %v1855_v61 }
0x140a   : > { %v1857_v62 = vpop.xlane.xlu1 %1856 }
0x140b   : > { %v1858_v63 = vsub.f32 %v1854_v59, %v1857_v62 }
0x140d   : > { %v1859_v0 = vmul.f32 1.442695, %v1858_v63 }
0x140f   : > { %7763 = vpow2.f32 %v1859_v0 }
0x141c   : > { %v7764_v2 = vpop.eup %7763 }
0x141d   : > { %v1861_v3 = vsel %vm763_vm6, %v7764_v2, 0.0 }
0x141e   : > { %1862 = vadd.xlane.f32.xlu1 %v1861_v3 }
0x142f   : > { %1866 = vrot.lane.b32.xlu1 %v8455_v53, %s9600_s17  ;;  %s9638_s17 = smov 24  }
0x14a7   : > { %v1863_v4 = vpop.xlane.xlu1 %1862 }
0x14a8   : > { %7765 = vrcp.f32 %v1863_v4 }
0x14ab   : > { %v1867_v58 = vpop.permute.xlu1 %1866 }
0x14ac   : > { %7260 = vmatpush3.msk.msra.mxu0 %vm781_vm5, %v1867_v58 }
0x14ad   : > { %7264 = vmatprep.subr.mxu0 %v7904_v1 }
0x14b5   : > { %v7766_v37 = vpop.eup %7765 }
0x14b6   : > { %v1865_v6 = vmul.f32 %v7766_v37, %v7764_v2 }
0x14b8   : > { %7262 = vmatmul.mubr.msk.f32.vlgmr.msra.gmra.mxu0 %vm777_vm7, %v1865_v6 }
0x14b9   : > { %7265 = vmatpush3.xpose.msk.msra.mxu0 %vm687_vm4, %v1946_v5  ;;  %7266 = vmatprep.mubr.msk.f32.mxu0 %vm7905_vm2, %v7904_v1 }
0x14ba   : > { %7269 = vmatprep.subr.mxu0 %v7904_v1 }
0x14bc   : > { %7267 = vmatmul.mubr.msk.f32.vlgmr.msra.gmra.mxu0 %vm687_vm4, %v1944_v7 }
0x14bd   : > { %7271 = vmatprep.mubr.msk.f32.mxu0 %vm7905_vm2, %v7904_v1 }
0x1578   : > { %v8483_v8 = vpop.f32.mrf.mxu0 }
0x157a   : > { %v7263_v9 = vpop.f32.mrf.mxu0 }
0x157c   : > { %v2017_v39 = vpop.f32.mrf.mxu0 }
0x157d   : > { %v2021_v10 = vmul.f32 0.35355338, %v2017_v39 }
0x157e   : > { %v7268_v11 = vpop.f32.mrf.mxu0 }
0x157f   : > { %v2022_v12 = vsel %vm763_vm6, %v2021_v10, -inf }
0x1580   : > { %2023 = vmax.xlane.f32.xlu1 %v2022_v12 }
0x1591   : > { %2112 = vrot.lane.b32.xlu1 %v8455_v53, %s9598_s22  ;;  %s9637_s22 = smov 16  }
0x1595   : > { %2110 = vrot.lane.b32.xlu1 %v8455_v53, %s9629_s24 }
0x1599   : > { %2277 = vrot.lane.b32.xlu1 %v8455_v53, %s9630_s25 }
0x1609   : > { %v2024_v14 = vpop.xlane.xlu1 %2023 }
0x160a   : > { %v2025_v15 = vsub.f32 %v2021_v10, %v2024_v14 }
0x160c   : > { %v2026_v16 = vmul.f32 1.442695, %v2025_v15 }
0x160d   : > { %v2113_v21 = vpop.permute.xlu1 %2112 }
0x160e   : > { %7767 = vpow2.f32 %v2026_v16 }
0x1611   : > { %v2111_v26 = vpop.permute.xlu1 %2110 }
0x1615   : > { %v2278_v28 = vpop.permute.xlu1 %2277 }
0x161b   : > { %v7768_v17 = vpop.eup %7767 }
0x161c   : > { %v2028_v19 = vsel %vm763_vm6, %v7768_v17, 0.0 }
0x161d   : > { %2029 = vadd.xlane.f32.xlu0 %v2028_v19 }
0x1633   : > { %2033 = vrot.lane.b32.xlu0 %v8455_v53, %s9631_s26 }
0x1637   : > { %2279 = vrot.lane.b32.xlu0 %v8455_v53, %s9632_s27 }
0x16a6   : > { %v2030_v13 = vpop.xlane.xlu0 %2029 }
0x16a7   : > { %7769 = vrcp.f32 %v2030_v13 }
0x16aa   : > { %v2034_v20 = vpop.permute.xlu0 %2033 }
0x16ab   : > { %7270 = vmatpush3.msk.msra.mxu0 %vm781_vm5, %v2034_v20 }
0x16ac   : > { %7274 = vmatprep.subr.mxu0 %v7904_v1 }
0x16ae   : > { %v2280_v27 = vpop.permute.xlu0 %2279 }
0x16b4   : > { %v7770_v24 = vpop.eup %7769 }
0x16b5   : > { %v2032_v25 = vmul.f32 %v7770_v24, %v7768_v17  ;;  %v6757_v24 = vld [vmem:[%s2870_s11] ss:$0 sm:$0xff]  ;;  %s9639_s11 = smov 96  }
0x16b7   : > { %7272 = vmatmul.mubr.msk.f32.vlgmr.msra.gmra.mxu0 %vm777_vm7, %v2032_v25  ;;  %v6758_v25 = vld [vmem:[%s2874_s2] ss:$0 sm:$0xff] }
0x16b8   : > { %7275 = vmatpush3.xpose.msk.msra.mxu0 %vm687_vm4, %v2113_v21  ;;  %7276 = vmatprep.mubr.msk.f32.mxu0 %vm7905_vm2, %v7904_v1 }
0x16b9   : > { %7284 = vmatprep.subr.mxu0 %v7904_v1 }
0x16bb   : > { %7277 = vmatmul.mubr.msk.f32.vlgmr.msra.gmra.mxu0 %vm687_vm4, %v2111_v26 }
0x16bc   : > { %7285 = vmatpush3.xpose.msk.msra.mxu0 %vm687_vm4, %v2280_v27  ;;  %7286 = vmatprep.mubr.msk.f32.mxu0 %vm7905_vm2, %v7904_v1  ;;  %v6759_v27 = vld [vmem:[%s2878_s28] ss:$0 sm:$0xff]  ;;  %s9652_s28 = sld [smem:[#allocation13_spill]] }
0x16bd   : > { %7294 = vmatprep.subr.mxu0 %v7904_v1 }
0x16bf   : > { %7287 = vmatmul.mubr.msk.f32.vlgmr.msra.gmra.mxu0 %vm687_vm4, %v2278_v28 }
0x16c0   : > { %7302 = vmatprep.mubr.msk.f32.mxu0 %vm7905_vm2, %v7904_v1 }
0x1777   : > { %v2106_v45 = vpop.f32.mrf.mxu0 }
0x1779   : > { %v7273_v31 = vpop.f32.mrf.mxu0 }
0x177b   : > { %v2184_v32 = vpop.f32.mrf.mxu0 }
0x177c   : > { %v2188_v33 = vmul.f32 0.35355338, %v2184_v32 }
0x177d   : > { %v7278_v35 = vpop.f32.mrf.mxu0 }
0x177e   : > { %v2189_v42 = vsel %vm763_vm6, %v2188_v33, -inf }
0x177f   : > { %2190 = vmax.xlane.f32.xlu0 %v2189_v42  ;;  %v2351_v43 = vpop.f32.mrf.mxu0 }
0x1780   : > { %v2355_v44 = vmul.f32 0.35355338, %v2351_v43 }
0x1781   : > { %v7288_v49 = vpop.f32.mrf.mxu0 }
0x1782   : > { %v2356_v50 = vsel %vm763_vm6, %v2355_v44, -inf }
0x1783   : > { %2357 = vmax.xlane.f32.xlu1 %v2356_v50 }
0x1794   : > { %2200 = vrot.lane.b32.xlu1 %v8455_v53, %s9633_s29 }
0x1798   : > { %2473 = vrot.lane.b32.xlu1 %v8416_v47, %s9634_s30 }
0x179c   : > { %2471 = vrot.lane.b32.xlu1 %v8421_v22, %s9634_s30 }
0x17a0   : > { %2469 = vrot.lane.b32.xlu1 %v8428_v30, %s9634_s30 }
0x1808   : > { %v2191_v51 = vpop.xlane.xlu0 %2190 }
0x1809   : > { %v2192_v52 = vsub.f32 %v2188_v33, %v2191_v51 }
0x180b   : > { %v2193_v54 = vmul.f32 1.442695, %v2192_v52  ;;  %v2951_v52 = vld [vmem:[%s9569_s8] sm:$0xff] }
0x180c   : > { %v2358_v56 = vpop.xlane.xlu1 %2357 }
0x180d   : > { %7771 = vpow2.f32 %v2193_v54  ;;  %v2359_v57 = vsub.f32 %v2355_v44, %v2358_v56 }
0x180f   : > { %v2360_v59 = vmul.f32 1.442695, %v2359_v57 }
0x1810   : > { %v2201_v60 = vpop.permute.xlu1 %2200 }
0x1811   : > { %7773 = vpow2.f32 %v2360_v59  ;;  %7280 = vmatpush3.msk.msra.mxu1 %vm781_vm5, %v2201_v60 }
0x1812   : > { %7289 = vmatprep.subr.mxu1 %v7904_v1 }
0x181a   : > { %v7772_v47 = vpop.eup %7771 }
0x181b   : > { %v2195_v61 = vsel %vm763_vm6, %v7772_v47, 0.0 }
0x181c   : > { %2196 = vadd.xlane.f32.xlu0 %v2195_v61  ;;  %v6733_v61 = vld [vmem:[%s9565_s4 + $0xf0] sm:$0xff] }
0x181e   : > { %v7774_v22 = vpop.eup %7773 }
0x181f   : > { %v2362_v30 = vsel %vm763_vm6, %v7774_v22, 0.0 }
0x1820   : > { %2363 = vadd.xlane.f32.xlu0 %v2362_v30  ;;  %v6731_v30 = vld [vmem:[%s9565_s4 + $0xe0] sm:$0xff] }
0x1836   : > { %2367 = vrot.lane.b32.xlu0 %v8455_v53, %s9635_s16  ;;  %v2474_v53 = vpop.permute.xlu1 %2473  ;;  %s2888_s16 = sadd.s32 6, %s8560_s19 }
0x1837   : > { %7295 = vmatpush3.msra.mxu0 %v2474_v53  ;;  %s2889_s1 = sld [smem:[#allocation3 + %s2888_s16]]  ;;  %s9648_s16 = smov 24  }
0x1838   : > { %7296 = vmatprep.subr.mxu0 %v7904_v1 }
0x183a   : > { %2445 = vrot.lane.b32.xlu0 %v2106_v45, %s9636_s20  ;;  %v2472_v37 = vpop.permute.xlu1 %2471 }
0x183b   : > { %7297 = vmatpush3.msra.mxu0 %v2472_v37  ;;  %v2569_v37 = vrot.slane %v8444_v34, %v8318_v36 }
0x183c   : > { %7298 = vmatprep.subr.mxu0 %v7904_v1 }
0x183e   : > { %v2470_v5 = vpop.permute.xlu1 %2469 }
0x183f   : > { %7299 = vmatpush3.msra.mxu0 %v2470_v5 }
0x1840   : > { %7300 = vmatprep.subr.mxu0 %v7904_v1 }
0x18a5   : > { %v2197_v62 = vpop.xlane.xlu0 %2196 }
0x18a6   : > { %7775 = vrcp.f32 %v2197_v62 }
0x18a9   : > { %v2364_v63 = vpop.xlane.xlu0 %2363 }
0x18aa   : > { %7777 = vrcp.f32 %v2364_v63 }
0x18ad   : > { %v2368_v3 = vpop.permute.xlu0 %2367 }
0x18b1   : > { %v2446_v10 = vpop.permute.xlu0 %2445 }
0x18b2   : > { %v2456_v12 = vsel %vm687_vm4, %v8483_v8, %v2446_v10  ;;  %v6751_v10 = vld [vmem:[%s9565_s4 + $0x178] sm:$0xff] }
0x18b3   : > { %v7776_v0 = vpop.eup %7775 }
0x18b4   : > { %v2199_v2 = vmul.f32 %v7776_v0, %v7772_v47  ;;  %v6734_v47 = vld [vmem:[%s9565_s4 + $0xf8] sm:$0xff] }
0x18b6   : > { %7282 = vmatmul.mubr.msk.f32.vlgmr.msra.gmra.mxu1 %vm777_vm7, %v2199_v2 }
0x18b7   : > { %v7778_v4 = vpop.eup %7777  ;;  %7290 = vmatpush3.msk.msra.mxu1 %vm781_vm5, %v2368_v3  ;;  %7291 = vmatprep.mubr.msk.f32.mxu1 %vm7905_vm2, %v7904_v1 }
0x18b8   : > { %v2366_v58 = vmul.f32 %v7778_v4, %v7774_v22  ;;  %7305 = vmatprep.subr.mxu1 %v7904_v1  ;;  %v6732_v22 = vld [vmem:[%s9565_s4 + $0xe8] sm:$0xff] }
0x18ba   : > { %7292 = vmatmul.mubr.msk.f32.vlgmr.msra.gmra.mxu1 %vm777_vm7, %v2366_v58 }
0x18bb   : > { %7313 = vmatprep.mubr.msk.f32.mxu1 %vm7905_vm2, %v7904_v1  ;;  %7306 = vmatpush3.msra.mxu1 %v6734_v47 }
0x18bc   : > { %7307 = vmatprep.subr.mxu1 %v7904_v1 }
0x18bd   : > { %7308 = vmatpush3.msra.mxu1 %v6733_v61 }
0x18be   : > { %7309 = vmatprep.subr.mxu1 %v7904_v1 }
0x18bf   : > { %7310 = vmatpush3.msra.mxu1 %v6732_v22 }
0x18c0   : > { %7311 = vmatprep.subr.mxu1 %v7904_v1 }
0x18c1   : > { %7312 = vmatpush3.msra.mxu1 %v6731_v30 }
0x18c2   : > { %7351 = vmatprep.subr.mxu1 %v7904_v1 }
0x1976   : > { %v2273_v6 = vpop.f32.mrf.mxu1 }
0x1977   : > { %2449 = vrot.lane.b32.xlu0 %v2273_v6, %s9637_s22  ;;  %s2884_s22 = sadd.s32 5, %s8560_s19  ;;  %s2890_s19 = scalar_lea.vmem %s9568_s7, %s2889_s1 }
0x1978   : > { %v7283_v7 = vpop.f32.mrf.mxu1  ;;  %s2885_s5 = sld [smem:[#allocation3 + %s2884_s22]]  ;;  %v6762_v35 = vld [vmem:[%s2890_s19] ss:$0 sm:$0xff]  ;;  %s9643_s22 = smov 80  }
0x1979   : > { %v2574_v7 = vrot.slane %v8444_v34, %v8321_v41  ;;  %s9647_s19 = smov 16  }
0x197a   : > { %v2440_v9 = vpop.f32.mrf.mxu1 }
0x197b   : > { %2467 = vrot.lane.b32.xlu0 %v8435_v29, %s9634_s30  ;;  %2453 = vrot.lane.b32.xlu1 %v2440_v9, %s9638_s17  ;;  %v2462_v29 = vrot.slane %v8444_v34, %v8290_v40  ;;  %s2881_s17 = sld [smem:[#allocation3 + %s2880_s15]]  ;;  %s9646_s30 = smov 8  }
0x197c   : > { %v7293_v39 = vpop.f32.mrf.mxu1 }
0x197e   : > { %s2886_s20 = scalar_lea.vmem %s9568_s7, %s2885_s5  ;;  %s9651_s5 = sld [smem:[#allocation12_spill]] }
0x197f   : > { %v6761_v32 = vld [vmem:[%s2886_s20] ss:$0 sm:$0xff]  ;;  %s9644_s20 = smov 32  }
0x1981   : > { %s2882_s15 = scalar_lea.vmem %s9568_s7, %s2881_s17  ;;  %s2894_s17 = scalar_lea.vmem %s9568_s7, %s2893_s3 }
0x1982   : > { %v6760_v45 = vld [vmem:[%s2882_s15] ss:$0 sm:$0xff]  ;;  %s9640_s15 = smov 88   ;;  %s9641_s3 = smov 120  }
0x1983   : > { %v6763_v43 = vld [vmem:[%s2894_s17] ss:$0 sm:$0xff]  ;;  %s9653_s17 = sld [smem:[#allocation6_spill]] }
0x19e9   : > { %v2450_v11 = vpop.permute.xlu0 %2449 }
0x19ea   : > { %v2457_v14 = vsel %vm1368_vm8, %v2456_v12, %v2450_v11  ;;  %v6750_v11 = vld [vmem:[%s9565_s4 + $0x170] sm:$0xff]  ;;  %v6749_v12 = vld [vmem:[%s9565_s4 + $0x168] sm:$0xff] }
0x19ed   : > { %v2468_v15 = vpop.permute.xlu0 %2467  ;;  %v2454_v16 = vpop.permute.xlu1 %2453 }
0x19ee   : > { %v2458_v17 = vsel %vm1370_vm9, %v2457_v14, %v2454_v16  ;;  %7301 = vmatpush3.msra.mxu0 %v2468_v15  ;;  %v6748_v14 = vld [vmem:[%s9565_s4 + $0x160] sm:$0xff]  ;;  %v6747_v15 = vld [vmem:[%s9565_s4 + $0x158] sm:$0xff]  ;;  %v6746_v16 = vld [vmem:[%s9565_s4 + $0x150] sm:$0xff] }
0x19ef   : > { %7303 = vmatmul.mubr.msk.f32.vlgmr.msra.gmra.mxu0 %vm610_vm3, %v2458_v17  ;;  %7316 = vmatprep.subr.mxu0 %v7904_v1  ;;  %v6745_v17 = vld [vmem:[%s9565_s4 + $0x148] sm:$0xff] }
0x19f0   : > { %7348 = vmatprep.mubr.msk.f32.mxu0 %vm7905_vm2, %v7904_v1  ;;  %7317 = vmatpush3.msra.mxu0 %v6751_v10 }
0x19f1   : > { %7318 = vmatprep.subr.mxu0 %v7904_v1 }
0x19f2   : > { %7319 = vmatpush3.msra.mxu0 %v6750_v11 }
0x19f3   : > { %7320 = vmatprep.subr.mxu0 %v7904_v1 }
0x19f4   : > { %7321 = vmatpush3.msra.mxu0 %v6749_v12  ;;  %v2785_v12 = vld [vmem:[%s9567_s6 + $0x18] sm:$0xff] }
0x19f5   : > { %7322 = vmatprep.subr.mxu0 %v7904_v1 }
0x19f6   : > { %7323 = vmatpush3.msra.mxu0 %v6748_v14  ;;  %v2782_v14 = vld [vmem:[%s9567_s6] sm:$0xff] }
0x19f7   : > { %7324 = vmatprep.subr.mxu0 %v7904_v1 }
0x19f8   : > { %7325 = vmatpush3.msra.mxu0 %v6747_v15 }
0x19f9   : > { %7326 = vmatprep.subr.mxu0 %v7904_v1 }
0x19fa   : > { %7327 = vmatpush3.msra.mxu0 %v6746_v16 }
0x19fb   : > { %7328 = vmatprep.subr.mxu0 %v7904_v1 }
0x19fc   : > { %7329 = vmatpush3.msra.mxu0 %v6745_v17 }
0x19fd   : > { %7330 = vmatprep.subr.mxu0 %v7904_v1 }
0x1aaf   : > { %v2548_v19 = vpop.f32.mrf.mxu0 }
0x1ab0   : > { %v2549_v8 = vadd.f32 %v2548_v19, %v2462_v29  ;;  %v6744_v29 = vld [vmem:[%s9565_s4 + $0x140] sm:$0xff]  ;;  %v6743_v19 = vld [vmem:[%s9565_s4 + $0x138] sm:$0xff] }
0x1ab1   : > { %v7304_v13 = vpop.f32.mrf.mxu0  ;;  %7331 = vmatpush3.msra.mxu0 %v6744_v29 }
0x1ab2   : > { %v8555_v20 = vadd.f32 %v2549_v8, %v8407_v23  ;;  %v2867_v23 = vld [vmem:[%s2866_s0] sm:$0x1]  ;;  %7332 = vmatprep.subr.mxu0 %v7904_v1  ;;  %v6742_v8 = vld [vmem:[%s9565_s4 + $0x130] sm:$0xff]  ;;  %v6741_v13 = vld [vmem:[%s9565_s4 + $0x128] sm:$0xff]  ;;  %s9650_s0 = sld [smem:[#allocation14_spill]] }
0x1ab3   : > { %v2939_v26 = vsel %vm2938_vm10, %v2867_v23, %v6757_v24  ;;  %7333 = vmatpush3.msra.mxu0 %v6743_v19  ;;  %v6739_v23 = vld [vmem:[%s9565_s4 + $0x118] sm:$0xff]  ;;  %v6738_v24 = vld [vmem:[%s9565_s4 + $0x110] sm:$0xff] }
0x1ab4   : > { %v2553_v21 = vsel %vm577_vm1, %v8555_v20, 0.0  ;;  %v2941_v28 = vsel %vm2940_vm11, %v2939_v26, %v6758_v25  ;;  %7334 = vmatprep.subr.mxu0 %v7904_v1  ;;  %v6737_v25 = vld [vmem:[%s9565_s4 + $0x108] sm:$0xff]  ;;  %v6736_v26 = vld [vmem:[%s9565_s4 + $0x100] sm:$0xff] }
0x1ab5   : > { %2554 = vadd.xlane.f32.xlu1 %v2553_v21  ;;  %v2943_v31 = vsel %vm2942_vm12, %v2941_v28, %v6759_v27  ;;  %7335 = vmatpush3.msra.mxu0 %v6742_v8  ;;  %v6740_v21 = vld [vmem:[%s9565_s4 + $0x120] sm:$0xff] }
0x1ab6   : > { %v2945_v33 = vsel %vm2944_vm13, %v2943_v31, %v6760_v45  ;;  %7336 = vmatprep.subr.mxu0 %v7904_v1 }
0x1ab7   : > { %v2946_v42 = vsel %vm781_vm5, %v2945_v33, %v6761_v32  ;;  %7337 = vmatpush3.msra.mxu0 %v6741_v13  ;;  %v6764_v32 = vld [vmem:[%s9569_s8 + $0x8] ss:$0 sm:$0xff] }
0x1ab8   : > { %v2948_v44 = vsel %vm2947_vm14, %v2946_v42, %v6762_v35  ;;  %7338 = vmatprep.subr.mxu0 %v7904_v1  ;;  %v6765_v35 = vld [vmem:[%s9569_s8 + $0x9] ss:$0 sm:$0xff] }
0x1ab9   : > { %v2950_v51 = vsel %vm2949_vm15, %v2948_v44, %v6763_v43  ;;  %7339 = vmatpush3.msra.mxu0 %v6740_v21  ;;  %v6752_v21 = vld [vmem:[%s9567_s6 + $0x21] ss:$0 sm:$0xff] }
0x1aba   : > { %v2952_v57 = vadd.f32 %v2951_v52, %v2950_v51  ;;  %7340 = vmatprep.subr.mxu0 %v7904_v1 }
0x1abb   : > { %7341 = vmatpush3.msra.mxu0 %v6739_v23 }
0x1abc   : > { %v2955_v60 = vsel %vm610_vm3, %v2952_v57, 0.0  ;;  %7342 = vmatprep.subr.mxu0 %v7904_v1 }
0x1abd   : > { %7343 = vmatpush3.msra.mxu0 %v6738_v24 }
0x1abe   : > { %7344 = vmatprep.subr.mxu0 %v7904_v1 }
0x1abf   : > { %7345 = vmatpush3.msra.mxu0 %v6737_v25  ;;  %v6753_v25 = vld [vmem:[%s9567_s6 + $0x22] ss:$0 sm:$0xff] }
0x1ac0   : > { %7346 = vmatprep.subr.mxu0 %v7904_v1 }
0x1ac1   : > { %7347 = vmatpush3.msra.mxu0 %v6736_v26  ;;  %v8742_v26 = vld [vmem:[%s9571_s10] sm:$0xff] }
0x1ac2   : > { %7393 = vmatprep.subr.mxu0 %v7904_v1 }
0x1b3e   : > { %v2555_v49 = vpop.xlane.xlu1 %2554 }
0x1b3f   : > { %v2556_v50 = vmul.f32 0.03125, %v2555_v49  ;;  %v2583_v49 = vrot.slane %v8444_v34, %v8395_v38 }
0x1b41   : > { %v2557_v54 = vsub.f32 %v8555_v20, %v2556_v50 }
0x1b43   : > { %v2558_v56 = vmul.f32 %v2557_v54, %v2557_v54 }
0x1b45   : > { %v2559_v59 = vsel %vm577_vm1, %v2558_v56, 0.0 }
0x1b46   : > { %2560 = vadd.xlane.f32.xlu0 %v2559_v59 }
0x1b4a   : > { %2956 = vadd.xlane.f32.xlu0 %v2955_v60 }
0x1bcf   : > { %v2561_v62 = vpop.xlane.xlu0 %2560 }
0x1bd0   : > { %v2562_v63 = vmul.f32 0.03125, %v2561_v62 }
0x1bd2   : > { %v2563_v0 = vadd.f32 1e-12, %v2562_v63 }
0x1bd3   : > { %v2957_v2 = vpop.xlane.xlu0 %2956 }
0x1bd4   : > { %7779 = vrsqrt.f32 %v2563_v0  ;;  %v2958_v3 = vmul.f32 0.03125, %v2957_v2 }
0x1bd6   : > { %v8619_v4 = vsub.f32 %v2952_v57, %v2958_v3 }
0x1bd8   : > { %v2960_v58 = vmul.f32 %v8619_v4, %v8619_v4 }
0x1bda   : > { %v2961_v53 = vsel %vm610_vm3, %v2960_v58, 0.0 }
0x1bdb   : > { %2962 = vadd.xlane.f32.xlu1 %v2961_v53 }
0x1be1   : > { %v7780_v5 = vpop.eup %7779 }
0x1be2   : > { %v2565_v6 = vmul.f32 %v7780_v5, %v2557_v54 }
0x1be4   : > { %v2570_v9 = vmul.f32 %v2569_v37, %v2565_v6 }
0x1be6   : > { %v2575_v39 = vadd.f32 %v2574_v7, %v2570_v9 }
0x1be8   : > { %7314 = vmatmul.mubr.msk.f32.vlgmr.msra.gmra.mxu1 %vm610_vm3, %v2575_v39 }
0x1be9   : > { %7359 = vmatprep.mubr.msk.f32.mxu1 %vm7905_vm2, %v7904_v1  ;;  %7352 = vmatpush3.msra.mxu1 %v2785_v12 }
0x1bea   : > { %7353 = vmatprep.subr.mxu1 %v7904_v1 }
0x1c64   : > { %v2963_v27 = vpop.xlane.xlu1 %2962 }
0x1c65   : > { %v2964_v28 = vmul.f32 0.03125, %v2963_v27 }
0x1c67   : > { %v2965_v45 = vadd.f32 1e-12, %v2964_v28 }
0x1c69   : > { %7781 = vrsqrt.f32 %v2965_v45  ;;  %v8747_v45 = vld [vmem:[%s9570_s9 + $0x18] sm:$0xff] }
0x1c76   : > { %v7782_v31 = vpop.eup %7781 }
0x1c77   : > { %v2967_v33 = vmul.f32 %v7782_v31, %v8619_v4  ;;  %v2685_v4 = vrot.slane %v8444_v34, %v8402_v18  ;;  %v2784_v34 = vld [vmem:[%s9567_s6 + $0x10] sm:$0xff] }
0x1c78   : > { %7354 = vmatpush3.msra.mxu1 %v2784_v34 }
0x1c79   : > { %v2972_v42 = vmul.f32 %v6764_v32, %v2967_v33  ;;  %7355 = vmatprep.subr.mxu1 %v7904_v1  ;;  %v2995_v32 = vrot.slane %v8742_v26, %v8170_v46  ;;  %v8755_v33 = vld [vmem:[%s9570_s9 + $0x10] sm:$0xff] }
0x1c7b   : > { %v8702_v43 = vadd.f32 %v6765_v35, %v2972_v42  ;;  %v8764_v35 = vld [vmem:[%s9570_s9 + $0x8] sm:$0xff] }
0x1c7d   : > { %v2979_v44 = vsel %vm610_vm3, %v8702_v43, 0.0 }
0x1c7e   : > { %2980 = vadd.xlane.f32.xlu1 %v2979_v44  ;;  %v3000_v44 = vrot.slane %v8742_v26, %v8178_v48 }
0x1ca8   : > { %v2653_v50 = vpop.f32.mrf.mxu1 }
0x1ca9   : > { %v2654_v51 = vadd.f32 %v2653_v50, %v2583_v49  ;;  %v8773_v49 = vld [vmem:[%s9570_s9] sm:$0xff] }
0x1caa   : > { %v7315_v52 = vpop.f32.mrf.mxu1 }
0x1cab   : > { %v2658_v54 = vmul.f32 0.044715, %v2654_v51  ;;  %v2657_v61 = vmul.f32 0.5, %v2654_v51 }
0x1cad   : > { %v2659_v56 = vmul.f32 %v2658_v54, %v2654_v51  ;;  %v3009_v54 = vrot.slane %v8742_v26, %v8188_v55 }
0x1caf   : > { %v2660_v57 = vmul.f32 %v2659_v56, %v2654_v51 }
0x1cb1   : > { %v2661_v59 = vadd.f32 %v2660_v57, %v2654_v51 }
0x1cb3   : > { %v2662_v60 = vmul.f32 0.7978846, %v2661_v59 }
0x1cb5   : > { %7783 = vtanh.f32 %v2662_v60 }
0x1cc2   : > { %v7784_v47 = vpop.eup %7783 }
0x1cc3   : > { %v2664_v22 = vadd.f32 1.0, %v7784_v47 }
0x1cc5   : > { %v2665_v30 = vmul.f32 %v2664_v22, %v2657_v61 }
0x1cc7   : > { %7349 = vmatmul.mubr.f32.vlgmr.msra.gmra.mxu0 %v2665_v30 }
0x1cc8   : > { %7395 = vmatprep.mubr.msk.f32.mxu0 %vm7905_vm2, %v7904_v1 }
0x1d07   : > { %v2981_v62 = vpop.xlane.xlu1 %2980 }
0x1d08   : > { %v2982_v63 = vmul.f32 0.03125, %v2981_v62 }
0x1d0a   : > { %v2983_v0 = vsub.f32 %v8702_v43, %v2982_v63 }
0x1d0c   : > { %v2984_v2 = vmul.f32 %v2983_v0, %v2983_v0 }
0x1d0e   : > { %v2985_v3 = vsel %vm610_vm3, %v2984_v2, 0.0 }
0x1d0f   : > { %2986 = vadd.xlane.f32.xlu1 %v2985_v3 }
0x1d87   : > { %v2752_v58 = vpop.f32.mrf.mxu0 }
0x1d88   : > { %v2753_v53 = vadd.f32 %v2752_v58, %v2685_v4 }
0x1d89   : > { %v7350_v37 = vpop.f32.mrf.mxu0 }
0x1d8a   : > { %v2756_v5 = vadd.f32 %v2753_v53, %v8555_v20  ;;  %v2783_v20 = vld [vmem:[%s9567_s6 + $0x8] sm:$0xff] }
0x1d8b   : > { %7356 = vmatpush3.msra.mxu1 %v2783_v20 }
0x1d8c   : > { %v2759_v6 = vsel %vm577_vm1, %v2756_v5, 0.0  ;;  %7357 = vmatprep.subr.mxu1 %v7904_v1 }
0x1d8d   : > { %2760 = vadd.xlane.f32.xlu0 %v2759_v6  ;;  %7358 = vmatpush3.msra.mxu1 %v2782_v14 }
0x1d8e   : > { %7362 = vmatprep.subr.mxu1 %v7904_v1 }
0x1d98   : > { %v2987_v15 = vpop.xlane.xlu1 %2986 }
0x1d99   : > { %v2988_v16 = vmul.f32 0.03125, %v2987_v15 }
0x1d9b   : > { %v2989_v19 = vadd.f32 1e-12, %v2988_v16 }
0x1e16   : > { %v2761_v7 = vpop.xlane.xlu0 %2760 }
0x1e17   : > { %v2762_v9 = vmul.f32 0.03125, %v2761_v7 }
0x1e19   : > { %v2763_v39 = vsub.f32 %v2756_v5, %v2762_v9 }
0x1e1b   : > { %v2764_v10 = vmul.f32 %v2763_v39, %v2763_v39 }
0x1e1d   : > { %v2765_v11 = vsel %vm577_vm1, %v2764_v10, 0.0  ;;  %vm5482_vm1 = vcmask 111616  }
0x1e1e   : > { %2766 = vadd.xlane.f32.xlu0 %v2765_v11 }
0x1ea7   : > { %v2767_v17 = vpop.xlane.xlu0 %2766 }
0x1ea8   : > { %v2768_v29 = vmul.f32 0.03125, %v2767_v17 }
0x1eaa   : > { %v2769_v8 = vadd.f32 1e-12, %v2768_v29 }
0x1eac   : > { %7785 = vrsqrt.f32 %v2769_v8 }
0x1ead   : > { %7787 = vrsqrt.f32 %v2989_v19 }
0x1eb9   : > { %v7786_v13 = vpop.eup %7785 }
0x1eba   : > { %v2771_v23 = vmul.f32 %v7786_v13, %v2763_v39  ;;  %v7788_v24 = vpop.eup %7787 }
0x1ebb   : > { %v2991_v31 = vmul.f32 %v7788_v24, %v2983_v0 }
0x1ebc   : > { %v2776_v27 = vmul.f32 %v6752_v21, %v2771_v23 }
0x1ebd   : > { %v2996_v42 = vmul.f32 %v2995_v32, %v2991_v31 }
0x1ebe   : > { %v2781_v28 = vadd.f32 %v6753_v25, %v2776_v27 }
0x1ebf   : > { %v3001_v50 = vadd.f32 %v3000_v44, %v2996_v42 }
0x1ec0   : > { %7360 = vmatmul.mubr.msk.f32.vlgmr.msra.gmra.mxu1 %vm610_vm3, %v2781_v28 }
0x1ec1   : > { %7363 = vmatpush3.msra.mxu1 %v8747_v45  ;;  %7370 = vmatprep.mubr.msk.f32.mxu1 %vm7905_vm2, %v7904_v1 }
0x1ec2   : > { %7364 = vmatprep.subr.mxu1 %v7904_v1 }
0x1ec3   : > { %7365 = vmatpush3.msra.mxu1 %v8755_v33 }
0x1ec4   : > { %7366 = vmatprep.subr.mxu1 %v7904_v1 }
0x1ec5   : > { %7367 = vmatpush3.msra.mxu1 %v8764_v35 }
0x1ec6   : > { %7368 = vmatprep.subr.mxu1 %v7904_v1 }
0x1ec7   : > { %7369 = vmatpush3.msra.mxu1 %v8773_v49 }
0x1ec8   : > { %7371 = vmatmul.mubr.msk.f32.vlgmr.msra.gmra.mxu1 %vm610_vm3, %v3001_v50  ;;  %7373 = vmatprep.subr.mxu1 %v7904_v1 }
0x1ec9   : > { %7375 = vmatprep.mubr.msk.f32.mxu1 %vm7905_vm2, %v7904_v1 }
0x1f80   : > { %v8782_v51 = vpop.f32.mrf.mxu1 }
0x1f82   : > { %v7361_v52 = vpop.f32.mrf.mxu1 }
0x1f88   : > { %v3079_v56 = vpop.f32.mrf.mxu1 }
0x1f89   : > { %v8786_v57 = vadd.f32 %v3079_v56, %v3009_v54 }
0x1f8a   : > { %v7372_v59 = vpop.f32.mrf.mxu1 }
0x1f8b   : > { %3084 = vrot.lane.b32.xlu0 %v8786_v57, %s9639_s11 }
0x1f8f   : > { %3250 = vrot.lane.b32.xlu0 %v8786_v57, %s9640_s15 }
0x1f93   : > { %3248 = vrot.lane.b32.xlu0 %v8786_v57, %s9641_s3 }
0x1f97   : > { %3414 = vrot.lane.b32.xlu0 %v8786_v57, %s9629_s24 }
0x1f9b   : > { %3580 = vrot.lane.b32.xlu0 %v8786_v57, %s9630_s25 }
0x1ffd   : > { %v3085_v60 = vpop.permute.xlu0 %3084 }
0x1ffe   : > { %7374 = vmatpush3.xpose.msk.msra.mxu1 %vm687_vm4, %v3085_v60 }
0x1fff   : > { %7378 = vmatprep.subr.mxu1 %v7904_v1 }
0x2001   : > { %7376 = vmatmul.mubr.msk.f32.vlgmr.msra.gmra.mxu1 %vm687_vm4, %v8786_v57  ;;  %v3251_v58 = vpop.permute.xlu0 %3250 }
0x2002   : > { %7380 = vmatprep.mubr.msk.f32.mxu1 %vm7905_vm2, %v7904_v1 }
0x2005   : > { %v3249_v53 = vpop.permute.xlu0 %3248 }
0x2009   : > { %v3415_v6 = vpop.permute.xlu0 %3414 }
0x200d   : > { %v3581_v9 = vpop.permute.xlu0 %3580 }
0x20c1   : > { %v3156_v47 = vpop.f32.mrf.mxu1 }
0x20c2   : > { %v3160_v61 = vmul.f32 0.35355338, %v3156_v47 }
0x20c3   : > { %v7377_v22 = vpop.f32.mrf.mxu1 }
0x20c4   : > { %v3161_v30 = vsel %vm687_vm4, %v3160_v61, -inf }
0x20c5   : > { %3162 = vmax.xlane.f32.xlu1 %v3161_v30 }
0x20d6   : > { %3172 = vrot.lane.b32.xlu1 %v8786_v57, %s9642_s18 }
0x214e   : > { %v3163_v62 = vpop.xlane.xlu1 %3162 }
0x214f   : > { %v3164_v63 = vsub.f32 %v3160_v61, %v3163_v62 }
0x2151   : > { %v3165_v0 = vmul.f32 1.442695, %v3164_v63 }
0x2152   : > { %v3173_v2 = vpop.permute.xlu1 %3172 }
0x2153   : > { %7789 = vpow2.f32 %v3165_v0  ;;  %7379 = vmatpush3.msra.mxu1 %v3173_v2 }
0x2154   : > { %7383 = vmatprep.subr.mxu1 %v7904_v1 }
0x2160   : > { %v7790_v3 = vpop.eup %7789 }
0x2161   : > { %v3167_v4 = vsel %vm687_vm4, %v7790_v3, 0.0 }
0x2162   : > { %3168 = vadd.xlane.f32.xlu1 %v3167_v4 }
0x2173   : > { %3416 = vrot.lane.b32.xlu1 %v8786_v57, %s9643_s22 }
0x2177   : > { %3582 = vrot.lane.b32.xlu1 %v8786_v57, %s9632_s27 }
0x21eb   : > { %v3169_v37 = vpop.xlane.xlu1 %3168 }
0x21ec   : > { %7791 = vrcp.f32 %v3169_v37 }
0x21ef   : > { %v3417_v5 = vpop.permute.xlu1 %3416 }
0x21f0   : > { %7394 = vmatpush3.xpose.msk.msra.mxu0 %vm687_vm4, %v3417_v5 }
0x21f1   : > { %7403 = vmatprep.subr.mxu0 %v7904_v1 }
0x21f3   : > { %7396 = vmatmul.mubr.msk.f32.vlgmr.msra.gmra.mxu0 %vm687_vm4, %v3415_v6  ;;  %v3583_v7 = vpop.permute.xlu1 %3582 }
0x21f4   : > { %7404 = vmatpush3.xpose.msk.msra.mxu0 %vm687_vm4, %v3583_v7  ;;  %7405 = vmatprep.mubr.msk.f32.mxu0 %vm7905_vm2, %v7904_v1 }
0x21f5   : > { %7413 = vmatprep.subr.mxu0 %v7904_v1 }
0x21f7   : > { %7406 = vmatmul.mubr.msk.f32.vlgmr.msra.gmra.mxu0 %vm687_vm4, %v3581_v9 }
0x21f8   : > { %7421 = vmatprep.mubr.msk.f32.mxu0 %vm7905_vm2, %v7904_v1 }
0x21f9   : > { %v7792_v39 = vpop.eup %7791 }
0x21fa   : > { %v3171_v10 = vmul.f32 %v7792_v39, %v7790_v3 }
0x21fc   : > { %7381 = vmatmul.mubr.msk.f32.vlgmr.msra.gmra.mxu1 %vm687_vm4, %v3171_v10 }
0x21fd   : > { %7384 = vmatpush3.xpose.msk.msra.mxu1 %vm687_vm4, %v3251_v58  ;;  %7385 = vmatprep.mubr.msk.f32.mxu1 %vm7905_vm2, %v7904_v1 }
0x21fe   : > { %7388 = vmatprep.subr.mxu1 %v7904_v1 }
0x2200   : > { %7386 = vmatmul.mubr.msk.f32.vlgmr.msra.gmra.mxu1 %vm687_vm4, %v3249_v53 }
0x2201   : > { %7390 = vmatprep.mubr.msk.f32.mxu1 %vm7905_vm2, %v7904_v1 }
0x22b3   : > { %v3488_v11 = vpop.f32.mrf.mxu0 }
0x22b4   : > { %v3492_v12 = vmul.f32 0.35355338, %v3488_v11 }
0x22b5   : > { %v7397_v34 = vpop.f32.mrf.mxu0 }
0x22b6   : > { %v3493_v20 = vsel %vm687_vm4, %v3492_v12, -inf }
0x22b7   : > { %3494 = vmax.xlane.f32.xlu0 %v3493_v20  ;;  %v3654_v14 = vpop.f32.mrf.mxu0 }
0x22b8   : > { %v3658_v15 = vmul.f32 0.35355338, %v3654_v14 }
0x22b9   : > { %v7407_v16 = vpop.f32.mrf.mxu0 }
0x22ba   : > { %v3659_v17 = vsel %vm687_vm4, %v3658_v15, -inf }
0x22bb   : > { %3660 = vmax.xlane.f32.xlu0 %v3659_v17 }
0x22bc   : > { %v8833_v29 = vpop.f32.mrf.mxu1 }
0x22be   : > { %v7382_v19 = vpop.f32.mrf.mxu1 }
0x22c0   : > { %v3322_v8 = vpop.f32.mrf.mxu1 }
0x22c1   : > { %v3326_v13 = vmul.f32 0.35355338, %v3322_v8 }
0x22c2   : > { %v7387_v21 = vpop.f32.mrf.mxu1 }
0x22c3   : > { %v3327_v23 = vsel %vm687_vm4, %v3326_v13, -inf }
0x22c4   : > { %3328 = vmax.xlane.f32.xlu1 %v3327_v23 }
0x2340   : > { %v3495_v24 = vpop.xlane.xlu0 %3494 }
0x2341   : > { %v3496_v25 = vsub.f32 %v3492_v12, %v3495_v24 }
0x2343   : > { %v3497_v27 = vmul.f32 1.442695, %v3496_v25 }
0x2344   : > { %v3661_v28 = vpop.xlane.xlu0 %3660 }
0x2345   : > { %7793 = vpow2.f32 %v3497_v27  ;;  %v3662_v31 = vsub.f32 %v3658_v15, %v3661_v28  ;;  %v3881_v27 = vld [vmem:[%s9570_s9 + $0x38] sm:$0xff]  ;;  %v3879_v28 = vld [vmem:[%s9570_s9 + $0x28] sm:$0xff] }
0x2347   : > { %v3663_v32 = vmul.f32 1.442695, %v3662_v31  ;;  %v3878_v31 = vld [vmem:[%s9570_s9 + $0x20] sm:$0xff] }
0x2349   : > { %7795 = vpow2.f32 %v3663_v32 }
0x234d   : > { %v3329_v54 = vpop.xlane.xlu1 %3328 }
0x234e   : > { %v3330_v56 = vsub.f32 %v3326_v13, %v3329_v54 }
0x2350   : > { %v3331_v59 = vmul.f32 1.442695, %v3330_v56  ;;  %v3876_v56 = vrot.slane %v8742_v26, %v8321_v41 }
0x2352   : > { %v7794_v42 = vpop.eup %7793  ;;  %7797 = vpow2.f32 %v3331_v59 }
0x2353   : > { %v3499_v44 = vsel %vm687_vm4, %v7794_v42, 0.0 }
0x2354   : > { %3500 = vadd.xlane.f32.xlu0 %v3499_v44 }
0x2356   : > { %v7796_v50 = vpop.eup %7795 }
0x2357   : > { %v3665_v52 = vsel %vm687_vm4, %v7796_v50, 0.0 }
0x2358   : > { %3666 = vadd.xlane.f32.xlu1 %v3665_v52 }
0x235f   : > { %v7798_v60 = vpop.eup %7797 }
0x2360   : > { %v3333_v47 = vsel %vm687_vm4, %v7798_v60, 0.0 }
0x2369   : > { %3504 = vrot.lane.b32.xlu1 %v8786_v57, %s9633_s29 }
0x236a   : > { %3338 = vrot.lane.b32.xlu0 %v8786_v57, %s9631_s26 }
0x236e   : > { %3775 = vrot.lane.b32.xlu0 %v8747_v45, %s9644_s20 }
0x238d   : > { %3334 = vadd.xlane.f32.xlu1 %v3333_v47  ;;  %v3983_v47 = vld [vmem:[%s9570_s9 + $0xb8] sm:$0xff] }
0x239e   : > { %3670 = vrot.lane.b32.xlu1 %v8786_v57, %s9645_s23 }
0x23a2   : > { %3773 = vrot.lane.b32.xlu1 %v8755_v33, %s9644_s20 }
0x23a6   : > { %3771 = vrot.lane.b32.xlu1 %v8764_v35, %s9644_s20 }
0x23dd   : > { %v3501_v61 = vpop.xlane.xlu0 %3500 }
0x23e1   : > { %v3339_v22 = vpop.permute.xlu0 %3338  ;;  %v3667_v45 = vpop.xlane.xlu1 %3666 }
0x23e2   : > { %7389 = vmatpush3.msra.mxu1 %v3339_v22  ;;  %v3981_v22 = vld [vmem:[%s9570_s9 + $0xa8] sm:$0xff] }
0x23e3   : > { %7398 = vmatprep.subr.mxu1 %v7904_v1 }
0x23e5   : > { %v3505_v30 = vpop.permute.xlu1 %3504  ;;  %v3776_v4 = vpop.permute.xlu0 %3775 }
0x23e6   : > { %7414 = vmatpush3.msra.mxu0 %v3776_v4  ;;  %v3970_v4 = vld [vmem:[%s9570_s9 + $0x50] sm:$0xff] }
0x23e7   : > { %7415 = vmatprep.subr.mxu0 %v7904_v1 }
0x2416   : > { %v3335_v62 = vpop.xlane.xlu1 %3334 }
0x2417   : > { %7799 = vrcp.f32 %v3335_v62  ;;  %v3978_v62 = vld [vmem:[%s9570_s9 + $0x90] sm:$0xff] }
0x2418   : > { %7801 = vrcp.f32 %v3501_v61  ;;  %v3982_v61 = vld [vmem:[%s9570_s9 + $0xb0] sm:$0xff] }
0x2419   : > { %7803 = vrcp.f32 %v3667_v45  ;;  %v3980_v45 = vld [vmem:[%s9570_s9 + $0xa0] sm:$0xff] }
0x241a   : > { %v3671_v2 = vpop.permute.xlu1 %3670 }
0x241e   : > { %v3774_v58 = vpop.permute.xlu1 %3773 }
0x241f   : > { %7416 = vmatpush3.msra.mxu0 %v3774_v58  ;;  %v3969_v58 = vld [vmem:[%s9570_s9 + $0x48] sm:$0xff] }
0x2420   : > { %7417 = vmatprep.subr.mxu0 %v7904_v1 }
0x2422   : > { %v3772_v53 = vpop.permute.xlu1 %3771 }
0x2423   : > { %7418 = vmatpush3.msra.mxu0 %v3772_v53  ;;  %v3968_v53 = vld [vmem:[%s9570_s9 + $0x40] sm:$0xff] }
0x2424   : > { %v7800_v63 = vpop.eup %7799  ;;  %7419 = vmatprep.subr.mxu0 %v7904_v1 }
0x2425   : > { %v3337_v0 = vmul.f32 %v7800_v63, %v7798_v60  ;;  %v7802_v57 = vpop.eup %7801  ;;  %v3977_v63 = vld [vmem:[%s9570_s9 + $0x88] sm:$0xff] }
0x2426   : > { %v3503_v33 = vmul.f32 %v7802_v57, %v7794_v42  ;;  %v7804_v35 = vpop.eup %7803  ;;  %v3975_v57 = vld [vmem:[%s9570_s9 + $0x78] sm:$0xff] }
0x2427   : > { %7391 = vmatmul.mubr.msk.f32.vlgmr.msra.gmra.mxu1 %vm687_vm4, %v3337_v0  ;;  %v3669_v3 = vmul.f32 %v7804_v35, %v7796_v50  ;;  %v3871_v50 = vrot.slane %v8742_v26, %v8318_v36  ;;  %v3976_v0 = vld [vmem:[%s9570_s9 + $0x80] sm:$0xff]  ;;  %v3973_v35 = vld [vmem:[%s9570_s9 + $0x68] sm:$0xff] }
0x2428   : > { %7399 = vmatpush3.msra.mxu1 %v3505_v30  ;;  %7400 = vmatprep.mubr.msk.f32.mxu1 %vm7905_vm2, %v7904_v1  ;;  %v3979_v30 = vld [vmem:[%s9570_s9 + $0x98] sm:$0xff] }
0x2429   : > { %7408 = vmatprep.subr.mxu1 %v7904_v1 }
0x242b   : > { %7401 = vmatmul.mubr.msk.f32.vlgmr.msra.gmra.mxu1 %vm687_vm4, %v3503_v33  ;;  %v3974_v33 = vld [vmem:[%s9570_s9 + $0x70] sm:$0xff] }
0x242c   : > { %7409 = vmatpush3.msra.mxu1 %v3671_v2  ;;  %7410 = vmatprep.mubr.msk.f32.mxu1 %vm7905_vm2, %v7904_v1  ;;  %v3972_v2 = vld [vmem:[%s9570_s9 + $0x60] sm:$0xff] }
0x242d   : > { %7424 = vmatprep.subr.mxu1 %v7904_v1 }
0x242f   : > { %7411 = vmatmul.mubr.msk.f32.vlgmr.msra.gmra.mxu1 %vm687_vm4, %v3669_v3  ;;  %v3971_v3 = vld [vmem:[%s9570_s9 + $0x58] sm:$0xff] }
0x2430   : > { %7432 = vmatprep.mubr.msk.f32.mxu1 %vm7905_vm2, %v7904_v1  ;;  %7425 = vmatpush3.msra.mxu1 %v3881_v27 }
0x2431   : > { %7426 = vmatprep.subr.mxu1 %v7904_v1 }
0x24e7   : > { %v3410_v37 = vpop.f32.mrf.mxu1 }
0x24e8   : > { %3747 = vrot.lane.b32.xlu0 %v3410_v37, %s9646_s30  ;;  %v3885_v37 = vrot.slane %v8742_v26, %v8395_v38 }
0x24e9   : > { %v7392_v5 = vpop.f32.mrf.mxu1 }
0x24eb   : > { %v3576_v6 = vpop.f32.mrf.mxu1 }
0x24ec   : > { %3751 = vrot.lane.b32.xlu0 %v3576_v6, %s9647_s19 }
0x24ed   : > { %v7402_v7 = vpop.f32.mrf.mxu1 }
0x24ef   : > { %v3742_v9 = vpop.f32.mrf.mxu1 }
0x24f0   : > { %3769 = vrot.lane.b32.xlu0 %v8773_v49, %s9644_s20  ;;  %3755 = vrot.lane.b32.xlu1 %v3742_v9, %s9648_s16  ;;  %v3764_v49 = vrot.slane %v8742_v26, %v8290_v40 }
0x24f1   : > { %v7412_v39 = vpop.f32.mrf.mxu1 }
0x255a   : > { %v3748_v10 = vpop.permute.xlu0 %3747 }
0x255b   : > { %v3758_v12 = vsel %vm687_vm4, %v8833_v29, %v3748_v10 }
0x255e   : > { %v3752_v11 = vpop.permute.xlu0 %3751 }
0x255f   : > { %v3759_v34 = vsel %vm1368_vm8, %v3758_v12, %v3752_v11 }
0x2562   : > { %v3770_v20 = vpop.permute.xlu0 %3769  ;;  %v3756_v14 = vpop.permute.xlu1 %3755 }
0x2563   : > { %v3760_v15 = vsel %vm1370_vm9, %v3759_v34, %v3756_v14  ;;  %7420 = vmatpush3.msra.mxu0 %v3770_v20 }
0x2564   : > { %7422 = vmatmul.mubr.msk.f32.vlgmr.msra.gmra.mxu0 %vm610_vm3, %v3760_v15  ;;  %7435 = vmatprep.subr.mxu0 %v7904_v1 }
0x2565   : > { %7467 = vmatprep.mubr.msk.f32.mxu0 %vm7905_vm2, %v7904_v1  ;;  %7436 = vmatpush3.msra.mxu0 %v3983_v47 }
0x2566   : > { %7437 = vmatprep.subr.mxu0 %v7904_v1 }
0x2567   : > { %7438 = vmatpush3.msra.mxu0 %v3982_v61 }
0x2568   : > { %7439 = vmatprep.subr.mxu0 %v7904_v1 }
0x2569   : > { %7440 = vmatpush3.msra.mxu0 %v3981_v22 }
0x256a   : > { %7441 = vmatprep.subr.mxu0 %v7904_v1 }
0x256b   : > { %7442 = vmatpush3.msra.mxu0 %v3980_v45 }
0x256c   : > { %7443 = vmatprep.subr.mxu0 %v7904_v1 }
0x256d   : > { %7444 = vmatpush3.msra.mxu0 %v3979_v30 }
0x256e   : > { %7445 = vmatprep.subr.mxu0 %v7904_v1 }
0x256f   : > { %7446 = vmatpush3.msra.mxu0 %v3978_v62 }
0x2570   : > { %7447 = vmatprep.subr.mxu0 %v7904_v1 }
0x2571   : > { %7448 = vmatpush3.msra.mxu0 %v3977_v63 }
0x2572   : > { %7449 = vmatprep.subr.mxu0 %v7904_v1 }
0x2573   : > { %7450 = vmatpush3.msra.mxu0 %v3976_v0 }
0x2574   : > { %7451 = vmatprep.subr.mxu0 %v7904_v1 }
0x2575   : > { %7452 = vmatpush3.msra.mxu0 %v3975_v57 }
0x2576   : > { %7453 = vmatprep.subr.mxu0 %v7904_v1 }
0x2577   : > { %7454 = vmatpush3.msra.mxu0 %v3974_v33 }
0x2578   : > { %7455 = vmatprep.subr.mxu0 %v7904_v1 }
0x2579   : > { %7456 = vmatpush3.msra.mxu0 %v3973_v35 }
0x257a   : > { %7457 = vmatprep.subr.mxu0 %v7904_v1 }
0x257b   : > { %7458 = vmatpush3.msra.mxu0 %v3972_v2 }
0x257c   : > { %7459 = vmatprep.subr.mxu0 %v7904_v1 }
0x257d   : > { %7460 = vmatpush3.msra.mxu0 %v3971_v3 }
0x257e   : > { %7461 = vmatprep.subr.mxu0 %v7904_v1 }
0x257f   : > { %7462 = vmatpush3.msra.mxu0 %v3970_v4 }
0x2580   : > { %7463 = vmatprep.subr.mxu0 %v7904_v1 }
0x2581   : > { %7464 = vmatpush3.msra.mxu0 %v3969_v58 }
0x2582   : > { %7465 = vmatprep.subr.mxu0 %v7904_v1 }
0x2583   : > { %7466 = vmatpush3.msra.mxu0 %v3968_v53 }
0x2584   : > { %7511 = vmatprep.subr.mxu0 %v7904_v1 }
0x2624   : > { %v3850_v16 = vpop.f32.mrf.mxu0 }
0x2625   : > { %v3851_v17 = vadd.f32 %v3850_v16, %v3764_v49  ;;  %v3987_v49 = vrot.slane %v8742_v26, %v8402_v18  ;;  %v8991_v26 = vld [vmem:[%s9570_s9 + $0xd8] sm:$0xff] }
0x2626   : > { %v7423_v29 = vpop.f32.mrf.mxu0 }
0x2627   : > { %v8882_v19 = vadd.f32 %v3851_v17, %v8702_v43  ;;  %v3880_v43 = vld [vmem:[%s9570_s9 + $0x30] sm:$0xff] }
0x2628   : > { %7427 = vmatpush3.msra.mxu1 %v3880_v43  ;;  %v9003_v43 = vld [vmem:[%s9570_s9 + $0xc8] sm:$0xff] }
0x2629   : > { %v3855_v8 = vsel %vm610_vm3, %v8882_v19, 0.0  ;;  %7428 = vmatprep.subr.mxu1 %v7904_v1 }
0x262a   : > { %3856 = vadd.xlane.f32.xlu1 %v3855_v8  ;;  %7429 = vmatpush3.msra.mxu1 %v3879_v28  ;;  %v9010_v28 = vld [vmem:[%s9570_s9 + $0xc0] sm:$0xff] }
0x262b   : > { %7430 = vmatprep.subr.mxu1 %v7904_v1 }
0x262c   : > { %7431 = vmatpush3.msra.mxu1 %v3878_v31 }
0x262d   : > { %7470 = vmatprep.subr.mxu1 %v7904_v1 }
0x26b3   : > { %v3857_v13 = vpop.xlane.xlu1 %3856 }
0x26b4   : > { %v3858_v21 = vmul.f32 0.03125, %v3857_v13 }
0x26b6   : > { %v3859_v23 = vsub.f32 %v8882_v19, %v3858_v21 }
0x26b8   : > { %v3860_v24 = vmul.f32 %v3859_v23, %v3859_v23 }
0x26ba   : > { %v3861_v25 = vsel %vm610_vm3, %v3860_v24, 0.0 }
0x26bb   : > { %3862 = vadd.xlane.f32.xlu0 %v3861_v25 }
0x2744   : > { %v3863_v32 = vpop.xlane.xlu0 %3862 }
0x2745   : > { %v3864_v42 = vmul.f32 0.03125, %v3863_v32 }
0x2747   : > { %v3865_v44 = vadd.f32 1e-12, %v3864_v42 }
0x2749   : > { %7805 = vrsqrt.f32 %v3865_v44  ;;  %v9019_v44 = vld [vmem:[%s9571_s10 + $0x8] sm:$0xff] }
0x274a   : > { %v4092_v47 = vrot.slane %v9019_v44, %v8188_v55 }
0x2756   : > { %v7806_v52 = vpop.eup %7805 }
0x2757   : > { %v3867_v54 = vmul.f32 %v7806_v52, %v3859_v23 }
0x2759   : > { %v3872_v59 = vmul.f32 %v3871_v50, %v3867_v54  ;;  %v4077_v50 = vrot.slane %v9019_v44, %v8170_v46 }
0x275b   : > { %v3877_v60 = vadd.f32 %v3876_v56, %v3872_v59  ;;  %v4082_v56 = vrot.slane %v9019_v44, %v8178_v48 }
0x275d   : > { %7433 = vmatmul.mubr.msk.f32.vlgmr.msra.gmra.mxu1 %vm610_vm3, %v3877_v60 }
0x275e   : > { %7478 = vmatprep.mubr.msk.f32.mxu1 %vm7905_vm2, %v7904_v1  ;;  %7471 = vmatpush3.msra.mxu1 %v8991_v26 }
0x275f   : > { %7472 = vmatprep.subr.mxu1 %v7904_v1 }
0x281d   : > { %v3955_v5 = vpop.f32.mrf.mxu1 }
0x281e   : > { %v3956_v6 = vadd.f32 %v3955_v5, %v3885_v37 }
0x281f   : > { %v7434_v7 = vpop.f32.mrf.mxu1 }
0x2820   : > { %v3960_v9 = vmul.f32 0.044715, %v3956_v6  ;;  %v3959_v20 = vmul.f32 0.5, %v3956_v6 }
0x2822   : > { %v3961_v39 = vmul.f32 %v3960_v9, %v3956_v6 }
0x2824   : > { %v3962_v10 = vmul.f32 %v3961_v39, %v3956_v6 }
0x2826   : > { %v3963_v11 = vadd.f32 %v3962_v10, %v3956_v6 }
0x2828   : > { %v3964_v12 = vmul.f32 0.7978846, %v3963_v11 }
0x282a   : > { %7807 = vtanh.f32 %v3964_v12 }
0x2837   : > { %v7808_v34 = vpop.eup %7807 }
0x2838   : > { %v3966_v14 = vadd.f32 1.0, %v7808_v34 }
0x283a   : > { %v3967_v15 = vmul.f32 %v3966_v14, %v3959_v20 }
0x283c   : > { %7468 = vmatmul.mubr.f32.vlgmr.msra.gmra.mxu0 %v3967_v15 }
0x283d   : > { %7513 = vmatprep.mubr.msk.f32.mxu0 %vm7905_vm2, %v7904_v1 }
0x28fc   : > { %v4054_v16 = vpop.f32.mrf.mxu0 }
0x28fd   : > { %v4055_v17 = vadd.f32 %v4054_v16, %v3987_v49 }
0x28fe   : > { %v7469_v29 = vpop.f32.mrf.mxu0 }
0x28ff   : > { %v8982_v8 = vadd.f32 %v4055_v17, %v8882_v19  ;;  %v8997_v19 = vld [vmem:[%s9570_s9 + $0xd0] sm:$0xff] }
0x2900   : > { %7473 = vmatpush3.msra.mxu1 %v8997_v19 }
0x2901   : > { %v4061_v13 = vsel %vm610_vm3, %v8982_v8, 0.0  ;;  %7474 = vmatprep.subr.mxu1 %v7904_v1 }
0x2902   : > { %4062 = vadd.xlane.f32.xlu0 %v4061_v13  ;;  %7475 = vmatpush3.msra.mxu1 %v9003_v43 }
0x2903   : > { %7476 = vmatprep.subr.mxu1 %v7904_v1 }
0x2904   : > { %7477 = vmatpush3.msra.mxu1 %v9010_v28 }
0x2905   : > { %7481 = vmatprep.subr.mxu1 %v7904_v1 }
0x298b   : > { %v4063_v21 = vpop.xlane.xlu0 %4062 }
0x298c   : > { %v4064_v23 = vmul.f32 0.03125, %v4063_v21 }
0x298e   : > { %v4065_v24 = vsub.f32 %v8982_v8, %v4064_v23 }
0x2990   : > { %v4066_v25 = vmul.f32 %v4065_v24, %v4065_v24 }
0x2992   : > { %v4067_v27 = vsel %vm610_vm3, %v4066_v25, 0.0 }
0x2993   : > { %4068 = vadd.xlane.f32.xlu1 %v4067_v27 }
0x2a1c   : > { %v4069_v31 = vpop.xlane.xlu1 %4068 }
0x2a1d   : > { %v4070_v32 = vmul.f32 0.03125, %v4069_v31 }
0x2a1f   : > { %v4071_v42 = vadd.f32 1e-12, %v4070_v32 }
0x2a21   : > { %7809 = vrsqrt.f32 %v4071_v42 }
0x2a2e   : > { %v7810_v52 = vpop.eup %7809 }
0x2a2f   : > { %v4073_v54 = vmul.f32 %v7810_v52, %v4065_v24 }
0x2a31   : > { %v4078_v59 = vmul.f32 %v4077_v50, %v4073_v54 }
0x2a33   : > { %v4083_v60 = vadd.f32 %v4082_v56, %v4078_v59 }
0x2a35   : > { %7479 = vmatmul.mubr.msk.f32.vlgmr.msra.gmra.mxu1 %vm610_vm3, %v4083_v60 }
0x2a36   : > { %7483 = vmatprep.mubr.msk.f32.mxu1 %vm7905_vm2, %v7904_v1 }
0x2af5   : > { %v4162_v61 = vpop.f32.mrf.mxu1 }
0x2af6   : > { %v9030_v22 = vadd.f32 %v4162_v61, %v4092_v47 }
0x2af7   : > { %v7480_v45 = vpop.f32.mrf.mxu1 }
0x2af8   : > { %4167 = vrot.lane.b32.xlu0 %v9030_v22, %s9639_s11 }
0x2afc   : > { %4333 = vrot.lane.b32.xlu0 %v9030_v22, %s9640_s15 }
0x2b00   : > { %4331 = vrot.lane.b32.xlu0 %v9030_v22, %s9641_s3 }
0x2b6a   : > { %v4168_v30 = vpop.permute.xlu0 %4167 }
0x2b6b   : > { %7482 = vmatpush3.xpose.msk.msra.mxu1 %vm687_vm4, %v4168_v30 }
0x2b6c   : > { %7486 = vmatprep.subr.mxu1 %v7904_v1 }
0x2b6e   : > { %7484 = vmatmul.mubr.msk.f32.vlgmr.msra.gmra.mxu1 %vm687_vm4, %v9030_v22  ;;  %v4334_v5 = vpop.permute.xlu0 %4333 }
0x2b6f   : > { %7488 = vmatprep.mubr.msk.f32.mxu1 %vm7905_vm2, %v7904_v1 }
0x2b72   : > { %v4332_v7 = vpop.permute.xlu0 %4331 }
0x2c2e   : > { %v4239_v62 = vpop.f32.mrf.mxu1 }
0x2c2f   : > { %v4243_v63 = vmul.f32 0.35355338, %v4239_v62 }
0x2c30   : > { %v7485_v0 = vpop.f32.mrf.mxu1 }
0x2c31   : > { %v4244_v57 = vsel %vm687_vm4, %v4243_v63, -inf }
0x2c32   : > { %4245 = vmax.xlane.f32.xlu1 %v4244_v57 }
0x2cbb   : > { %v4246_v33 = vpop.xlane.xlu1 %4245 }
0x2cbc   : > { %v4247_v35 = vsub.f32 %v4243_v63, %v4246_v33 }
0x2cbe   : > { %v4248_v2 = vmul.f32 1.442695, %v4247_v35 }
0x2cc0   : > { %7811 = vpow2.f32 %v4248_v2 }
0x2ccd   : > { %v7812_v3 = vpop.eup %7811 }
0x2cce   : > { %v4250_v4 = vsel %vm687_vm4, %v7812_v3, 0.0 }
0x2ccf   : > { %4251 = vadd.xlane.f32.xlu1 %v4250_v4 }
0x2ce0   : > { %4255 = vrot.lane.b32.xlu1 %v9030_v22, %s9642_s18 }
0x2d58   : > { %v4252_v58 = vpop.xlane.xlu1 %4251 }
0x2d59   : > { %7813 = vrcp.f32 %v4252_v58 }
0x2d5c   : > { %v4256_v53 = vpop.permute.xlu1 %4255 }
0x2d5d   : > { %7487 = vmatpush3.msra.mxu1 %v4256_v53 }
0x2d5e   : > { %7491 = vmatprep.subr.mxu1 %v7904_v1 }
0x2d66   : > { %v7814_v37 = vpop.eup %7813 }
0x2d67   : > { %v4254_v6 = vmul.f32 %v7814_v37, %v7812_v3 }
0x2d69   : > { %7489 = vmatmul.mubr.msk.f32.vlgmr.msra.gmra.mxu1 %vm687_vm4, %v4254_v6 }
0x2d6a   : > { %7492 = vmatpush3.xpose.msk.msra.mxu1 %vm687_vm4, %v4334_v5  ;;  %7493 = vmatprep.mubr.msk.f32.mxu1 %vm7905_vm2, %v7904_v1 }
0x2d6b   : > { %7496 = vmatprep.subr.mxu1 %v7904_v1 }
0x2d6d   : > { %7494 = vmatmul.mubr.msk.f32.vlgmr.msra.gmra.mxu1 %vm687_vm4, %v4332_v7 }
0x2d6e   : > { %7498 = vmatprep.mubr.msk.f32.mxu1 %vm7905_vm2, %v7904_v1 }
0x2e29   : > { %v9057_v9 = vpop.f32.mrf.mxu1 }
0x2e2b   : > { %v7490_v39 = vpop.f32.mrf.mxu1 }
0x2e2d   : > { %v4405_v10 = vpop.f32.mrf.mxu1 }
0x2e2e   : > { %v4409_v11 = vmul.f32 0.35355338, %v4405_v10 }
0x2e2f   : > { %v7495_v12 = vpop.f32.mrf.mxu1 }
0x2e30   : > { %v4410_v34 = vsel %vm687_vm4, %v4409_v11, -inf }
0x2e31   : > { %4411 = vmax.xlane.f32.xlu1 %v4410_v34 }
0x2e42   : > { %4499 = vrot.lane.b32.xlu1 %v9030_v22, %s9643_s22 }
0x2e46   : > { %4497 = vrot.lane.b32.xlu1 %v9030_v22, %s9629_s24 }
0x2e4a   : > { %4663 = vrot.lane.b32.xlu1 %v9030_v22, %s9630_s25 }
0x2eba   : > { %v4412_v20 = vpop.xlane.xlu1 %4411 }
0x2ebb   : > { %v4413_v14 = vsub.f32 %v4409_v11, %v4412_v20 }
0x2ebd   : > { %v4414_v15 = vmul.f32 1.442695, %v4413_v14 }
0x2ebe   : > { %v4500_v17 = vpop.permute.xlu1 %4499 }
0x2ebf   : > { %7815 = vpow2.f32 %v4414_v15 }
0x2ec2   : > { %v4498_v21 = vpop.permute.xlu1 %4497 }
0x2ec6   : > { %v4664_v24 = vpop.permute.xlu1 %4663 }
0x2ecc   : > { %v7816_v49 = vpop.eup %7815 }
0x2ecd   : > { %v4416_v16 = vsel %vm687_vm4, %v7816_v49, 0.0 }
0x2ece   : > { %4417 = vadd.xlane.f32.xlu0 %v4416_v16 }
0x2ee4   : > { %4421 = vrot.lane.b32.xlu0 %v9030_v22, %s9631_s26 }
0x2ee8   : > { %4665 = vrot.lane.b32.xlu0 %v9030_v22, %s9632_s27 }
0x2f57   : > { %v4418_v29 = vpop.xlane.xlu0 %4417 }
0x2f58   : > { %7817 = vrcp.f32 %v4418_v29 }
0x2f5b   : > { %v4422_v13 = vpop.permute.xlu0 %4421 }
0x2f5c   : > { %7497 = vmatpush3.msra.mxu1 %v4422_v13 }
0x2f5d   : > { %7501 = vmatprep.subr.mxu1 %v7904_v1 }
0x2f5f   : > { %v4666_v23 = vpop.permute.xlu0 %4665 }
0x2f60   : > { %7512 = vmatpush3.xpose.msk.msra.mxu0 %vm687_vm4, %v4666_v23 }
0x2f61   : > { %7521 = vmatprep.subr.mxu0 %v7904_v1 }
0x2f63   : > { %7514 = vmatmul.mubr.msk.f32.vlgmr.msra.gmra.mxu0 %vm687_vm4, %v4664_v24 }
0x2f64   : > { %7529 = vmatprep.mubr.msk.f32.mxu0 %vm7905_vm2, %v7904_v1 }
0x2f65   : > { %v7818_v25 = vpop.eup %7817 }
0x2f66   : > { %v4420_v27 = vmul.f32 %v7818_v25, %v7816_v49 }
0x2f68   : > { %7499 = vmatmul.mubr.msk.f32.vlgmr.msra.gmra.mxu1 %vm687_vm4, %v4420_v27 }
0x2f69   : > { %7502 = vmatpush3.xpose.msk.msra.mxu1 %vm687_vm4, %v4500_v17  ;;  %7503 = vmatprep.mubr.msk.f32.mxu1 %vm7905_vm2, %v7904_v1 }
0x2f6a   : > { %7506 = vmatprep.subr.mxu1 %v7904_v1 }
0x2f6c   : > { %7504 = vmatmul.mubr.msk.f32.vlgmr.msra.gmra.mxu1 %vm687_vm4, %v4498_v21 }
0x2f6d   : > { %7508 = vmatprep.mubr.msk.f32.mxu1 %vm7905_vm2, %v7904_v1 }
0x3023   : > { %v4737_v31 = vpop.f32.mrf.mxu0 }
0x3024   : > { %v4741_v32 = vmul.f32 0.35355338, %v4737_v31 }
0x3025   : > { %v7515_v42 = vpop.f32.mrf.mxu0 }
0x3026   : > { %v4742_v50 = vsel %vm687_vm4, %v4741_v32, -inf  ;;  %v6801_v42 = vld [vmem:[%s9570_s9 + $0xe8] sm:$0xff] }
0x3027   : > { %4743 = vmax.xlane.f32.xlu1 %v4742_v50  ;;  %v6800_v50 = vld [vmem:[%s9570_s9 + $0xe0] sm:$0xff] }
0x3028   : > { %v4493_v52 = vpop.f32.mrf.mxu1 }
0x302a   : > { %v7500_v54 = vpop.f32.mrf.mxu1 }
0x302c   : > { %v4571_v56 = vpop.f32.mrf.mxu1 }
0x302d   : > { %v4575_v59 = vmul.f32 0.35355338, %v4571_v56 }
0x302e   : > { %v7505_v60 = vpop.f32.mrf.mxu1 }
0x302f   : > { %v4576_v47 = vsel %vm687_vm4, %v4575_v59, -inf }
0x3030   : > { %4577 = vmax.xlane.f32.xlu0 %v4576_v47 }
0x3038   : > { %4587 = vrot.lane.b32.xlu1 %v9030_v22, %s9633_s29 }
0x303c   : > { %4858 = vrot.lane.b32.xlu1 %v8991_v26, %s9644_s20 }
0x3040   : > { %4856 = vrot.lane.b32.xlu1 %v8997_v19, %s9644_s20 }
0x3044   : > { %4854 = vrot.lane.b32.xlu1 %v9003_v43, %s9644_s20 }
0x30b0   : > { %v4744_v61 = vpop.xlane.xlu1 %4743 }
0x30b1   : > { %v4745_v45 = vsub.f32 %v4741_v32, %v4744_v61  ;;  %v6803_v32 = vld [vmem:[%s9570_s9 + $0xf8] sm:$0xff]  ;;  %v4959_v61 = vrot.slane %v9019_v44, %v8321_v41 }
0x30b3   : > { %v4746_v30 = vmul.f32 1.442695, %v4745_v45 }
0x30b4   : > { %v4588_v62 = vpop.permute.xlu1 %4587 }
0x30b5   : > { %7819 = vpow2.f32 %v4746_v30  ;;  %7507 = vmatpush3.msra.mxu1 %v4588_v62  ;;  %v6820_v62 = vld [vmem:[%s9570_s9 + $0x178] sm:$0xff] }
0x30b6   : > { %7516 = vmatprep.subr.mxu1 %v7904_v1 }
0x30b9   : > { %v4578_v63 = vpop.xlane.xlu0 %4577 }
0x30ba   : > { %v4579_v0 = vsub.f32 %v4575_v59, %v4578_v63  ;;  %v4954_v59 = vrot.slane %v9019_v44, %v8318_v36  ;;  %v6819_v63 = vld [vmem:[%s9570_s9 + $0x170] sm:$0xff] }
0x30bc   : > { %v4580_v57 = vmul.f32 1.442695, %v4579_v0  ;;  %v6818_v0 = vld [vmem:[%s9570_s9 + $0x168] sm:$0xff] }
0x30be   : > { %7821 = vpow2.f32 %v4580_v57  ;;  %v6817_v57 = vld [vmem:[%s9570_s9 + $0x160] sm:$0xff] }
0x30c2   : > { %v7820_v33 = vpop.eup %7819 }
0x30c3   : > { %v4748_v26 = vsel %vm687_vm4, %v7820_v33, 0.0 }
0x30c4   : > { %4749 = vadd.xlane.f32.xlu0 %v4748_v26  ;;  %v6815_v26 = vld [vmem:[%s9570_s9 + $0x150] sm:$0xff] }
0x30cb   : > { %v7822_v19 = vpop.eup %7821 }
0x30cc   : > { %v4582_v35 = vsel %vm687_vm4, %v7822_v19, 0.0 }
0x30cd   : > { %4583 = vadd.xlane.f32.xlu0 %v4582_v35  ;;  %v6813_v35 = vld [vmem:[%s9570_s9 + $0x140] sm:$0xff] }
0x30e3   : > { %4753 = vrot.lane.b32.xlu0 %v9030_v22, %s9645_s23  ;;  %v4859_v22 = vpop.permute.xlu1 %4858 }
0x30e4   : > { %7522 = vmatpush3.msra.mxu0 %v4859_v22  ;;  %v6805_v22 = vld [vmem:[%s9570_s9 + $0x100] sm:$0xff] }
0x30e5   : > { %7523 = vmatprep.subr.mxu0 %v7904_v1 }
0x30e7   : > { %4830 = vrot.lane.b32.xlu0 %v4493_v52, %s9646_s30  ;;  %v4857_v5 = vpop.permute.xlu1 %4856 }
0x30e8   : > { %7524 = vmatpush3.msra.mxu0 %v4857_v5  ;;  %v4968_v5 = vrot.slane %v9019_v44, %v8395_v38 }
0x30e9   : > { %7525 = vmatprep.subr.mxu0 %v7904_v1 }
0x30eb   : > { %v4855_v6 = vpop.permute.xlu1 %4854 }
0x30ec   : > { %7526 = vmatpush3.msra.mxu0 %v4855_v6 }
0x30ed   : > { %7527 = vmatprep.subr.mxu0 %v7904_v1 }
0x314d   : > { %v4750_v43 = vpop.xlane.xlu0 %4749 }
0x3156   : > { %v4584_v2 = vpop.xlane.xlu0 %4583 }
0x3157   : > { %7823 = vrcp.f32 %v4584_v2  ;;  %v6811_v2 = vld [vmem:[%s9570_s9 + $0x130] sm:$0xff] }
0x3158   : > { %7825 = vrcp.f32 %v4750_v43  ;;  %v6812_v43 = vld [vmem:[%s9570_s9 + $0x138] sm:$0xff] }
0x315a   : > { %v4754_v53 = vpop.permute.xlu0 %4753 }
0x315e   : > { %v4831_v12 = vpop.permute.xlu0 %4830 }
0x315f   : > { %v4841_v20 = vsel %vm687_vm4, %v9057_v9, %v4831_v12 }
0x3164   : > { %v7824_v3 = vpop.eup %7823 }
0x3165   : > { %v4586_v4 = vmul.f32 %v7824_v3, %v7822_v19  ;;  %v7826_v58 = vpop.eup %7825  ;;  %v6814_v19 = vld [vmem:[%s9570_s9 + $0x148] sm:$0xff] }
0x3166   : > { %v4752_v37 = vmul.f32 %v7826_v58, %v7820_v33  ;;  %v6816_v33 = vld [vmem:[%s9570_s9 + $0x158] sm:$0xff]  ;;  %v6810_v3 = vld [vmem:[%s9570_s9 + $0x128] sm:$0xff] }
0x3167   : > { %7509 = vmatmul.mubr.msk.f32.vlgmr.msra.gmra.mxu1 %vm687_vm4, %v4586_v4  ;;  %v6809_v4 = vld [vmem:[%s9570_s9 + $0x120] sm:$0xff]  ;;  %v6808_v58 = vld [vmem:[%s9570_s9 + $0x118] sm:$0xff] }
0x3168   : > { %7517 = vmatpush3.msra.mxu1 %v4754_v53  ;;  %7518 = vmatprep.mubr.msk.f32.mxu1 %vm7905_vm2, %v7904_v1  ;;  %v6807_v53 = vld [vmem:[%s9570_s9 + $0x110] sm:$0xff] }
0x3169   : > { %7532 = vmatprep.subr.mxu1 %v7904_v1 }
0x316b   : > { %7519 = vmatmul.mubr.msk.f32.vlgmr.msra.gmra.mxu1 %vm687_vm4, %v4752_v37  ;;  %v6806_v37 = vld [vmem:[%s9570_s9 + $0x108] sm:$0xff] }
0x316c   : > { %7540 = vmatprep.mubr.msk.f32.mxu1 %vm7905_vm2, %v7904_v1  ;;  %7533 = vmatpush3.msra.mxu1 %v6803_v32 }
0x316d   : > { %7534 = vmatprep.subr.mxu1 %v7904_v1 }
0x3227   : > { %v4659_v7 = vpop.f32.mrf.mxu1 }
0x3228   : > { %4834 = vrot.lane.b32.xlu0 %v4659_v7, %s9647_s19 }
0x3229   : > { %v7510_v39 = vpop.f32.mrf.mxu1 }
0x322b   : > { %v4825_v10 = vpop.f32.mrf.mxu1 }
0x322c   : > { %4852 = vrot.lane.b32.xlu0 %v9010_v28, %s9644_s20  ;;  %4838 = vrot.lane.b32.xlu1 %v4825_v10, %s9648_s16  ;;  %v4847_v28 = vrot.slane %v9019_v44, %v8290_v40 }
0x322d   : > { %v7520_v11 = vpop.f32.mrf.mxu1 }
0x329a   : > { %v4835_v34 = vpop.permute.xlu0 %4834 }
0x329b   : > { %v4842_v14 = vsel %vm1368_vm8, %v4841_v20, %v4835_v34 }
0x329e   : > { %v4853_v15 = vpop.permute.xlu0 %4852  ;;  %v4839_v49 = vpop.permute.xlu1 %4838 }
0x329f   : > { %v4843_v16 = vsel %vm1370_vm9, %v4842_v14, %v4839_v49  ;;  %7528 = vmatpush3.msra.mxu0 %v4853_v15 }
0x32a0   : > { %7530 = vmatmul.mubr.msk.f32.vlgmr.msra.gmra.mxu0 %vm610_vm3, %v4843_v16  ;;  %7543 = vmatprep.subr.mxu0 %v7904_v1 }
0x32a1   : > { %7575 = vmatprep.mubr.msk.f32.mxu0 %vm7905_vm2, %v7904_v1  ;;  %7544 = vmatpush3.msra.mxu0 %v6820_v62  ;;  %v6823_v62 = vld [vmem:[%s9649_s21 + $0x20] ss:$0 sm:$0xff] }
0x32a2   : > { %7545 = vmatprep.subr.mxu0 %v7904_v1 }
0x32a3   : > { %7546 = vmatpush3.msra.mxu0 %v6819_v63 }
0x32a4   : > { %7547 = vmatprep.subr.mxu0 %v7904_v1 }
0x32a5   : > { %7548 = vmatpush3.msra.mxu0 %v6818_v0 }
0x32a6   : > { %7549 = vmatprep.subr.mxu0 %v7904_v1 }
0x32a7   : > { %7550 = vmatpush3.msra.mxu0 %v6817_v57  ;;  %v5249_v57 = vld [vmem:[%s9650_s0 + $0x2] sm:$0x1] }
0x32a8   : > { %7551 = vmatprep.subr.mxu0 %v7904_v1 }
0x32a9   : > { %7552 = vmatpush3.msra.mxu0 %v6816_v33 }
0x32aa   : > { %7553 = vmatprep.subr.mxu0 %v7904_v1 }
0x32ab   : > { %7554 = vmatpush3.msra.mxu0 %v6815_v26 }
0x32ac   : > { %7555 = vmatprep.subr.mxu0 %v7904_v1 }
0x32ad   : > { %7556 = vmatpush3.msra.mxu0 %v6814_v19 }
0x32ae   : > { %7557 = vmatprep.subr.mxu0 %v7904_v1 }
0x32af   : > { %7558 = vmatpush3.msra.mxu0 %v6813_v35 }
0x32b0   : > { %7559 = vmatprep.subr.mxu0 %v7904_v1 }
0x32b1   : > { %7560 = vmatpush3.msra.mxu0 %v6812_v43 }
0x32b2   : > { %7561 = vmatprep.subr.mxu0 %v7904_v1 }
0x32b3   : > { %7562 = vmatpush3.msra.mxu0 %v6811_v2 }
0x32b4   : > { %7563 = vmatprep.subr.mxu0 %v7904_v1 }
0x32b5   : > { %7564 = vmatpush3.msra.mxu0 %v6810_v3 }
0x32b6   : > { %7565 = vmatprep.subr.mxu0 %v7904_v1 }
0x32b7   : > { %7566 = vmatpush3.msra.mxu0 %v6809_v4 }
0x32b8   : > { %7567 = vmatprep.subr.mxu0 %v7904_v1 }
0x32b9   : > { %7568 = vmatpush3.msra.mxu0 %v6808_v58 }
0x32ba   : > { %7569 = vmatprep.subr.mxu0 %v7904_v1 }
0x32bb   : > { %7570 = vmatpush3.msra.mxu0 %v6807_v53 }
0x32bc   : > { %7571 = vmatprep.subr.mxu0 %v7904_v1 }
0x32bd   : > { %7572 = vmatpush3.msra.mxu0 %v6806_v37 }
0x32be   : > { %7573 = vmatprep.subr.mxu0 %v7904_v1 }
0x32bf   : > { %7574 = vmatpush3.msra.mxu0 %v6805_v22 }
0x3360   : > { %v4933_v17 = vpop.f32.mrf.mxu0 }
0x3361   : > { %v4934_v29 = vadd.f32 %v4933_v17, %v4847_v28  ;;  %v5070_v28 = vrot.slane %v9019_v44, %v8402_v18  ;;  %v5169_v44 = vld [vmem:[%s9649_s21 + $0x10] sm:$0xff] }
0x3362   : > { %v7531_v9 = vpop.f32.mrf.mxu0 }
0x3363   : > { %v9126_v13 = vadd.f32 %v4934_v29, %v8982_v8  ;;  %v6802_v8 = vld [vmem:[%s9570_s9 + $0xf0] sm:$0xff] }
0x3364   : > { %7535 = vmatpush3.msra.mxu1 %v6802_v8  ;;  %v5170_v8 = vld [vmem:[%s9649_s21 + $0x18] sm:$0xff] }
0x3365   : > { %v4938_v21 = vsel %vm610_vm3, %v9126_v13, 0.0  ;;  %7536 = vmatprep.subr.mxu1 %v7904_v1 }
0x3366   : > { %4939 = vadd.xlane.f32.xlu1 %v4938_v21  ;;  %7537 = vmatpush3.msra.mxu1 %v6801_v42  ;;  %v5167_v42 = vld [vmem:[%s9649_s21] sm:$0xff] }
0x3367   : > { %7538 = vmatprep.subr.mxu1 %v7904_v1 }
0x3368   : > { %7539 = vmatpush3.msra.mxu1 %v6800_v50 }
0x3369   : > { %7578 = vmatprep.subr.mxu1 %v7904_v1 }
0x33ef   : > { %v4940_v23 = vpop.xlane.xlu1 %4939 }
0x33f0   : > { %v4941_v24 = vmul.f32 0.03125, %v4940_v23 }
0x33f2   : > { %v4942_v25 = vsub.f32 %v9126_v13, %v4941_v24 }
0x33f4   : > { %v4943_v27 = vmul.f32 %v4942_v25, %v4942_v25 }
0x33f6   : > { %v4944_v31 = vsel %vm610_vm3, %v4943_v27, 0.0 }
0x33f7   : > { %4945 = vadd.xlane.f32.xlu0 %v4944_v31 }
0x3480   : > { %v4946_v52 = vpop.xlane.xlu0 %4945 }
0x3481   : > { %v4947_v54 = vmul.f32 0.03125, %v4946_v52 }
0x3483   : > { %v4948_v56 = vadd.f32 1e-12, %v4947_v54 }
0x3485   : > { %7827 = vrsqrt.f32 %v4948_v56 }
0x3492   : > { %v7828_v60 = vpop.eup %7827 }
0x3493   : > { %v4950_v47 = vmul.f32 %v7828_v60, %v4942_v25 }
0x3495   : > { %v4955_v45 = vmul.f32 %v4954_v59, %v4950_v47  ;;  %v6821_v59 = vld [vmem:[%s9649_s21 + $0x21] ss:$0 sm:$0xff]  ;;  %v6822_v47 = vld [vmem:[%s9649_s21 + $0x22] ss:$0 sm:$0xff] }
0x3497   : > { %v4960_v30 = vadd.f32 %v4959_v61, %v4955_v45 }
0x3499   : > { %7541 = vmatmul.mubr.msk.f32.vlgmr.msra.gmra.mxu1 %vm610_vm3, %v4960_v30 }
0x349a   : > { %7586 = vmatprep.mubr.msk.f32.mxu1 %vm7905_vm2, %v7904_v1  ;;  %7579 = vmatpush3.msra.mxu1 %v5170_v8  ;;  %vm5478_vm2 = vcmask 113664  }
0x349b   : > { %7580 = vmatprep.subr.mxu1 %v7904_v1 }
0x349c   : > { %7581 = vmatpush3.msra.mxu1 %v5169_v44 }
0x349d   : > { %7582 = vmatprep.subr.mxu1 %v7904_v1 }
0x3559   : > { %v5038_v6 = vpop.f32.mrf.mxu1 }
0x355a   : > { %v5039_v7 = vadd.f32 %v5038_v6, %v4968_v5 }
0x355b   : > { %v7542_v39 = vpop.f32.mrf.mxu1 }
0x355c   : > { %v5043_v10 = vmul.f32 0.044715, %v5039_v7  ;;  %v5042_v15 = vmul.f32 0.5, %v5039_v7 }
0x355e   : > { %v5044_v11 = vmul.f32 %v5043_v10, %v5039_v7  ;;  %v9275_v10 = vld [vmem:[%s9651_s5 + $0x18] sm:$0xff] }
0x3560   : > { %v5045_v12 = vmul.f32 %v5044_v11, %v5039_v7  ;;  %v9280_v11 = vld [vmem:[%s9651_s5 + $0x10] sm:$0xff] }
0x3562   : > { %v5046_v34 = vadd.f32 %v5045_v12, %v5039_v7  ;;  %v9287_v12 = vld [vmem:[%s9651_s5 + $0x8] sm:$0xff] }
0x3564   : > { %v5047_v20 = vmul.f32 0.7978846, %v5046_v34  ;;  %v9294_v34 = vld [vmem:[%s9651_s5] sm:$0xff] }
0x3566   : > { %7829 = vtanh.f32 %v5047_v20 }
0x3573   : > { %v7830_v14 = vpop.eup %7829 }
0x3574   : > { %v5049_v49 = vadd.f32 1.0, %v7830_v14 }
0x3576   : > { %v5050_v16 = vmul.f32 %v5049_v49, %v5042_v15 }
0x3578   : > { %7576 = vmatmul.mubr.f32.vlgmr.msra.gmra.mxu0 %v5050_v16 }
0x3638   : > { %v5137_v17 = vpop.f32.mrf.mxu0 }
0x3639   : > { %v5138_v29 = vadd.f32 %v5137_v17, %v5070_v28  ;;  %v9303_v17 = vld [vmem:[%s9652_s28] sm:$0xff] }
0x363a   : > { %v7577_v9 = vpop.f32.mrf.mxu0  ;;  %v5305_v44 = vrot.slane %v9303_v17, %v8188_v55 }
0x363b   : > { %v5141_v21 = vadd.f32 %v5138_v29, %v9126_v13  ;;  %v5168_v13 = vld [vmem:[%s9649_s21 + $0x8] sm:$0xff]  ;;  %v5289_v29 = vrot.slane %v9303_v17, %v8170_v46 }
0x363c   : > { %7583 = vmatpush3.msra.mxu1 %v5168_v13 }
0x363d   : > { %v5144_v23 = vsel %vm610_vm3, %v5141_v21, 0.0  ;;  %7584 = vmatprep.subr.mxu1 %v7904_v1  ;;  %v6754_v1 = vld [vmem:[%s9567_s6 + $0x20] ss:$0 sm:$0xff] }
0x363e   : > { %5145 = vadd.xlane.f32.xlu0 %v5144_v23  ;;  %7585 = vmatpush3.msra.mxu1 %v5167_v42  ;;  %v2861_v30 = vadd.f32 %v6754_v1, %v8782_v51 }
0x363f   : > { %7589 = vmatprep.subr.mxu1 %v9275_v10 }
0x3640   : > { %v5251_v63 = vrot.slane %v2861_v30, 7 }
0x3642   : > { %v5256_v35 = vsel %vm2938_vm10, %v5249_v57, %v5251_v63 }
0x36c7   : > { %v5146_v24 = vpop.xlane.xlu0 %5145 }
0x36c8   : > { %v5147_v25 = vmul.f32 0.03125, %v5146_v24 }
0x36ca   : > { %v5148_v27 = vsub.f32 %v5141_v21, %v5147_v25  ;;  %v5295_v25 = vrot.slane %v9303_v17, %v8178_v48 }
0x36cc   : > { %v5149_v31 = vmul.f32 %v5148_v27, %v5148_v27 }
0x36ce   : > { %v5150_v32 = vsel %vm610_vm3, %v5149_v31, 0.0 }
0x36cf   : > { %5151 = vadd.xlane.f32.xlu1 %v5150_v32 }
0x3758   : > { %v5152_v50 = vpop.xlane.xlu1 %5151 }
0x3759   : > { %v5153_v52 = vmul.f32 0.03125, %v5152_v50 }
0x375b   : > { %v5154_v54 = vadd.f32 1e-12, %v5153_v52 }
0x375d   : > { %7831 = vrsqrt.f32 %v5154_v54 }
0x376a   : > { %v7832_v56 = vpop.eup %7831 }
0x376b   : > { %v5156_v60 = vmul.f32 %v7832_v56, %v5148_v27 }
0x376d   : > { %v5161_v61 = vmul.f32 %v6821_v59, %v5156_v60 }
0x376f   : > { %v5166_v45 = vadd.f32 %v6822_v47, %v5161_v61 }
0x3771   : > { %7587 = vmatmul.mubr.msk.f32.vlgmr.msra.gmra.mxu1 %vm610_vm3, %v5166_v45 }
0x3772   : > { %7590 = vmatpush3.msra.mxu1 %v9275_v10 }
0x3773   : > { %7591 = vmatprep.subr.mxu1 %v9280_v11 }
0x3774   : > { %7592 = vmatpush3.msra.mxu1 %v9280_v11 }
0x3775   : > { %7593 = vmatprep.subr.mxu1 %v9287_v12 }
0x3776   : > { %7594 = vmatpush3.msra.mxu1 %v9287_v12 }
0x3777   : > { %7595 = vmatprep.subr.mxu1 %v9294_v34 }
0x3778   : > { %7596 = vmatpush3.msra.mxu1 %v9294_v34 }
0x3831   : > { %v5245_v0 = vpop.f32.mrf.mxu1 }
0x3832   : > { %v5246_v33 = vadd.f32 %v6823_v62, %v5245_v0 }
0x3833   : > { %v7588_v26 = vpop.f32.mrf.mxu1 }
0x3834   : > { %v9257_v19 = vrot.slane %v5246_v33, 2 }
0x3836   : > { %v5263_v51 = vsel %vm5262_vm0, %v9257_v19, 0.0  ;;  %v9264_v43 = vsel %vm2947_vm14, %v5256_v35, %v9257_v19 }
0x3837   : > { %5264 = vadd.xlane.f32.xlu1 %v5263_v51  ;;  %v5259_v2 = vsel %vm610_vm3, %v9264_v43, 0.0 }
0x3838   : > { %5260 = vadd.xlane.f32.xlu0 %v5259_v2 }
0x38c0   : > { %v5265_v3 = vpop.xlane.xlu1 %5264 }
0x38c1   : > { %v5267_v4 = vmul.f32 0.03125, %v5265_v3  ;;  %v5261_v58 = vpop.xlane.xlu0 %5260 }
0x38c2   : > { %v5266_v53 = vmul.f32 0.03125, %v5261_v58 }
0x38c3   : > { %v5269_v37 = vsub.f32 %v9257_v19, %v5267_v4 }
0x38c4   : > { %v5268_v22 = vsub.f32 %v9264_v43, %v5266_v53 }
0x38c5   : > { %v5271_v5 = vmul.f32 %v5269_v37, %v5269_v37 }
0x38c6   : > { %v5270_v6 = vmul.f32 %v5268_v22, %v5268_v22 }
0x38c7   : > { %v5275_v7 = vsel %vm5262_vm0, %v5271_v5, 0.0 }
0x38c8   : > { %5276 = vadd.xlane.f32.xlu1 %v5275_v7  ;;  %v5272_v39 = vsel %vm610_vm3, %v5270_v6, 0.0 }
0x38c9   : > { %5273 = vadd.xlane.f32.xlu0 %v5272_v39 }
0x3951   : > { %v5277_v20 = vpop.xlane.xlu1 %5276 }
0x3952   : > { %v5279_v14 = vmul.f32 0.03125, %v5277_v20  ;;  %v5274_v15 = vpop.xlane.xlu0 %5273 }
0x3953   : > { %v5278_v49 = vmul.f32 0.03125, %v5274_v15 }
0x3954   : > { %v5281_v16 = vadd.f32 1e-12, %v5279_v14 }
0x3955   : > { %v5280_v28 = vadd.f32 1e-12, %v5278_v49 }
0x3956   : > { %7833 = vrsqrt.f32 %v5281_v16 }
0x3957   : > { %7835 = vrsqrt.f32 %v5280_v28 }
0x3963   : > { %v7834_v9 = vpop.eup %7833 }
0x3964   : > { %v7836_v21 = vpop.eup %7835  ;;  %v5285_v23 = vmul.f32 %v7834_v9, %v5269_v37 }
0x3965   : > { %v5284_v24 = vmul.f32 %v7836_v21, %v5268_v22 }
0x3966   : > { %v5291_v27 = vmul.f32 %v5289_v29, %v5285_v23 }
0x3967   : > { %v5290_v31 = vmul.f32 %v5289_v29, %v5284_v24 }
0x3968   : > { %v5297_v8 = vadd.f32 %v5295_v25, %v5291_v27 }
0x3969   : > { %v5296_v32 = vadd.f32 %v5295_v25, %v5290_v31 }
0x396b   : > { %7597 = vmatprep.mubr.msk.f32.mxu1 %vm610_vm3, %v5296_v32 }
0x396c   : > { %7598 = vmatmul.mubr.msk.f32.vlgmr.msra.gmra.mxu1 %vm610_vm3, %v5297_v8 }
0x3a2c   : > { %v7599_v13 = vpop.f32.mrf.mxu1 }
0x3a2d   : > { %v9313_v46 = vadd.f32 %v7599_v13, %v5305_v44 }
0x3a2e   : > { %v5378_v42 = vpop.f32.mrf.mxu1 }
0x3a2f   : > { %v9315_v50 = vadd.f32 %v5378_v42, %v5305_v44  ;;  %5391 = vrot.lane.b32.xlu0 %v9313_v46, %s9639_s11 }
0x3a31   : > { %5389 = vrot.lane.b32.xlu1 %v9315_v50, %s9639_s11  ;;  %7604 = vmatprep.mubr.msk.f32.mxu1 %vm687_vm4, %v9315_v50 }
0x3aa1   : > { %v5392_v48 = vpop.permute.xlu0 %5391 }
0x3aa2   : > { %7600 = vmatprep.subr.msk.mxu1 %vm687_vm4, %v5392_v48 }
0x3aa3   : > { %7601 = vmatpush3.xpose.msk.msra.mxu1 %vm687_vm4, %v5392_v48  ;;  %v5390_v55 = vpop.permute.xlu1 %5389 }
0x3aa4   : > { %7602 = vmatprep.subr.msk.mxu1 %vm687_vm4, %v5390_v55 }
0x3aa7   : > { %7603 = vmatpush3.xpose.msk.msra.mxu1 %vm687_vm4, %v5390_v55 }
0x3aaa   : > { %7605 = vmatmul.mubr.msk.f32.vlgmr.msra.gmra.mxu1 %vm687_vm4, %v9313_v46 }
0x3b6a   : > { %v7606_v52 = vpop.f32.mrf.mxu1 }
0x3b6b   : > { %v5477_v54 = vmul.f32 0.35355338, %v7606_v52 }
0x3b6c   : > { %v5467_v56 = vpop.f32.mrf.mxu1 }
0x3b6d   : > { %v5476_v59 = vmul.f32 0.35355338, %v5467_v56  ;;  %v5483_v60 = vsel %vm5482_vm1, %v5477_v54, -inf }
0x3b6e   : > { %5484 = vmax.xlane.f32.xlu0 %v5483_v60 }
0x3b6f   : > { %v5479_v47 = vsel %vm5478_vm2, %v5476_v59, -inf }
0x3b70   : > { %5480 = vmax.xlane.f32.xlu1 %v5479_v47 }
0x3bf7   : > { %v5485_v61 = vpop.xlane.xlu0 %5484 }
0x3bf8   : > { %v5487_v45 = vsub.f32 %v5477_v54, %v5485_v61 }
0x3bf9   : > { %v5481_v1 = vpop.xlane.xlu1 %5480 }
0x3bfa   : > { %v5490_v30 = vmul.f32 1.442695, %v5487_v45  ;;  %v5486_v62 = vsub.f32 %v5476_v59, %v5481_v1 }
0x3bfc   : > { %7837 = vpow2.f32 %v5490_v30  ;;  %v5488_v63 = vmul.f32 1.442695, %v5486_v62 }
0x3bfe   : > { %7839 = vpow2.f32 %v5488_v63 }
0x3c09   : > { %v7838_v0 = vpop.eup %7837 }
0x3c0a   : > { %v5495_v57 = vsel %vm5482_vm1, %v7838_v0, 0.0 }
0x3c0b   : > { %v7840_v33 = vpop.eup %7839  ;;  %5496 = vadd.xlane.f32.xlu1 %v5495_v57 }
0x3c0c   : > { %v5492_v26 = vsel %vm5478_vm2, %v7840_v33, 0.0 }
0x3c0d   : > { %5493 = vadd.xlane.f32.xlu0 %v5492_v26 }
0x3c1c   : > { %5502 = vrot.lane.b32.xlu1 %v9315_v50, %s9642_s18 }
0x3c20   : > { %5596 = vrot.lane.b32.xlu1 %v9313_v46, %s9640_s15 }
0x3c23   : > { %5504 = vrot.lane.b32.xlu0 %v9313_v46, %s9642_s18 }
0x3c24   : > { %5590 = vrot.lane.b32.xlu1 %v9315_v50, %s9641_s3 }
0x3c27   : > { %5594 = vrot.lane.b32.xlu0 %v9315_v50, %s9640_s15 }
0x3c2b   : > { %5592 = vrot.lane.b32.xlu0 %v9313_v46, %s9641_s3 }
0x3c94   : > { %v5497_v35 = vpop.xlane.xlu1 %5496 }
0x3c95   : > { %7841 = vrcp.f32 %v5497_v35 }
0x3c96   : > { %v5494_v51 = vpop.xlane.xlu0 %5493 }
0x3c97   : > { %7843 = vrcp.f32 %v5494_v51 }
0x3c98   : > { %v5503_v2 = vpop.permute.xlu1 %5502 }
0x3c9a   : > { %v5505_v3 = vpop.permute.xlu0 %5504 }
0x3c9b   : > { %7607 = vmatprep.subr.msk.mxu1 %vm2947_vm14, %v5505_v3 }
0x3c9c   : > { %7608 = vmatpush3.msk.msra.mxu1 %vm2947_vm14, %v5505_v3  ;;  %v5597_v4 = vpop.permute.xlu1 %5596 }
0x3c9d   : > { %7609 = vmatprep.subr.mxu1 %v5503_v2 }
0x3c9e   : > { %7610 = vmatpush3.msra.mxu1 %v5503_v2  ;;  %v5595_v6 = vpop.permute.xlu0 %5594 }
0x3c9f   : > { %7614 = vmatprep.subr.msk.mxu1 %vm687_vm4, %v5597_v4 }
0x3ca0   : > { %v5591_v5 = vpop.permute.xlu1 %5590 }
0x3ca2   : > { %v7842_v58 = vpop.eup %7841  ;;  %v5593_v7 = vpop.permute.xlu0 %5592 }
0x3ca3   : > { %v5501_v22 = vmul.f32 %v7842_v58, %v7838_v0 }
0x3ca4   : > { %v7844_v53 = vpop.eup %7843 }
0x3ca5   : > { %v5500_v37 = vmul.f32 %v7844_v53, %v7840_v33 }
0x3ca7   : > { %7611 = vmatprep.mubr.msk.f32.mxu1 %vm5478_vm2, %v5500_v37 }
0x3ca8   : > { %7612 = vmatmul.mubr.msk.f32.vlgmr.msra.gmra.mxu1 %vm5478_vm2, %v5501_v22 }
0x3ca9   : > { %7615 = vmatpush3.xpose.msk.msra.mxu1 %vm687_vm4, %v5597_v4  ;;  %7618 = vmatprep.mubr.msk.f32.mxu1 %vm687_vm4, %v5591_v5 }
0x3caa   : > { %7616 = vmatprep.subr.msk.mxu1 %vm687_vm4, %v5595_v6 }
0x3cad   : > { %7617 = vmatpush3.xpose.msk.msra.mxu1 %vm687_vm4, %v5595_v6 }
0x3cb0   : > { %7619 = vmatmul.mubr.msk.f32.vlgmr.msra.gmra.mxu1 %vm687_vm4, %v5593_v7 }
0x3d68   : > { %v9355_v39 = vpop.f32.mrf.mxu1 }
0x3d6a   : > { %v9357_v20 = vpop.f32.mrf.mxu1 }
0x3d70   : > { %v7620_v14 = vpop.f32.mrf.mxu1 }
0x3d71   : > { %v5682_v15 = vmul.f32 0.35355338, %v7620_v14 }
0x3d72   : > { %v5672_v49 = vpop.f32.mrf.mxu1 }
0x3d73   : > { %v5681_v16 = vmul.f32 0.35355338, %v5672_v49  ;;  %v5686_v28 = vsel %vm5482_vm1, %v5682_v15, -inf }
0x3d74   : > { %5687 = vmax.xlane.f32.xlu0 %v5686_v28 }
0x3d75   : > { %v5683_v29 = vsel %vm5478_vm2, %v5681_v16, -inf }
0x3d76   : > { %5684 = vmax.xlane.f32.xlu1 %v5683_v29 }
0x3dfd   : > { %v5688_v9 = vpop.xlane.xlu0 %5687 }
0x3dfe   : > { %v5690_v21 = vsub.f32 %v5682_v15, %v5688_v9 }
0x3dff   : > { %v5685_v23 = vpop.xlane.xlu1 %5684 }
0x3e00   : > { %v5693_v24 = vmul.f32 1.442695, %v5690_v21  ;;  %v5689_v25 = vsub.f32 %v5681_v16, %v5685_v23 }
0x3e02   : > { %7845 = vpow2.f32 %v5693_v24  ;;  %v5691_v27 = vmul.f32 1.442695, %v5689_v25 }
0x3e04   : > { %7847 = vpow2.f32 %v5691_v27 }
0x3e0f   : > { %v7846_v31 = vpop.eup %7845 }
0x3e10   : > { %v5698_v32 = vsel %vm5482_vm1, %v7846_v31, 0.0 }
0x3e11   : > { %v7848_v8 = vpop.eup %7847  ;;  %5699 = vadd.xlane.f32.xlu1 %v5698_v32 }
0x3e12   : > { %v5695_v44 = vsel %vm5478_vm2, %v7848_v8, 0.0 }
0x3e13   : > { %5696 = vadd.xlane.f32.xlu0 %v5695_v44 }
0x3e22   : > { %5705 = vrot.lane.b32.xlu1 %v9315_v50, %s9631_s26 }
0x3e26   : > { %5799 = vrot.lane.b32.xlu1 %v9313_v46, %s9643_s22 }
0x3e29   : > { %5707 = vrot.lane.b32.xlu0 %v9313_v46, %s9631_s26 }
0x3e2a   : > { %5793 = vrot.lane.b32.xlu1 %v9315_v50, %s9629_s24 }
0x3e2d   : > { %5797 = vrot.lane.b32.xlu0 %v9315_v50, %s9643_s22 }
0x3e31   : > { %5795 = vrot.lane.b32.xlu0 %v9313_v46, %s9629_s24 }
0x3e9a   : > { %v5700_v13 = vpop.xlane.xlu1 %5699 }
0x3e9b   : > { %7849 = vrcp.f32 %v5700_v13 }
0x3e9c   : > { %v5697_v42 = vpop.xlane.xlu0 %5696 }
0x3e9d   : > { %7851 = vrcp.f32 %v5697_v42 }
0x3e9e   : > { %v5706_v48 = vpop.permute.xlu1 %5705 }
0x3ea0   : > { %v5708_v55 = vpop.permute.xlu0 %5707 }
0x3ea1   : > { %7621 = vmatprep.subr.msk.mxu0 %vm2947_vm14, %v5708_v55 }
0x3ea2   : > { %7622 = vmatpush3.msk.msra.mxu0 %vm2947_vm14, %v5708_v55  ;;  %v5800_v52 = vpop.permute.xlu1 %5799 }
0x3ea3   : > { %7623 = vmatprep.subr.mxu0 %v5706_v48 }
0x3ea4   : > { %7624 = vmatpush3.msra.mxu0 %v5706_v48  ;;  %v5798_v61 = vpop.permute.xlu0 %5797 }
0x3ea5   : > { %7628 = vmatprep.subr.msk.mxu0 %vm687_vm4, %v5800_v52 }
0x3ea6   : > { %v5794_v47 = vpop.permute.xlu1 %5793 }
0x3ea8   : > { %v7850_v54 = vpop.eup %7849  ;;  %v5796_v45 = vpop.permute.xlu0 %5795 }
0x3ea9   : > { %v5704_v60 = vmul.f32 %v7850_v54, %v7846_v31 }
0x3eaa   : > { %v7852_v56 = vpop.eup %7851 }
0x3eab   : > { %v5703_v59 = vmul.f32 %v7852_v56, %v7848_v8 }
0x3ead   : > { %7625 = vmatprep.mubr.msk.f32.mxu0 %vm5478_vm2, %v5703_v59 }
0x3eae   : > { %7626 = vmatmul.mubr.msk.f32.vlgmr.msra.gmra.mxu0 %vm5478_vm2, %v5704_v60 }
0x3eaf   : > { %7629 = vmatpush3.xpose.msk.msra.mxu0 %vm687_vm4, %v5800_v52  ;;  %7632 = vmatprep.mubr.msk.f32.mxu0 %vm687_vm4, %v5794_v47 }
0x3eb0   : > { %7630 = vmatprep.subr.msk.mxu0 %vm687_vm4, %v5798_v61 }
0x3eb3   : > { %7631 = vmatpush3.xpose.msk.msra.mxu0 %vm687_vm4, %v5798_v61 }
0x3eb6   : > { %7633 = vmatmul.mubr.msk.f32.vlgmr.msra.gmra.mxu0 %vm687_vm4, %v5796_v45 }
0x3f6e   : > { %v9385_v1 = vpop.f32.mrf.mxu0 }
0x3f70   : > { %v9387_v30 = vpop.f32.mrf.mxu0 }
0x3f76   : > { %v7634_v62 = vpop.f32.mrf.mxu0 }
0x3f77   : > { %v5885_v63 = vmul.f32 0.35355338, %v7634_v62 }
0x3f78   : > { %v5875_v0 = vpop.f32.mrf.mxu0 }
0x3f79   : > { %v5884_v57 = vmul.f32 0.35355338, %v5875_v0  ;;  %v5889_v33 = vsel %vm5482_vm1, %v5885_v63, -inf }
0x3f7a   : > { %5890 = vmax.xlane.f32.xlu0 %v5889_v33 }
0x3f7b   : > { %v5886_v26 = vsel %vm5478_vm2, %v5884_v57, -inf }
0x3f7c   : > { %5887 = vmax.xlane.f32.xlu1 %v5886_v26 }
0x4003   : > { %v5891_v35 = vpop.xlane.xlu0 %5890 }
0x4004   : > { %v5893_v51 = vsub.f32 %v5885_v63, %v5891_v35 }
0x4005   : > { %v5888_v2 = vpop.xlane.xlu1 %5887 }
0x4006   : > { %v5896_v3 = vmul.f32 1.442695, %v5893_v51  ;;  %v5892_v4 = vsub.f32 %v5884_v57, %v5888_v2 }
0x4008   : > { %7853 = vpow2.f32 %v5896_v3  ;;  %v5894_v58 = vmul.f32 1.442695, %v5892_v4 }
0x400a   : > { %7855 = vpow2.f32 %v5894_v58 }
0x4015   : > { %v7854_v53 = vpop.eup %7853 }
0x4016   : > { %v5901_v37 = vsel %vm5482_vm1, %v7854_v53, 0.0 }
0x4017   : > { %v7856_v22 = vpop.eup %7855  ;;  %5902 = vadd.xlane.f32.xlu1 %v5901_v37 }
0x4018   : > { %v5898_v5 = vsel %vm5478_vm2, %v7856_v22, 0.0 }
0x4019   : > { %5899 = vadd.xlane.f32.xlu0 %v5898_v5 }
0x4028   : > { %5908 = vrot.lane.b32.xlu1 %v9315_v50, %s9633_s29 }
0x402c   : > { %6002 = vrot.lane.b32.xlu1 %v9313_v46, %s9632_s27 }
0x402f   : > { %5910 = vrot.lane.b32.xlu0 %v9313_v46, %s9633_s29  ;;  %s9655_s29 = sld [smem:[#allocation15_spill]] }
0x4030   : > { %5996 = vrot.lane.b32.xlu1 %v9315_v50, %s9630_s25 }
0x4033   : > { %6000 = vrot.lane.b32.xlu0 %v9315_v50, %s9632_s27 }
0x4037   : > { %5998 = vrot.lane.b32.xlu0 %v9313_v46, %s9630_s25  ;;  %s9654_s25 = sshll.u32 %s9653_s17, 4 }
0x4038   : > { %s474_s11 = scalar_lea.vmem %s9655_s29, %s9654_s25 }
0x40a0   : > { %v5903_v6 = vpop.xlane.xlu1 %5902 }
0x40a1   : > { %7857 = vrcp.f32 %v5903_v6 }
0x40a2   : > { %v5900_v7 = vpop.xlane.xlu0 %5899 }
0x40a3   : > { %7859 = vrcp.f32 %v5900_v7 }
0x40a4   : > { %v5909_v14 = vpop.permute.xlu1 %5908 }
0x40a6   : > { %v5911_v15 = vpop.permute.xlu0 %5910 }
0x40a7   : > { %7635 = vmatprep.subr.msk.mxu1 %vm2947_vm14, %v5911_v15 }
0x40a8   : > { %7636 = vmatpush3.msk.msra.mxu1 %vm2947_vm14, %v5911_v15  ;;  %v6003_v49 = vpop.permute.xlu1 %6002 }
0x40a9   : > { %7637 = vmatprep.subr.mxu1 %v5909_v14 }
0x40aa   : > { %7638 = vmatpush3.msra.mxu1 %v5909_v14  ;;  %v6001_v23 = vpop.permute.xlu0 %6000 }
0x40ab   : > { %7642 = vmatprep.subr.msk.mxu1 %vm687_vm4, %v6003_v49 }
0x40ac   : > { %v5997_v21 = vpop.permute.xlu1 %5996 }
0x40ae   : > { %v7858_v16 = vpop.eup %7857  ;;  %v5999_v24 = vpop.permute.xlu0 %5998 }
0x40af   : > { %v5907_v9 = vmul.f32 %v7858_v16, %v7854_v53 }
0x40b0   : > { %v7860_v28 = vpop.eup %7859 }
0x40b1   : > { %v5906_v29 = vmul.f32 %v7860_v28, %v7856_v22 }
0x40b3   : > { %7639 = vmatprep.mubr.msk.f32.mxu1 %vm5478_vm2, %v5906_v29 }
0x40b4   : > { %7640 = vmatmul.mubr.msk.f32.vlgmr.msra.gmra.mxu1 %vm5478_vm2, %v5907_v9 }
0x40b5   : > { %7643 = vmatpush3.xpose.msk.msra.mxu1 %vm687_vm4, %v6003_v49  ;;  %7646 = vmatprep.mubr.msk.f32.mxu1 %vm687_vm4, %v5997_v21 }
0x40b6   : > { %7644 = vmatprep.subr.msk.mxu1 %vm687_vm4, %v6001_v23 }
0x40b9   : > { %7645 = vmatpush3.xpose.msk.msra.mxu1 %vm687_vm4, %v6001_v23 }
0x40bc   : > { %7647 = vmatmul.mubr.msk.f32.vlgmr.msra.gmra.mxu1 %vm687_vm4, %v5999_v24 }
0x4174   : > { %v7641_v25 = vpop.f32.mrf.mxu1 }
0x4176   : > { %v5987_v27 = vpop.f32.mrf.mxu1 }
0x417c   : > { %v7648_v31 = vpop.f32.mrf.mxu1 }
0x417d   : > { %v6088_v32 = vmul.f32 0.35355338, %v7648_v31 }
0x417e   : > { %v6078_v8 = vpop.f32.mrf.mxu1 }
0x417f   : > { %v6087_v44 = vmul.f32 0.35355338, %v6078_v8  ;;  %v6092_v13 = vsel %vm5482_vm1, %v6088_v32, -inf  ;;  %v6373_v8 = vld [vmem:[%s9651_s5 + $0x38] sm:$0xff] }
0x4180   : > { %6093 = vmax.xlane.f32.xlu0 %v6092_v13  ;;  %7667 = vmatprep.subr.mxu1 %v6373_v8  ;;  %v6371_v13 = vld [vmem:[%s9651_s5 + $0x28] sm:$0xff] }
0x4181   : > { %v6089_v42 = vsel %vm5478_vm2, %v6087_v44, -inf  ;;  %7668 = vmatpush3.msra.mxu1 %v6373_v8 }
0x4182   : > { %6090 = vmax.xlane.f32.xlu1 %v6089_v42  ;;  %v6370_v42 = vld [vmem:[%s9651_s5 + $0x20] sm:$0xff] }
0x4209   : > { %v6094_v48 = vpop.xlane.xlu0 %6093 }
0x420a   : > { %v6096_v55 = vsub.f32 %v6088_v32, %v6094_v48 }
0x420b   : > { %v6091_v52 = vpop.xlane.xlu1 %6090 }
0x420c   : > { %v6099_v54 = vmul.f32 1.442695, %v6096_v55  ;;  %v6095_v56 = vsub.f32 %v6087_v44, %v6091_v52  ;;  %v6372_v44 = vld [vmem:[%s9651_s5 + $0x30] sm:$0xff] }
0x420d   : > { %7669 = vmatprep.subr.mxu1 %v6372_v44 }
0x420e   : > { %7861 = vpow2.f32 %v6099_v54  ;;  %v6097_v59 = vmul.f32 1.442695, %v6095_v56  ;;  %7670 = vmatpush3.msra.mxu1 %v6372_v44 }
0x420f   : > { %7671 = vmatprep.subr.mxu1 %v6371_v13 }
0x4210   : > { %7863 = vpow2.f32 %v6097_v59  ;;  %7672 = vmatpush3.msra.mxu1 %v6371_v13 }
0x4211   : > { %7673 = vmatprep.subr.mxu1 %v6370_v42 }
0x4212   : > { %7674 = vmatpush3.msra.mxu1 %v6370_v42 }
0x421b   : > { %v7862_v60 = vpop.eup %7861 }
0x421c   : > { %v6104_v47 = vsel %vm5482_vm1, %v7862_v60, 0.0 }
0x421d   : > { %v7864_v61 = vpop.eup %7863  ;;  %6105 = vadd.xlane.f32.xlu1 %v6104_v47  ;;  %v6361_v47 = vrot.slane %v9303_v17, %v8318_v36  ;;  %v6491_v36 = vld [vmem:[%s9651_s5 + $0xb0] sm:$0xff] }
0x421e   : > { %v6101_v45 = vsel %vm5478_vm2, %v7864_v61, 0.0 }
0x421f   : > { %6102 = vadd.xlane.f32.xlu0 %v6101_v45 }
0x422e   : > { %6111 = vrot.lane.b32.xlu1 %v9315_v50, %s9645_s23 }
0x4232   : > { %6243 = vrot.lane.b32.xlu1 %v9275_v10, %s9644_s20 }
0x4235   : > { %6113 = vrot.lane.b32.xlu0 %v9313_v46, %s9645_s23 }
0x4236   : > { %6201 = vrot.lane.b32.xlu1 %v9387_v30, %s9646_s30 }
0x4239   : > { %6241 = vrot.lane.b32.xlu0 %v9280_v11, %s9644_s20 }
0x423a   : > { %6203 = vrot.lane.b32.xlu1 %v9385_v1, %s9646_s30 }
0x423d   : > { %6239 = vrot.lane.b32.xlu0 %v9287_v12, %s9644_s20 }
0x423e   : > { %6211 = vrot.lane.b32.xlu1 %v7641_v25, %s9647_s19 }
0x4241   : > { %6209 = vrot.lane.b32.xlu0 %v5987_v27, %s9647_s19 }
0x4242   : > { %6237 = vrot.lane.b32.xlu1 %v9294_v34, %s9644_s20 }
0x42a6   : > { %v6106_v10 = vpop.xlane.xlu1 %6105 }
0x42a7   : > { %7865 = vrcp.f32 %v6106_v10 }
0x42a8   : > { %v6103_v46 = vpop.xlane.xlu0 %6102 }
0x42a9   : > { %7867 = vrcp.f32 %v6103_v46 }
0x42aa   : > { %v6112_v50 = vpop.permute.xlu1 %6111 }
0x42ac   : > { %v6114_v30 = vpop.permute.xlu0 %6113 }
0x42ad   : > { %7649 = vmatprep.subr.msk.mxu0 %vm2947_vm14, %v6114_v30 }
0x42ae   : > { %7650 = vmatpush3.msk.msra.mxu0 %vm2947_vm14, %v6114_v30  ;;  %v6244_v11 = vpop.permute.xlu1 %6243 }
0x42af   : > { %7651 = vmatprep.subr.mxu0 %v6112_v50 }
0x42b0   : > { %7652 = vmatpush3.msra.mxu0 %v6112_v50  ;;  %v6242_v62 = vpop.permute.xlu0 %6241  ;;  %v6367_v50 = vrot.slane %v9303_v17, %v8321_v41  ;;  %v6490_v41 = vld [vmem:[%s9651_s5 + $0xa8] sm:$0xff] }
0x42b1   : > { %7656 = vmatprep.subr.mxu0 %v6244_v11 }
0x42b2   : > { %v6202_v57 = vpop.permute.xlu1 %6201 }
0x42b3   : > { %v6223_v4 = vsel %vm687_vm4, %v9357_v20, %v6202_v57  ;;  %v6232_v20 = vrot.slane %v9303_v17, %v8290_v40  ;;  %v6485_v57 = vld [vmem:[%s9651_s5 + $0x80] sm:$0xff] }
0x42b4   : > { %v7866_v12 = vpop.eup %7865  ;;  %v6240_v34 = vpop.permute.xlu0 %6239 }
0x42b5   : > { %v6110_v0 = vmul.f32 %v7866_v12, %v7862_v60 }
0x42b6   : > { %v7868_v1 = vpop.eup %7867  ;;  %v6204_v33 = vpop.permute.xlu1 %6203 }
0x42b7   : > { %v6109_v63 = vmul.f32 %v7868_v1, %v7864_v61  ;;  %v6224_v22 = vsel %vm687_vm4, %v9355_v39, %v6204_v33  ;;  %v6492_v1 = vld [vmem:[%s9651_s5 + $0xb8] sm:$0xff] }
0x42b8   : > { %v6210_v3 = vpop.permute.xlu0 %6209  ;;  %v6484_v33 = vld [vmem:[%s9651_s5 + $0x78] sm:$0xff] }
0x42b9   : > { %7653 = vmatprep.mubr.msk.f32.mxu0 %vm5478_vm2, %v6109_v63  ;;  %v6225_v58 = vsel %vm1368_vm8, %v6223_v4, %v6210_v3  ;;  %v6488_v63 = vld [vmem:[%s9651_s5 + $0x98] sm:$0xff]  ;;  %v6479_v3 = vld [vmem:[%s9651_s5 + $0x50] sm:$0xff]  ;;  %v6478_v4 = vld [vmem:[%s9651_s5 + $0x48] sm:$0xff] }
0x42ba   : > { %7654 = vmatmul.mubr.msk.f32.vlgmr.msra.gmra.mxu0 %vm5478_vm2, %v6110_v0  ;;  %v6212_v26 = vpop.permute.xlu1 %6211  ;;  %v6487_v0 = vld [vmem:[%s9651_s5 + $0x90] sm:$0xff] }
0x42bb   : > { %7657 = vmatpush3.msra.mxu0 %v6244_v11  ;;  %v6226_v5 = vsel %vm1368_vm8, %v6224_v22, %v6212_v26  ;;  %v6483_v26 = vld [vmem:[%s9651_s5 + $0x70] sm:$0xff] }
0x42bc   : > { %7658 = vmatprep.subr.mxu0 %v6242_v62 }
0x42bd   : > { %7659 = vmatpush3.msra.mxu0 %v6242_v62  ;;  %v6489_v62 = vld [vmem:[%s9651_s5 + $0xa0] sm:$0xff] }
0x42be   : > { %7660 = vmatprep.subr.mxu0 %v6240_v34  ;;  %v6238_v35 = vpop.permute.xlu1 %6237 }
0x42bf   : > { %7661 = vmatpush3.msra.mxu0 %v6240_v34  ;;  %v6486_v34 = vld [vmem:[%s9651_s5 + $0x88] sm:$0xff] }
0x42c0   : > { %7662 = vmatprep.subr.mxu0 %v6238_v35 }
0x42c1   : > { %7663 = vmatpush3.msra.mxu0 %v6238_v35  ;;  %v6482_v35 = vld [vmem:[%s9651_s5 + $0x68] sm:$0xff] }
0x42c2   : > { %7678 = vmatprep.subr.mxu0 %v6492_v1 }
0x437a   : > { %v7655_v51 = vpop.f32.mrf.mxu0 }
0x437c   : > { %v6190_v2 = vpop.f32.mrf.mxu0 }
0x437d   : > { %6217 = vrot.lane.b32.xlu0 %v6190_v2, %s9648_s16  ;;  %v6480_v2 = vld [vmem:[%s9651_s5 + $0x58] sm:$0xff] }
0x4381   : > { %6219 = vrot.lane.b32.xlu0 %v7655_v51, %s9648_s16  ;;  %v6481_v51 = vld [vmem:[%s9651_s5 + $0x60] sm:$0xff] }
0x43ef   : > { %v6218_v53 = vpop.permute.xlu0 %6217 }
0x43f0   : > { %v6227_v37 = vsel %vm1370_vm9, %v6225_v58, %v6218_v53  ;;  %v6477_v58 = vld [vmem:[%s9651_s5 + $0x40] sm:$0xff]  ;;  %v6377_v53 = vrot.slane %v9303_v17, %v8395_v38 }
0x43f1   : > { %7664 = vmatprep.mubr.msk.f32.mxu0 %vm610_vm3, %v6227_v37 }
0x43f3   : > { %v6220_v6 = vpop.permute.xlu0 %6219 }
0x43f4   : > { %v6228_v7 = vsel %vm1370_vm9, %v6226_v5, %v6220_v6 }
0x43f5   : > { %7665 = vmatmul.mubr.msk.f32.vlgmr.msra.gmra.mxu0 %vm610_vm3, %v6228_v7 }
0x43f6   : > { %7679 = vmatpush3.msra.mxu0 %v6492_v1 }
0x43f7   : > { %7680 = vmatprep.subr.mxu0 %v6491_v36 }
0x43f8   : > { %7681 = vmatpush3.msra.mxu0 %v6491_v36  ;;  %v6859_v36 = vld [vmem:[%s9650_s0] ss:$0 sm:$0xff] }
0x43f9   : > { %7682 = vmatprep.subr.mxu0 %v6490_v41 }
0x43fa   : > { %7683 = vmatpush3.msra.mxu0 %v6490_v41 }
0x43fb   : > { %7684 = vmatprep.subr.mxu0 %v6489_v62 }
0x43fc   : > { %7685 = vmatpush3.msra.mxu0 %v6489_v62 }
0x43fd   : > { %7686 = vmatprep.subr.mxu0 %v6488_v63 }
0x43fe   : > { %7687 = vmatpush3.msra.mxu0 %v6488_v63  ;;  %v6860_v63 = vld [vmem:[%s9650_s0 + $0x1] ss:$0 sm:$0xff] }
0x43ff   : > { %7688 = vmatprep.subr.mxu0 %v6487_v0 }
0x4400   : > { %7689 = vmatpush3.msra.mxu0 %v6487_v0 }
0x4401   : > { %7690 = vmatprep.subr.mxu0 %v6486_v34 }
0x4402   : > { %7691 = vmatpush3.msra.mxu0 %v6486_v34 }
0x4403   : > { %7692 = vmatprep.subr.mxu0 %v6485_v57 }
0x4404   : > { %7693 = vmatpush3.msra.mxu0 %v6485_v57 }
0x4405   : > { %7694 = vmatprep.subr.mxu0 %v6484_v33 }
0x4406   : > { %7695 = vmatpush3.msra.mxu0 %v6484_v33 }
0x4407   : > { %7696 = vmatprep.subr.mxu0 %v6483_v26 }
0x4408   : > { %7697 = vmatpush3.msra.mxu0 %v6483_v26 }
0x4409   : > { %7698 = vmatprep.subr.mxu0 %v6482_v35 }
0x440a   : > { %7699 = vmatpush3.msra.mxu0 %v6482_v35 }
0x440b   : > { %7700 = vmatprep.subr.mxu0 %v6481_v51 }
0x440c   : > { %7701 = vmatpush3.msra.mxu0 %v6481_v51 }
0x440d   : > { %7702 = vmatprep.subr.mxu0 %v6480_v2 }
0x440e   : > { %7703 = vmatpush3.msra.mxu0 %v6480_v2 }
0x440f   : > { %7704 = vmatprep.subr.mxu0 %v6479_v3 }
0x4410   : > { %7705 = vmatpush3.msra.mxu0 %v6479_v3 }
0x4411   : > { %7706 = vmatprep.subr.mxu0 %v6478_v4 }
0x4412   : > { %7707 = vmatpush3.msra.mxu0 %v6478_v4 }
0x4413   : > { %7708 = vmatprep.subr.mxu0 %v6477_v58 }
0x4414   : > { %7709 = vmatpush3.msra.mxu0 %v6477_v58 }
0x44b5   : > { %v7666_v14 = vpop.f32.mrf.mxu0 }
0x44b6   : > { %v6327_v15 = vadd.f32 %v7666_v14, %v6232_v20 }
0x44b7   : > { %v6321_v49 = vpop.f32.mrf.mxu0 }
0x44b8   : > { %v9456_v16 = vadd.f32 %v6327_v15, %v9257_v19  ;;  %v6322_v28 = vadd.f32 %v6321_v49, %v6232_v20 }
0x44ba   : > { %v9459_v29 = vadd.f32 %v6322_v28, %v9264_v43  ;;  %v6335_v39 = vsel %vm5262_vm0, %v9456_v16, 0.0 }
0x44bb   : > { %6336 = vadd.xlane.f32.xlu0 %v6335_v39 }
0x44bc   : > { %v6332_v9 = vsel %vm610_vm3, %v9459_v29, 0.0 }
0x44bd   : > { %6333 = vadd.xlane.f32.xlu1 %v6332_v9 }
0x4544   : > { %v6337_v21 = vpop.xlane.xlu0 %6336 }
0x4545   : > { %v6339_v40 = vmul.f32 0.03125, %v6337_v21 }
0x4546   : > { %v6334_v23 = vpop.xlane.xlu1 %6333 }
0x4547   : > { %v6341_v24 = vsub.f32 %v9456_v16, %v6339_v40  ;;  %v6338_v25 = vmul.f32 0.03125, %v6334_v23 }
0x4549   : > { %v6340_v19 = vsub.f32 %v9459_v29, %v6338_v25  ;;  %v6343_v27 = vmul.f32 %v6341_v24, %v6341_v24 }
0x454b   : > { %v6347_v43 = vsel %vm5262_vm0, %v6343_v27, 0.0  ;;  %v6342_v31 = vmul.f32 %v6340_v19, %v6340_v19 }
0x454c   : > { %6348 = vadd.xlane.f32.xlu1 %v6347_v43 }
0x454d   : > { %v6344_v32 = vsel %vm610_vm3, %v6342_v31, 0.0 }
0x454e   : > { %6345 = vadd.xlane.f32.xlu0 %v6344_v32  ;;  %v6496_v32 = vrot.slane %v9303_v17, %v8402_v18 }
0x45d5   : > { %v6349_v48 = vpop.xlane.xlu1 %6348 }
0x45d6   : > { %v6351_v55 = vmul.f32 0.03125, %v6349_v48 }
0x45d7   : > { %v6346_v52 = vpop.xlane.xlu0 %6345 }
0x45d8   : > { %v6353_v54 = vadd.f32 1e-12, %v6351_v55  ;;  %v6350_v56 = vmul.f32 0.03125, %v6346_v52 }
0x45da   : > { %7869 = vrsqrt.f32 %v6353_v54  ;;  %v6352_v59 = vadd.f32 1e-12, %v6350_v56 }
0x45dc   : > { %7871 = vrsqrt.f32 %v6352_v59 }
0x45e7   : > { %v7870_v60 = vpop.eup %7869 }
0x45e8   : > { %v6357_v61 = vmul.f32 %v7870_v60, %v6341_v24 }
0x45e9   : > { %v7872_v45 = vpop.eup %7871 }
0x45ea   : > { %v6356_v10 = vmul.f32 %v7872_v45, %v6340_v19  ;;  %v6363_v46 = vmul.f32 %v6361_v47, %v6357_v61 }
0x45ec   : > { %v6362_v30 = vmul.f32 %v6361_v47, %v6356_v10  ;;  %v6369_v12 = vadd.f32 %v6367_v50, %v6363_v46 }
0x45ee   : > { %v6368_v11 = vadd.f32 %v6367_v50, %v6362_v30 }
0x45f0   : > { %7675 = vmatprep.mubr.msk.f32.mxu1 %vm610_vm3, %v6368_v11 }
0x45f1   : > { %7676 = vmatmul.mubr.msk.f32.vlgmr.msra.gmra.mxu1 %vm610_vm3, %v6369_v12 }
0x46b1   : > { %v7677_v37 = vpop.f32.mrf.mxu1 }
0x46b2   : > { %v6456_v22 = vadd.f32 %v7677_v37, %v6377_v53 }
0x46b3   : > { %v6450_v5 = vpop.f32.mrf.mxu1 }
0x46b4   : > { %v6462_v6 = vmul.f32 0.044715, %v6456_v22  ;;  %v6451_v7 = vadd.f32 %v6450_v5, %v6377_v53  ;;  %v6460_v27 = vmul.f32 0.5, %v6456_v22 }
0x46b6   : > { %v6464_v20 = vmul.f32 %v6462_v6, %v6456_v22  ;;  %v6461_v14 = vmul.f32 0.044715, %v6451_v7  ;;  %v6459_v38 = vmul.f32 0.5, %v6451_v7 }
0x46b8   : > { %v6466_v15 = vmul.f32 %v6464_v20, %v6456_v22  ;;  %v6463_v49 = vmul.f32 %v6461_v14, %v6451_v7 }
0x46ba   : > { %v6468_v28 = vadd.f32 %v6466_v15, %v6456_v22  ;;  %v6465_v39 = vmul.f32 %v6463_v49, %v6451_v7 }
0x46bc   : > { %v6467_v9 = vadd.f32 %v6465_v39, %v6451_v7  ;;  %v6470_v21 = vmul.f32 0.7978846, %v6468_v28 }
0x46be   : > { %v6469_v40 = vmul.f32 0.7978846, %v6467_v9  ;;  %7873 = vtanh.f32 %v6470_v21 }
0x46c0   : > { %7875 = vtanh.f32 %v6469_v40 }
0x46cb   : > { %v7874_v23 = vpop.eup %7873 }
0x46cc   : > { %v6474_v25 = vadd.f32 1.0, %v7874_v23 }
0x46cd   : > { %v7876_v24 = vpop.eup %7875 }
0x46ce   : > { %v6473_v19 = vadd.f32 1.0, %v7876_v24  ;;  %v6476_v31 = vmul.f32 %v6474_v25, %v6460_v27 }
0x46d0   : > { %v6475_v43 = vmul.f32 %v6473_v19, %v6459_v38 }
0x46d2   : > { %7710 = vmatprep.mubr.f32.mxu0 %v6475_v43 }
0x46d3   : > { %7711 = vmatmul.mubr.f32.vlgmr.msra.gmra.mxu0 %v6476_v31 }
0x4793   : > { %v7712_v8 = vpop.f32.mrf.mxu0 }
0x4794   : > { %v6569_v44 = vadd.f32 %v7712_v8, %v6496_v32 }
0x4795   : > { %v6563_v13 = vpop.f32.mrf.mxu0 }
0x4796   : > { %v6573_v42 = vadd.f32 %v6569_v44, %v9456_v16  ;;  %v6564_v48 = vadd.f32 %v6563_v13, %v6496_v32 }
0x4798   : > { %v6572_v55 = vadd.f32 %v6564_v48, %v9459_v29  ;;  %v6579_v52 = vsel %vm5262_vm0, %v6573_v42, 0.0 }
0x4799   : > { %6580 = vadd.xlane.f32.xlu1 %v6579_v52 }
0x479a   : > { %v6576_v54 = vsel %vm610_vm3, %v6572_v55, 0.0 }
0x479b   : > { %6577 = vadd.xlane.f32.xlu0 %v6576_v54 }
0x4822   : > { %v6581_v56 = vpop.xlane.xlu1 %6580 }
0x4823   : > { %v6583_v59 = vmul.f32 0.03125, %v6581_v56 }
0x4824   : > { %v6578_v60 = vpop.xlane.xlu0 %6577 }
0x4825   : > { %v6585_v47 = vsub.f32 %v6573_v42, %v6583_v59  ;;  %v6582_v61 = vmul.f32 0.03125, %v6578_v60 }
0x4827   : > { %v6584_v18 = vsub.f32 %v6572_v55, %v6582_v61  ;;  %v6587_v17 = vmul.f32 %v6585_v47, %v6585_v47 }
0x4829   : > { %v6591_v45 = vsel %vm5262_vm0, %v6587_v17, 0.0  ;;  %v6586_v10 = vmul.f32 %v6584_v18, %v6584_v18 }
0x482a   : > { %6592 = vadd.xlane.f32.xlu1 %v6591_v45 }
0x482b   : > { %v6588_v16 = vsel %vm610_vm3, %v6586_v10, 0.0 }
0x482c   : > { %6589 = vadd.xlane.f32.xlu0 %v6588_v16 }
0x48b3   : > { %v6593_v29 = vpop.xlane.xlu1 %6592 }
0x48b4   : > { %v6595_v46 = vmul.f32 0.03125, %v6593_v29 }
0x48b5   : > { %v6590_v50 = vpop.xlane.xlu0 %6589 }
0x48b6   : > { %v6597_v30 = vadd.f32 1e-12, %v6595_v46  ;;  %v6594_v11 = vmul.f32 0.03125, %v6590_v50 }
0x48b8   : > { %7877 = vrsqrt.f32 %v6597_v30  ;;  %v6596_v12 = vadd.f32 1e-12, %v6594_v11 }
0x48ba   : > { %7879 = vrsqrt.f32 %v6596_v12 }
0x48c5   : > { %v7878_v1 = vpop.eup %7877 }
0x48c6   : > { %v6601_v41 = vmul.f32 %v7878_v1, %v6585_v47 }
0x48c7   : > { %v7880_v62 = vpop.eup %7879 }
0x48c8   : > { %v6607_v0 = vmul.f32 %v6859_v36, %v6601_v41  ;;  %v6600_v34 = vmul.f32 %v7880_v62, %v6584_v18 }
0x48ca   : > { %v6613_v57 = vadd.f32 %v6860_v63, %v6607_v0  ;;  %v6606_v33 = vmul.f32 %v6859_v36, %v6600_v34 }
0x48cc   : > { %6615 = vst.msk [vmem:[%s474_s11 + $0x8] sm:$0x3f] %vm5262_vm0, %v6613_v57  ;;  %v6612_v26 = vadd.f32 %v6860_v63, %v6606_v33 }
0x48ce   : > { %6614 = vst.msk [vmem:[%s474_s11] sm:$0xff] %vm610_vm3, %v6612_v26 }
0x48cf PF: > { %s9656_s15 = sld [smem:[#allocation5_spill]] }
0x48d5   : > { %s31_s23 = sadd.s32 1, %s9656_s15  }
0x48d6   : > { %p28_p9 = scmp.ge.s32.totalorder %s31_s23, 4  }
0x48d8   :  { %30 = sbr.rel (!%p28_p9) target bundleno = 18 (0x12), region = 118 }

</bundles_post_ra>
